<compile_context>
chip_gen: v6e
topology: v6e:2x2x1
jax: 0.10.0
libtpu: 0.0.40
codegen_flags: <defaults>
</compile_context>

<pallas_src>
import jax
import jax.numpy as jnp
from jax import lax
from jax.experimental import pallas as pl
from jax.experimental.pallas import tpu as pltpu

LATENT = 32       # latent input width (arch_dict unknown; documented assumption)
HIDDEN = 64
C1 = 16           # channels after View((2,2))
BATCH = 2
IMG_SIZE = 32


# --------------------------------- kernel ------------------------------------
def _decoder_kernel(x_ref,
                    fc1_w, fc1_b, fc2_w, fc2_b,
                    uc1_w, uc1_b,
                    su2_w, su2_b, su2_m,
                    uc2_w, uc2_b,
                    su3_w, su3_b, su3_m,
                    uc3_w, uc3_b,
                    su4_w, su4_b, su4_m,
                    uc4_w, uc4_b,
                    lc5_m, lc5_w, lc5_b,
                    uc5_w, uc5_b,
                    out_ref):
    f32, bf16 = jnp.float32, jnp.bfloat16
    B = out_ref.shape[0]

    def pad_rows(fm, h, pad):
        """Per-sample zero-row padding via concat (no matmul): (B*h, L) -> bf16 (B*(h+2p), L)."""
        xb = fm.astype(bf16)
        z = jnp.zeros((pad, fm.shape[1]), bf16)
        parts = []
        for s in range(B):
            parts += [z, xb[s * h:(s + 1) * h], z]
        return jnp.concatenate(parts, axis=0)

    def band_conv(xp, w_ref, b_ref, k, h_out, hp, relu):
        """Fused banded conv: ONE MXU matmul (k row-tap banks concatenated along the
        output lanes), then k sublane-shifted column-block adds on the VPU."""
        y = jnp.dot(xp, w_ref[...], preferred_element_type=f32)      # (B*hp, k*L)
        L = w_ref.shape[1] // k
        outs = []
        for s in range(B):
            acc = y[s * hp: s * hp + h_out, 0:L]
            for kh in range(1, k):
                acc = acc + y[s * hp + kh: s * hp + kh + h_out,
                              kh * L:(kh + 1) * L]
            outs.append(acc)
        out = jnp.concatenate(outs, axis=0) + b_ref[...]
        return jnp.maximum(out, 0.0) if relu else out

    def scale_up(fm, w_ref, b_ref, m_ref):
        """ConvTranspose2d(k=2, s=2, p=0) + ReLU, plus the row interleave AND the
        zero-row padding of the following 3x3 conv, in two MXU ops total.
        Returns the padded bf16 LHS for the next band_conv."""
        y = jnp.dot(fm.astype(bf16), w_ref[...], preferred_element_type=f32)
        y = jnp.maximum(y + b_ref[...], 0.0)                          # [even | odd] blocks
        L = y.shape[1] // 2
        g = jnp.concatenate([y[:, :L], y[:, L:]], axis=0).astype(bf16)
        # 0/1 bf16 row-scatter (exact): interleave even/odd rows + per-sample pad rows
        return jnp.dot(m_ref[...], g, preferred_element_type=f32).astype(bf16)

    # linear_layers: Linear(32,64)+ReLU, Linear(64,64)+ReLU (View permutation folded
    # into fc2's columns on the host).
    x = x_ref[...]                                                    # (B, LATENT)
    h = jnp.maximum(jnp.dot(x.astype(bf16), fc1_w[...],
                            preferred_element_type=f32) + fc1_b[...], 0.0)
    h = jnp.maximum(jnp.dot(h.astype(bf16), fc2_w[...],
                            preferred_element_type=f32) + fc2_b[...], 0.0)

    # scale_up_1 = blocks.View((2,2)): (B, 64) -> (B*2, 2*C1), rows [s0r0,s0r1,s1r0,...]
    rows = []
    for s in range(B):
        rows += [h[s:s + 1, :2 * C1], h[s:s + 1, 2 * C1:]]
    fm = jnp.concatenate(rows, axis=0)                                # (B*2, 32)

    fm = band_conv(pad_rows(fm, 2, 1), uc1_w, uc1_b, 3, 2, 4, True)   # (B*2, 32)   2x2x16
    xp = scale_up(fm, su2_w, su2_b, su2_m)                            # (B*6, 64)   padded 4x4x16
    fm = band_conv(xp, uc2_w, uc2_b, 3, 4, 6, True)                   # (B*4, 32)   4x4x8
    xp = scale_up(fm, su3_w, su3_b, su3_m)                            # (B*10, 64)  padded 8x8x8
    fm = band_conv(xp, uc3_w, uc3_b, 3, 8, 10, True)                  # (B*8, 64)   8x8x8
    xp = scale_up(fm, su4_w, su4_b, su4_m)                            # (B*18, 128) padded 16x16x8
    fm = band_conv(xp, uc4_w, uc4_b, 3, 16, 18, True)                 # (B*16, 128) 16x16x8

    # scale_up_5 = LastConv: ConvTranspose2d(k=5, s=2, p=2, output_padding=1) + ReLU.
    # Width dilation is folded into lc5_w on the host; the height dilation + padding
    # is a single 0/1 bf16 row-scatter matmul.
    # TODO(synk): blocks.LastConv's activation is unknown; ReLU assumed (like ScaleUp).
    xp = jnp.dot(lc5_m[...], fm.astype(bf16),
                 preferred_element_type=f32).astype(bf16)             # (B*36, 128)
    fm = band_conv(xp, lc5_w, lc5_b, 5, 32, 36, True)                 # (B*32, 256) 32x32x8

    # unconv_5: Conv2d 3x3, 8 -> 1.  TODO(synk): output activation unknown; left linear.
    img = band_conv(pad_rows(fm, 32, 1), uc5_w, uc5_b, 3, 32, 34, False)  # (B*32, 32)

    out_ref[...] = img.reshape(B, IMG_SIZE, IMG_SIZE)


# --------------------------- host-side preparation ----------------------------
def init_params(key):
    """PyTorch-convention parameters (Linear (out,in); Conv2d (Cout,Cin,k,k);
    ConvTranspose2d (Cin,Cout,k,k))."""
    ks = list(jax.random.split(key, 22))
    it = iter(ks)

    def w(shape, fan):
        return jax.random.normal(next(it), shape, jnp.float32) * (fan ** -0.5)

    def b(n):
        return jax.random.normal(next(it), (n,), jnp.float32) * 0.05

    p = {}
    p['fc1_w'] = w((HIDDEN, LATENT), LATENT);        p['fc1_b'] = b(HIDDEN)
    p['fc2_w'] = w((C1 * 4, HIDDEN), HIDDEN);        p['fc2_b'] = b(C1 * 4)
    p['uc1_w'] = w((16, 16, 3, 3), 16 * 9);          p['uc1_b'] = b(16)
    p['su2_w'] = w((16, 16, 2, 2), 16 * 4);          p['su2_b'] = b(16)
    p['uc2_w'] = w((8, 16, 3, 3), 16 * 9);           p['uc2_b'] = b(8)
    p['su3_w'] = w((8, 8, 2, 2), 8 * 4);             p['su3_b'] = b(8)
    p['uc3_w'] = w((8, 8, 3, 3), 8 * 9);             p['uc3_b'] = b(8)
    p['su4_w'] = w((8, 8, 2, 2), 8 * 4);             p['su4_b'] = b(8)
    p['uc4_w'] = w((8, 8, 3, 3), 8 * 9);             p['uc4_b'] = b(8)
    p['lc5_w'] = w((8, 8, 5, 5), 8 * 25);            p['lc5_b'] = b(8)
    p['uc5_w'] = w((1, 8, 3, 3), 8 * 9);             p['uc5_b'] = b(1)
    return p


def prepare_ops(p, batch):
    """Fold PyTorch params into the fused kernel's operand layouts: fused banded block
    weights (bf16) over the (rows=batch*H, lanes=W*C) layout, bf16 0/1 row-scatter
    matrices (interleave/dilate + per-sample pad), and width-tiled f32 biases."""
    f32, bf16 = jnp.float32, jnp.bfloat16

    def conv_taps(w):                  # Conv2d (Cout,Cin,kh,kw) -> correlation taps (kh,kw,Cin,Cout)
        return jnp.transpose(w, (2, 3, 1, 0))

    def convT_taps(w):                 # ConvTranspose2d (Cin,Cout,kh,kw) -> flipped correlation taps
        return jnp.transpose(w[:, :, ::-1, ::-1], (2, 3, 0, 1))

    def band_mats(taps, wb, pad):      # k banded block matrices (wb*Cin, wb*Cout), f32
        k = taps.shape[0]
        cin, cout = taps.shape[2], taps.shape[3]
        mats = []
        for kh in range(k):
            m = jnp.zeros((wb * cin, wb * cout), f32)
            for kw in range(k):
                m = m + jnp.kron(jnp.eye(wb, wb, k=pad - kw, dtype=f32), taps[kh, kw])
            mats.append(m)
        return mats

    def fuse(mats):                    # concat the k row-tap banks along output lanes
        return jnp.concatenate(mats, axis=1).astype(bf16)

    def expand_cols(wb, dw):           # (wb, 2wb) 0/1: width w -> width 2w+dw
        return jnp.zeros((wb, 2 * wb), f32).at[jnp.arange(wb),
                                               2 * jnp.arange(wb) + dw].set(1.0)

    def scaleup_fused(w, wb):          # ConvTranspose2d (Cin,Cout,2,2), s=2 -> (wb*Cin, 2*2wb*Cout) [even|odd]
        cin, cout = w.shape[0], w.shape[1]
        mats = []
        for dh in range(2):
            m = jnp.zeros((wb * cin, 2 * wb * cout), f32)
            for dw in range(2):
                m = m + jnp.kron(expand_cols(wb, dw), w[:, :, dh, dw])
            mats.append(m)
        return jnp.concatenate(mats, axis=1).astype(bf16)

    def scatter_pad(h, pad):           # interleave [Ye;Yo] rows + per-sample zero-row pad, bf16 0/1
        rows_out, rows_in = batch * (2 * h + 2 * pad), 2 * batch * h
        oi, ii = [], []
        for s in range(batch):
            base = s * (2 * h + 2 * pad)
            for t in range(h):
                oi += [base + pad + 2 * t, base + pad + 2 * t + 1]
                ii += [s * h + t, batch * h + s * h + t]
        m = jnp.zeros((rows_out, rows_in), f32)
        m = m.at[jnp.array(oi), jnp.array(ii)].set(1.0)
        return m.astype(bf16)

    def dilate_pad(h, pad):            # stride-2 row dilation + per-sample zero-row pad (LastConv)
        rows_out, rows_in = batch * (2 * h + 2 * pad), batch * h
        oi, ii = [], []
        for s in range(batch):
            base = s * (2 * h + 2 * pad)
            for t in range(h):
                oi.append(base + pad + 2 * t)
                ii.append(s * h + t)
        m = jnp.zeros((rows_out, rows_in), f32)
        m = m.at[jnp.array(oi), jnp.array(ii)].set(1.0)
        return m.astype(bf16)

    def btile(b, reps):                # (1, reps*Cout) width-tiled bias
        return jnp.tile(b.astype(f32), reps).reshape(1, -1)

    def btile2(b, reps):               # scale-up bias for the fused [even|odd] layout
        t = jnp.tile(b.astype(f32), reps)
        return jnp.concatenate([t, t]).reshape(1, -1)

    # fc2: fold View((2,2))'s NCHW -> (row, W*C) permutation into the weight columns.
    perm = jnp.array([c * 4 + hh * 2 + ww
                      for hh in range(2) for ww in range(2) for c in range(C1)],
                     dtype=jnp.int32)
    fc2_w = p['fc2_w'].T[:, perm].astype(bf16)
    fc2_b = p['fc2_b'][perm].reshape(1, -1).astype(f32)

    # LastConv: fold the stride-2 WIDTH dilation directly into the band weights
    # (halves K of the dominant matmul and removes an in-kernel f32 matmul).
    lc5_q = jnp.kron(expand_cols(16, 0), jnp.eye(8, dtype=f32))            # (128, 256)
    lc5_w = fuse([lc5_q @ m for m in band_mats(convT_taps(p['lc5_w']), 32, 2)])

    ops = (
        p['fc1_w'].T.astype(bf16), p['fc1_b'].reshape(1, -1).astype(f32),
        fc2_w, fc2_b,
        fuse(band_mats(conv_taps(p['uc1_w']), 2, 1)),  btile(p['uc1_b'], 2),
        scaleup_fused(p['su2_w'], 2),  btile2(p['su2_b'], 4),  scatter_pad(2, 1),
        fuse(band_mats(conv_taps(p['uc2_w']), 4, 1)),  btile(p['uc2_b'], 4),
        scaleup_fused(p['su3_w'], 4),  btile2(p['su3_b'], 8),  scatter_pad(4, 1),
        fuse(band_mats(conv_taps(p['uc3_w']), 8, 1)),  btile(p['uc3_b'], 8),
        scaleup_fused(p['su4_w'], 8),  btile2(p['su4_b'], 16), scatter_pad(8, 1),
        fuse(band_mats(conv_taps(p['uc4_w']), 16, 1)), btile(p['uc4_b'], 16),
        dilate_pad(16, 2),
        lc5_w, btile(p['lc5_b'], 32),
        fuse(band_mats(conv_taps(p['uc5_w']), 32, 1)), btile(p['uc5_b'], 32),
    )
    return ops


# ------------------------------ pallas_call wrapper ---------------------------
def make_forward(batch):
    def fwd(x, ops):
        # Single invocation, no grid: all operands (<1 MB) + activations fit VMEM
        # easily on v5e/v6e/v7x; both batch samples are folded into the row dim.
        return pl.pallas_call(
            _decoder_kernel,
            out_shape=jax.ShapeDtypeStruct((batch, IMG_SIZE, IMG_SIZE), jnp.float32),
        )(x, *ops)
    return jax.jit(fwd)


# ------------------------------ pure-JAX reference ----------------------------
def reference_forward(x, p):
    """Pure-JAX/XLA reference with PyTorch NCHW semantics (no Pallas)."""
    relu = jax.nn.relu

    def conv(h, w, b, pad):
        y = lax.conv_general_dilated(h, w, (1, 1), [(pad, pad), (pad, pad)],
                                     dimension_numbers=('NCHW', 'OIHW', 'NCHW'))
        return y + b.reshape(1, -1, 1, 1)

    def convT(h, w, b, stride, pad, out_pad):
        k = w.shape[-1]
        wf = jnp.transpose(w[:, :, ::-1, ::-1], (1, 0, 2, 3))
        lo, hi = k - 1 - pad, k - 1 - pad + out_pad
        y = lax.conv_general_dilated(h, wf, (1, 1), [(lo, hi), (lo, hi)],
                                     lhs_dilation=(stride, stride),
                                     dimension_numbers=('NCHW', 'OIHW', 'NCHW'))
        return y + b.reshape(1, -1, 1, 1)

    h = relu(x @ p['fc1_w'].T + p['fc1_b'])
    h = relu(h @ p['fc2_w'].T + p['fc2_b'])
    h = h.reshape(x.shape[0], C1, 2, 2)                     # blocks.View((2, 2))
    h = relu(conv(h, p['uc1_w'], p['uc1_b'], 1))
    h = relu(convT(h, p['su2_w'], p['su2_b'], 2, 0, 0))     # ScaleUp -> (4, 4)
    h = relu(conv(h, p['uc2_w'], p['uc2_b'], 1))
    h = relu(convT(h, p['su3_w'], p['su3_b'], 2, 0, 0))     # ScaleUp -> (8, 8)
    h = relu(conv(h, p['uc3_w'], p['uc3_b'], 1))
    h = relu(convT(h, p['su4_w'], p['su4_b'], 2, 0, 0))     # ScaleUp -> (16, 16)
    h = relu(conv(h, p['uc4_w'], p['uc4_b'], 1))
    h = relu(convT(h, p['lc5_w'], p['lc5_b'], 2, 2, 1))     # LastConv -> (32, 32)
    h = conv(h, p['uc5_w'], p['uc5_b'], 1)                  # unconv_5, linear output
    return h[:, 0, :, :]                                    # squeeze(dim=1)


# --------------------------------- main ---------------------------------------
if __name__ == "__main__":
    key = jax.random.PRNGKey(0)
    kx, kp = jax.random.split(key)
    x = jax.random.normal(kx, (BATCH, LATENT), dtype=jnp.float32)
    params = init_params(kp)
    ops = prepare_ops(params, BATCH)

    fwd = make_forward(BATCH)
    out = jax.block_until_ready(fwd(x, ops))

    assert out.shape == (BATCH, IMG_SIZE, IMG_SIZE), out.shape
    assert out.dtype == jnp.float32
    assert bool(jnp.all(jnp.isfinite(out)))

    # Cross-check against a pure-JAX reference (kernel uses bf16 MXU operands,
    # f32 accumulation -> small rounding differences expected).
    ref = jax.block_until_ready(jax.jit(reference_forward)(x, params))
    err = float(jnp.max(jnp.abs(out - ref)))
    scale = float(jnp.max(jnp.abs(ref))) + 1e-6
    assert err <= 0.08 * scale + 1e-4, (
        f"kernel/reference mismatch: max|diff|={err:.4e}, max|ref|={scale:.4e}")

    print("KERNEL_OK")
</pallas_src>

<mosaic_0001>
module attributes {stable_mosaic.version = 11 : i64} {
  func.func @_decoder_kernel(%arg0: memref<2x32xf32, #tpu.memory_space<vmem>>, %arg1: memref<32x64xbf16, #tpu.memory_space<vmem>>, %arg2: memref<1x64xf32, #tpu.memory_space<vmem>>, %arg3: memref<64x64xbf16, #tpu.memory_space<vmem>>, %arg4: memref<1x64xf32, #tpu.memory_space<vmem>>, %arg5: memref<32x96xbf16, #tpu.memory_space<vmem>>, %arg6: memref<1x32xf32, #tpu.memory_space<vmem>>, %arg7: memref<32x128xbf16, #tpu.memory_space<vmem>>, %arg8: memref<1x128xf32, #tpu.memory_space<vmem>>, %arg9: memref<12x8xbf16, #tpu.memory_space<vmem>>, %arg10: memref<64x96xbf16, #tpu.memory_space<vmem>>, %arg11: memref<1x32xf32, #tpu.memory_space<vmem>>, %arg12: memref<32x128xbf16, #tpu.memory_space<vmem>>, %arg13: memref<1x128xf32, #tpu.memory_space<vmem>>, %arg14: memref<20x16xbf16, #tpu.memory_space<vmem>>, %arg15: memref<64x192xbf16, #tpu.memory_space<vmem>>, %arg16: memref<1x64xf32, #tpu.memory_space<vmem>>, %arg17: memref<64x256xbf16, #tpu.memory_space<vmem>>, %arg18: memref<1x256xf32, #tpu.memory_space<vmem>>, %arg19: memref<36x32xbf16, #tpu.memory_space<vmem>>, %arg20: memref<128x384xbf16, #tpu.memory_space<vmem>>, %arg21: memref<1x128xf32, #tpu.memory_space<vmem>>, %arg22: memref<72x32xbf16, #tpu.memory_space<vmem>>, %arg23: memref<128x1280xbf16, #tpu.memory_space<vmem>>, %arg24: memref<1x256xf32, #tpu.memory_space<vmem>>, %arg25: memref<256x96xbf16, #tpu.memory_space<vmem>>, %arg26: memref<1x32xf32, #tpu.memory_space<vmem>>, %arg27: memref<2x32x32xf32, #tpu.memory_space<vmem>>) attributes {dimension_semantics = [], scalar_prefetch = 0 : i64, scratch_operands = 0 : i64, tpu.core_type = #tpu.core_type<tc>} {
    %c0 = arith.constant 0 : index
    %c0_0 = arith.constant 0 : index
    %0 = vector.load %arg0[%c0, %c0_0] : memref<2x32xf32, #tpu.memory_space<vmem>>, vector<2x32xf32>
    %1 = arith.truncf %0 : vector<2x32xf32> to vector<2x32xbf16>
    %c0_1 = arith.constant 0 : index
    %c0_2 = arith.constant 0 : index
    %2 = vector.load %arg1[%c0_1, %c0_2] : memref<32x64xbf16, #tpu.memory_space<vmem>>, vector<32x64xbf16>
    %cst = arith.constant dense<0.000000e+00> : vector<2x64xf32>
    %3 = tpu.matmul %1, %2, %cst {dimension_numbers = #tpu.dot_dimension_numbers<[1], [0], [0], [1], [0, 0, 1, 1], [], []>} : vector<2x32xbf16>, vector<32x64xbf16>, vector<2x64xf32> -> vector<2x64xf32>
    %c0_3 = arith.constant 0 : index
    %c0_4 = arith.constant 0 : index
    %4 = vector.load %arg2[%c0_3, %c0_4] : memref<1x64xf32, #tpu.memory_space<vmem>>, vector<1x64xf32>
    %5 = vector.broadcast %4 : vector<1x64xf32> to vector<2x64xf32>
    %6 = arith.addf %3, %5 : vector<2x64xf32>
    %cst_5 = arith.constant 0.000000e+00 : f32
    %7 = vector.broadcast %cst_5 : f32 to vector<2x64xf32>
    %8 = arith.maximumf %6, %7 : vector<2x64xf32>
    %9 = arith.truncf %8 : vector<2x64xf32> to vector<2x64xbf16>
    %c0_6 = arith.constant 0 : index
    %c0_7 = arith.constant 0 : index
    %10 = vector.load %arg3[%c0_6, %c0_7] : memref<64x64xbf16, #tpu.memory_space<vmem>>, vector<64x64xbf16>
    %cst_8 = arith.constant dense<0.000000e+00> : vector<2x64xf32>
    %11 = tpu.matmul %9, %10, %cst_8 {dimension_numbers = #tpu.dot_dimension_numbers<[1], [0], [0], [1], [0, 0, 1, 1], [], []>} : vector<2x64xbf16>, vector<64x64xbf16>, vector<2x64xf32> -> vector<2x64xf32>
    %c0_9 = arith.constant 0 : index
    %c0_10 = arith.constant 0 : index
    %12 = vector.load %arg4[%c0_9, %c0_10] : memref<1x64xf32, #tpu.memory_space<vmem>>, vector<1x64xf32>
    %13 = vector.broadcast %12 : vector<1x64xf32> to vector<2x64xf32>
    %14 = arith.addf %11, %13 : vector<2x64xf32>
    %cst_11 = arith.constant 0.000000e+00 : f32
    %15 = vector.broadcast %cst_11 : f32 to vector<2x64xf32>
    %16 = arith.maximumf %14, %15 : vector<2x64xf32>
    %17 = vector.extract_strided_slice %16 {offsets = [0, 0], sizes = [1, 32], strides = [1, 1]} : vector<2x64xf32> to vector<1x32xf32>
    %18 = vector.extract_strided_slice %16 {offsets = [0, 32], sizes = [1, 32], strides = [1, 1]} : vector<2x64xf32> to vector<1x32xf32>
    %19 = vector.extract_strided_slice %16 {offsets = [1, 0], sizes = [1, 32], strides = [1, 1]} : vector<2x64xf32> to vector<1x32xf32>
    %20 = vector.extract_strided_slice %16 {offsets = [1, 32], sizes = [1, 32], strides = [1, 1]} : vector<2x64xf32> to vector<1x32xf32>
    %21 = tpu.concatenate %17, %18, %19, %20 in 0 : vector<1x32xf32>, vector<1x32xf32>, vector<1x32xf32>, vector<1x32xf32> -> vector<4x32xf32>
    %22 = arith.truncf %21 : vector<4x32xf32> to vector<4x32xbf16>
    %cst_12 = arith.constant 0.000000e+00 : bf16
    %23 = vector.broadcast %cst_12 : bf16 to vector<1x32xbf16>
    %24 = vector.extract_strided_slice %22 {offsets = [0, 0], sizes = [2, 32], strides = [1, 1]} : vector<4x32xbf16> to vector<2x32xbf16>
    %25 = vector.extract_strided_slice %22 {offsets = [2, 0], sizes = [2, 32], strides = [1, 1]} : vector<4x32xbf16> to vector<2x32xbf16>
    %26 = tpu.concatenate %23, %24, %23, %23, %25, %23 in 0 : vector<1x32xbf16>, vector<2x32xbf16>, vector<1x32xbf16>, vector<1x32xbf16>, vector<2x32xbf16>, vector<1x32xbf16> -> vector<8x32xbf16>
    %c0_13 = arith.constant 0 : index
    %c0_14 = arith.constant 0 : index
    %27 = vector.load %arg5[%c0_13, %c0_14] : memref<32x96xbf16, #tpu.memory_space<vmem>>, vector<32x96xbf16>
    %cst_15 = arith.constant dense<0.000000e+00> : vector<8x96xf32>
    %28 = tpu.matmul %26, %27, %cst_15 {dimension_numbers = #tpu.dot_dimension_numbers<[1], [0], [0], [1], [0, 0, 1, 1], [], []>} : vector<8x32xbf16>, vector<32x96xbf16>, vector<8x96xf32> -> vector<8x96xf32>
    %29 = vector.extract_strided_slice %28 {offsets = [0, 0], sizes = [2, 32], strides = [1, 1]} : vector<8x96xf32> to vector<2x32xf32>
    %30 = vector.extract_strided_slice %28 {offsets = [1, 32], sizes = [2, 32], strides = [1, 1]} : vector<8x96xf32> to vector<2x32xf32>
    %31 = arith.addf %29, %30 : vector<2x32xf32>
    %32 = vector.extract_strided_slice %28 {offsets = [2, 64], sizes = [2, 32], strides = [1, 1]} : vector<8x96xf32> to vector<2x32xf32>
    %33 = arith.addf %31, %32 : vector<2x32xf32>
    %34 = vector.extract_strided_slice %28 {offsets = [4, 0], sizes = [2, 32], strides = [1, 1]} : vector<8x96xf32> to vector<2x32xf32>
    %35 = vector.extract_strided_slice %28 {offsets = [5, 32], sizes = [2, 32], strides = [1, 1]} : vector<8x96xf32> to vector<2x32xf32>
    %36 = arith.addf %34, %35 : vector<2x32xf32>
    %37 = vector.extract_strided_slice %28 {offsets = [6, 64], sizes = [2, 32], strides = [1, 1]} : vector<8x96xf32> to vector<2x32xf32>
    %38 = arith.addf %36, %37 : vector<2x32xf32>
    %39 = tpu.concatenate %33, %38 in 0 : vector<2x32xf32>, vector<2x32xf32> -> vector<4x32xf32>
    %c0_16 = arith.constant 0 : index
    %c0_17 = arith.constant 0 : index
    %40 = vector.load %arg6[%c0_16, %c0_17] : memref<1x32xf32, #tpu.memory_space<vmem>>, vector<1x32xf32>
    %41 = vector.broadcast %40 : vector<1x32xf32> to vector<4x32xf32>
    %42 = arith.addf %39, %41 : vector<4x32xf32>
    %cst_18 = arith.constant 0.000000e+00 : f32
    %43 = vector.broadcast %cst_18 : f32 to vector<4x32xf32>
    %44 = arith.maximumf %42, %43 : vector<4x32xf32>
    %45 = arith.truncf %44 : vector<4x32xf32> to vector<4x32xbf16>
    %c0_19 = arith.constant 0 : index
    %c0_20 = arith.constant 0 : index
    %46 = vector.load %arg7[%c0_19, %c0_20] : memref<32x128xbf16, #tpu.memory_space<vmem>>, vector<32x128xbf16>
    %cst_21 = arith.constant dense<0.000000e+00> : vector<4x128xf32>
    %47 = tpu.matmul %45, %46, %cst_21 {dimension_numbers = #tpu.dot_dimension_numbers<[1], [0], [0], [1], [0, 0, 1, 1], [], []>} : vector<4x32xbf16>, vector<32x128xbf16>, vector<4x128xf32> -> vector<4x128xf32>
    %c0_22 = arith.constant 0 : index
    %c0_23 = arith.constant 0 : index
    %48 = vector.load %arg8[%c0_22, %c0_23] : memref<1x128xf32, #tpu.memory_space<vmem>>, vector<1x128xf32>
    %49 = vector.broadcast %48 : vector<1x128xf32> to vector<4x128xf32>
    %50 = arith.addf %47, %49 : vector<4x128xf32>
    %cst_24 = arith.constant 0.000000e+00 : f32
    %51 = vector.broadcast %cst_24 : f32 to vector<4x128xf32>
    %52 = arith.maximumf %50, %51 : vector<4x128xf32>
    %53 = vector.extract_strided_slice %52 {offsets = [0, 0], sizes = [4, 64], strides = [1, 1]} : vector<4x128xf32> to vector<4x64xf32>
    %54 = vector.extract_strided_slice %52 {offsets = [0, 64], sizes = [4, 64], strides = [1, 1]} : vector<4x128xf32> to vector<4x64xf32>
    %55 = tpu.concatenate %53, %54 in 0 : vector<4x64xf32>, vector<4x64xf32> -> vector<8x64xf32>
    %56 = arith.truncf %55 : vector<8x64xf32> to vector<8x64xbf16>
    %c0_25 = arith.constant 0 : index
    %c0_26 = arith.constant 0 : index
    %57 = vector.load %arg9[%c0_25, %c0_26] : memref<12x8xbf16, #tpu.memory_space<vmem>>, vector<12x8xbf16>
    %cst_27 = arith.constant dense<0.000000e+00> : vector<12x64xf32>
    %58 = tpu.matmul %57, %56, %cst_27 {dimension_numbers = #tpu.dot_dimension_numbers<[1], [0], [0], [1], [0, 0, 1, 1], [], []>} : vector<12x8xbf16>, vector<8x64xbf16>, vector<12x64xf32> -> vector<12x64xf32>
    %59 = arith.truncf %58 : vector<12x64xf32> to vector<12x64xbf16>
    %c0_28 = arith.constant 0 : index
    %c0_29 = arith.constant 0 : index
    %60 = vector.load %arg10[%c0_28, %c0_29] : memref<64x96xbf16, #tpu.memory_space<vmem>>, vector<64x96xbf16>
    %cst_30 = arith.constant dense<0.000000e+00> : vector<12x96xf32>
    %61 = tpu.matmul %59, %60, %cst_30 {dimension_numbers = #tpu.dot_dimension_numbers<[1], [0], [0], [1], [0, 0, 1, 1], [], []>} : vector<12x64xbf16>, vector<64x96xbf16>, vector<12x96xf32> -> vector<12x96xf32>
    %62 = vector.extract_strided_slice %61 {offsets = [0, 0], sizes = [4, 32], strides = [1, 1]} : vector<12x96xf32> to vector<4x32xf32>
    %63 = vector.extract_strided_slice %61 {offsets = [1, 32], sizes = [4, 32], strides = [1, 1]} : vector<12x96xf32> to vector<4x32xf32>
    %64 = arith.addf %62, %63 : vector<4x32xf32>
    %65 = vector.extract_strided_slice %61 {offsets = [2, 64], sizes = [4, 32], strides = [1, 1]} : vector<12x96xf32> to vector<4x32xf32>
    %66 = arith.addf %64, %65 : vector<4x32xf32>
    %67 = vector.extract_strided_slice %61 {offsets = [6, 0], sizes = [4, 32], strides = [1, 1]} : vector<12x96xf32> to vector<4x32xf32>
    %68 = vector.extract_strided_slice %61 {offsets = [7, 32], sizes = [4, 32], strides = [1, 1]} : vector<12x96xf32> to vector<4x32xf32>
    %69 = arith.addf %67, %68 : vector<4x32xf32>
    %70 = vector.extract_strided_slice %61 {offsets = [8, 64], sizes = [4, 32], strides = [1, 1]} : vector<12x96xf32> to vector<4x32xf32>
    %71 = arith.addf %69, %70 : vector<4x32xf32>
    %72 = tpu.concatenate %66, %71 in 0 : vector<4x32xf32>, vector<4x32xf32> -> vector<8x32xf32>
    %c0_31 = arith.constant 0 : index
    %c0_32 = arith.constant 0 : index
    %73 = vector.load %arg11[%c0_31, %c0_32] : memref<1x32xf32, #tpu.memory_space<vmem>>, vector<1x32xf32>
    %74 = vector.broadcast %73 : vector<1x32xf32> to vector<8x32xf32>
    %75 = arith.addf %72, %74 : vector<8x32xf32>
    %cst_33 = arith.constant 0.000000e+00 : f32
    %76 = vector.broadcast %cst_33 : f32 to vector<8x32xf32>
    %77 = arith.maximumf %75, %76 : vector<8x32xf32>
    %78 = arith.truncf %77 : vector<8x32xf32> to vector<8x32xbf16>
    %c0_34 = arith.constant 0 : index
    %c0_35 = arith.constant 0 : index
    %79 = vector.load %arg12[%c0_34, %c0_35] : memref<32x128xbf16, #tpu.memory_space<vmem>>, vector<32x128xbf16>
    %cst_36 = arith.constant dense<0.000000e+00> : vector<8x128xf32>
    %80 = tpu.matmul %78, %79, %cst_36 {dimension_numbers = #tpu.dot_dimension_numbers<[1], [0], [0], [1], [0, 0, 1, 1], [], []>} : vector<8x32xbf16>, vector<32x128xbf16>, vector<8x128xf32> -> vector<8x128xf32>
    %c0_37 = arith.constant 0 : index
    %c0_38 = arith.constant 0 : index
    %81 = vector.load %arg13[%c0_37, %c0_38] : memref<1x128xf32, #tpu.memory_space<vmem>>, vector<1x128xf32>
    %82 = vector.broadcast %81 : vector<1x128xf32> to vector<8x128xf32>
    %83 = arith.addf %80, %82 : vector<8x128xf32>
    %cst_39 = arith.constant 0.000000e+00 : f32
    %84 = vector.broadcast %cst_39 : f32 to vector<8x128xf32>
    %85 = arith.maximumf %83, %84 : vector<8x128xf32>
    %86 = vector.extract_strided_slice %85 {offsets = [0, 0], sizes = [8, 64], strides = [1, 1]} : vector<8x128xf32> to vector<8x64xf32>
    %87 = vector.extract_strided_slice %85 {offsets = [0, 64], sizes = [8, 64], strides = [1, 1]} : vector<8x128xf32> to vector<8x64xf32>
    %88 = tpu.concatenate %86, %87 in 0 : vector<8x64xf32>, vector<8x64xf32> -> vector<16x64xf32>
    %89 = arith.truncf %88 : vector<16x64xf32> to vector<16x64xbf16>
    %c0_40 = arith.constant 0 : index
    %c0_41 = arith.constant 0 : index
    %90 = vector.load %arg14[%c0_40, %c0_41] : memref<20x16xbf16, #tpu.memory_space<vmem>>, vector<20x16xbf16>
    %cst_42 = arith.constant dense<0.000000e+00> : vector<20x64xf32>
    %91 = tpu.matmul %90, %89, %cst_42 {dimension_numbers = #tpu.dot_dimension_numbers<[1], [0], [0], [1], [0, 0, 1, 1], [], []>} : vector<20x16xbf16>, vector<16x64xbf16>, vector<20x64xf32> -> vector<20x64xf32>
    %92 = arith.truncf %91 : vector<20x64xf32> to vector<20x64xbf16>
    %c0_43 = arith.constant 0 : index
    %c0_44 = arith.constant 0 : index
    %93 = vector.load %arg15[%c0_43, %c0_44] : memref<64x192xbf16, #tpu.memory_space<vmem>>, vector<64x192xbf16>
    %cst_45 = arith.constant dense<0.000000e+00> : vector<20x192xf32>
    %94 = tpu.matmul %92, %93, %cst_45 {dimension_numbers = #tpu.dot_dimension_numbers<[1], [0], [0], [1], [0, 0, 1, 1], [], []>} : vector<20x64xbf16>, vector<64x192xbf16>, vector<20x192xf32> -> vector<20x192xf32>
    %95 = vector.extract_strided_slice %94 {offsets = [0, 0], sizes = [8, 64], strides = [1, 1]} : vector<20x192xf32> to vector<8x64xf32>
    %96 = vector.extract_strided_slice %94 {offsets = [1, 64], sizes = [8, 64], strides = [1, 1]} : vector<20x192xf32> to vector<8x64xf32>
    %97 = arith.addf %95, %96 : vector<8x64xf32>
    %98 = vector.extract_strided_slice %94 {offsets = [2, 128], sizes = [8, 64], strides = [1, 1]} : vector<20x192xf32> to vector<8x64xf32>
    %99 = arith.addf %97, %98 : vector<8x64xf32>
    %100 = vector.extract_strided_slice %94 {offsets = [10, 0], sizes = [8, 64], strides = [1, 1]} : vector<20x192xf32> to vector<8x64xf32>
    %101 = vector.extract_strided_slice %94 {offsets = [11, 64], sizes = [8, 64], strides = [1, 1]} : vector<20x192xf32> to vector<8x64xf32>
    %102 = arith.addf %100, %101 : vector<8x64xf32>
    %103 = vector.extract_strided_slice %94 {offsets = [12, 128], sizes = [8, 64], strides = [1, 1]} : vector<20x192xf32> to vector<8x64xf32>
    %104 = arith.addf %102, %103 : vector<8x64xf32>
    %105 = tpu.concatenate %99, %104 in 0 : vector<8x64xf32>, vector<8x64xf32> -> vector<16x64xf32>
    %c0_46 = arith.constant 0 : index
    %c0_47 = arith.constant 0 : index
    %106 = vector.load %arg16[%c0_46, %c0_47] : memref<1x64xf32, #tpu.memory_space<vmem>>, vector<1x64xf32>
    %107 = vector.broadcast %106 : vector<1x64xf32> to vector<16x64xf32>
    %108 = arith.addf %105, %107 : vector<16x64xf32>
    %cst_48 = arith.constant 0.000000e+00 : f32
    %109 = vector.broadcast %cst_48 : f32 to vector<16x64xf32>
    %110 = arith.maximumf %108, %109 : vector<16x64xf32>
    %111 = arith.truncf %110 : vector<16x64xf32> to vector<16x64xbf16>
    %c0_49 = arith.constant 0 : index
    %c0_50 = arith.constant 0 : index
    %112 = vector.load %arg17[%c0_49, %c0_50] : memref<64x256xbf16, #tpu.memory_space<vmem>>, vector<64x256xbf16>
    %cst_51 = arith.constant dense<0.000000e+00> : vector<16x256xf32>
    %113 = tpu.matmul %111, %112, %cst_51 {dimension_numbers = #tpu.dot_dimension_numbers<[1], [0], [0], [1], [0, 0, 1, 1], [], []>} : vector<16x64xbf16>, vector<64x256xbf16>, vector<16x256xf32> -> vector<16x256xf32>
    %c0_52 = arith.constant 0 : index
    %c0_53 = arith.constant 0 : index
    %114 = vector.load %arg18[%c0_52, %c0_53] : memref<1x256xf32, #tpu.memory_space<vmem>>, vector<1x256xf32>
    %115 = vector.broadcast %114 : vector<1x256xf32> to vector<16x256xf32>
    %116 = arith.addf %113, %115 : vector<16x256xf32>
    %cst_54 = arith.constant 0.000000e+00 : f32
    %117 = vector.broadcast %cst_54 : f32 to vector<16x256xf32>
    %118 = arith.maximumf %116, %117 : vector<16x256xf32>
    %119 = vector.extract_strided_slice %118 {offsets = [0, 0], sizes = [16, 128], strides = [1, 1]} : vector<16x256xf32> to vector<16x128xf32>
    %120 = vector.extract_strided_slice %118 {offsets = [0, 128], sizes = [16, 128], strides = [1, 1]} : vector<16x256xf32> to vector<16x128xf32>
    %121 = tpu.concatenate %119, %120 in 0 : vector<16x128xf32>, vector<16x128xf32> -> vector<32x128xf32>
    %122 = arith.truncf %121 : vector<32x128xf32> to vector<32x128xbf16>
    %c0_55 = arith.constant 0 : index
    %c0_56 = arith.constant 0 : index
    %123 = vector.load %arg19[%c0_55, %c0_56] : memref<36x32xbf16, #tpu.memory_space<vmem>>, vector<36x32xbf16>
    %cst_57 = arith.constant dense<0.000000e+00> : vector<36x128xf32>
    %124 = tpu.matmul %123, %122, %cst_57 {dimension_numbers = #tpu.dot_dimension_numbers<[1], [0], [0], [1], [0, 0, 1, 1], [], []>} : vector<36x32xbf16>, vector<32x128xbf16>, vector<36x128xf32> -> vector<36x128xf32>
    %125 = arith.truncf %124 : vector<36x128xf32> to vector<36x128xbf16>
    %c0_58 = arith.constant 0 : index
    %c0_59 = arith.constant 0 : index
    %126 = vector.load %arg20[%c0_58, %c0_59] : memref<128x384xbf16, #tpu.memory_space<vmem>>, vector<128x384xbf16>
    %cst_60 = arith.constant dense<0.000000e+00> : vector<36x384xf32>
    %127 = tpu.matmul %125, %126, %cst_60 {dimension_numbers = #tpu.dot_dimension_numbers<[1], [0], [0], [1], [0, 0, 1, 1], [], []>} : vector<36x128xbf16>, vector<128x384xbf16>, vector<36x384xf32> -> vector<36x384xf32>
    %128 = vector.extract_strided_slice %127 {offsets = [0, 0], sizes = [16, 128], strides = [1, 1]} : vector<36x384xf32> to vector<16x128xf32>
    %129 = vector.extract_strided_slice %127 {offsets = [1, 128], sizes = [16, 128], strides = [1, 1]} : vector<36x384xf32> to vector<16x128xf32>
    %130 = arith.addf %128, %129 : vector<16x128xf32>
    %131 = vector.extract_strided_slice %127 {offsets = [2, 256], sizes = [16, 128], strides = [1, 1]} : vector<36x384xf32> to vector<16x128xf32>
    %132 = arith.addf %130, %131 : vector<16x128xf32>
    %133 = vector.extract_strided_slice %127 {offsets = [18, 0], sizes = [16, 128], strides = [1, 1]} : vector<36x384xf32> to vector<16x128xf32>
    %134 = vector.extract_strided_slice %127 {offsets = [19, 128], sizes = [16, 128], strides = [1, 1]} : vector<36x384xf32> to vector<16x128xf32>
    %135 = arith.addf %133, %134 : vector<16x128xf32>
    %136 = vector.extract_strided_slice %127 {offsets = [20, 256], sizes = [16, 128], strides = [1, 1]} : vector<36x384xf32> to vector<16x128xf32>
    %137 = arith.addf %135, %136 : vector<16x128xf32>
    %138 = tpu.concatenate %132, %137 in 0 : vector<16x128xf32>, vector<16x128xf32> -> vector<32x128xf32>
    %c0_61 = arith.constant 0 : index
    %c0_62 = arith.constant 0 : index
    %139 = vector.load %arg21[%c0_61, %c0_62] : memref<1x128xf32, #tpu.memory_space<vmem>>, vector<1x128xf32>
    %140 = vector.broadcast %139 : vector<1x128xf32> to vector<32x128xf32>
    %141 = arith.addf %138, %140 : vector<32x128xf32>
    %cst_63 = arith.constant 0.000000e+00 : f32
    %142 = vector.broadcast %cst_63 : f32 to vector<32x128xf32>
    %143 = arith.maximumf %141, %142 : vector<32x128xf32>
    %c0_64 = arith.constant 0 : index
    %c0_65 = arith.constant 0 : index
    %144 = vector.load %arg22[%c0_64, %c0_65] : memref<72x32xbf16, #tpu.memory_space<vmem>>, vector<72x32xbf16>
    %145 = arith.truncf %143 : vector<32x128xf32> to vector<32x128xbf16>
    %cst_66 = arith.constant dense<0.000000e+00> : vector<72x128xf32>
    %146 = tpu.matmul %144, %145, %cst_66 {dimension_numbers = #tpu.dot_dimension_numbers<[1], [0], [0], [1], [0, 0, 1, 1], [], []>} : vector<72x32xbf16>, vector<32x128xbf16>, vector<72x128xf32> -> vector<72x128xf32>
    %147 = arith.truncf %146 : vector<72x128xf32> to vector<72x128xbf16>
    %c0_67 = arith.constant 0 : index
    %c0_68 = arith.constant 0 : index
    %148 = vector.load %arg23[%c0_67, %c0_68] : memref<128x1280xbf16, #tpu.memory_space<vmem>>, vector<128x1280xbf16>
    %cst_69 = arith.constant dense<0.000000e+00> : vector<72x1280xf32>
    %149 = tpu.matmul %147, %148, %cst_69 {dimension_numbers = #tpu.dot_dimension_numbers<[1], [0], [0], [1], [0, 0, 1, 1], [], []>} : vector<72x128xbf16>, vector<128x1280xbf16>, vector<72x1280xf32> -> vector<72x1280xf32>
    %150 = vector.extract_strided_slice %149 {offsets = [0, 0], sizes = [32, 256], strides = [1, 1]} : vector<72x1280xf32> to vector<32x256xf32>
    %151 = vector.extract_strided_slice %149 {offsets = [1, 256], sizes = [32, 256], strides = [1, 1]} : vector<72x1280xf32> to vector<32x256xf32>
    %152 = arith.addf %150, %151 : vector<32x256xf32>
    %153 = vector.extract_strided_slice %149 {offsets = [2, 512], sizes = [32, 256], strides = [1, 1]} : vector<72x1280xf32> to vector<32x256xf32>
    %154 = arith.addf %152, %153 : vector<32x256xf32>
    %155 = vector.extract_strided_slice %149 {offsets = [3, 768], sizes = [32, 256], strides = [1, 1]} : vector<72x1280xf32> to vector<32x256xf32>
    %156 = arith.addf %154, %155 : vector<32x256xf32>
    %157 = vector.extract_strided_slice %149 {offsets = [4, 1024], sizes = [32, 256], strides = [1, 1]} : vector<72x1280xf32> to vector<32x256xf32>
    %158 = arith.addf %156, %157 : vector<32x256xf32>
    %159 = vector.extract_strided_slice %149 {offsets = [36, 0], sizes = [32, 256], strides = [1, 1]} : vector<72x1280xf32> to vector<32x256xf32>
    %160 = vector.extract_strided_slice %149 {offsets = [37, 256], sizes = [32, 256], strides = [1, 1]} : vector<72x1280xf32> to vector<32x256xf32>
    %161 = arith.addf %159, %160 : vector<32x256xf32>
    %162 = vector.extract_strided_slice %149 {offsets = [38, 512], sizes = [32, 256], strides = [1, 1]} : vector<72x1280xf32> to vector<32x256xf32>
    %163 = arith.addf %161, %162 : vector<32x256xf32>
    %164 = vector.extract_strided_slice %149 {offsets = [39, 768], sizes = [32, 256], strides = [1, 1]} : vector<72x1280xf32> to vector<32x256xf32>
    %165 = arith.addf %163, %164 : vector<32x256xf32>
    %166 = vector.extract_strided_slice %149 {offsets = [40, 1024], sizes = [32, 256], strides = [1, 1]} : vector<72x1280xf32> to vector<32x256xf32>
    %167 = arith.addf %165, %166 : vector<32x256xf32>
    %168 = tpu.concatenate %158, %167 in 0 : vector<32x256xf32>, vector<32x256xf32> -> vector<64x256xf32>
    %c0_70 = arith.constant 0 : index
    %c0_71 = arith.constant 0 : index
    %169 = vector.load %arg24[%c0_70, %c0_71] : memref<1x256xf32, #tpu.memory_space<vmem>>, vector<1x256xf32>
    %170 = vector.broadcast %169 : vector<1x256xf32> to vector<64x256xf32>
    %171 = arith.addf %168, %170 : vector<64x256xf32>
    %cst_72 = arith.constant 0.000000e+00 : f32
    %172 = vector.broadcast %cst_72 : f32 to vector<64x256xf32>
    %173 = arith.maximumf %171, %172 : vector<64x256xf32>
    %174 = arith.truncf %173 : vector<64x256xf32> to vector<64x256xbf16>
    %cst_73 = arith.constant 0.000000e+00 : bf16
    %175 = vector.broadcast %cst_73 : bf16 to vector<1x256xbf16>
    %176 = vector.extract_strided_slice %174 {offsets = [0, 0], sizes = [32, 256], strides = [1, 1]} : vector<64x256xbf16> to vector<32x256xbf16>
    %177 = vector.extract_strided_slice %174 {offsets = [32, 0], sizes = [32, 256], strides = [1, 1]} : vector<64x256xbf16> to vector<32x256xbf16>
    %178 = tpu.concatenate %175, %176, %175, %175, %177, %175 in 0 : vector<1x256xbf16>, vector<32x256xbf16>, vector<1x256xbf16>, vector<1x256xbf16>, vector<32x256xbf16>, vector<1x256xbf16> -> vector<68x256xbf16>
    %c0_74 = arith.constant 0 : index
    %c0_75 = arith.constant 0 : index
    %179 = vector.load %arg25[%c0_74, %c0_75] : memref<256x96xbf16, #tpu.memory_space<vmem>>, vector<256x96xbf16>
    %cst_76 = arith.constant dense<0.000000e+00> : vector<68x96xf32>
    %180 = tpu.matmul %178, %179, %cst_76 {dimension_numbers = #tpu.dot_dimension_numbers<[1], [0], [0], [1], [0, 0, 1, 1], [], []>} : vector<68x256xbf16>, vector<256x96xbf16>, vector<68x96xf32> -> vector<68x96xf32>
    %181 = vector.extract_strided_slice %180 {offsets = [0, 0], sizes = [32, 32], strides = [1, 1]} : vector<68x96xf32> to vector<32x32xf32>
    %182 = vector.extract_strided_slice %180 {offsets = [1, 32], sizes = [32, 32], strides = [1, 1]} : vector<68x96xf32> to vector<32x32xf32>
    %183 = arith.addf %181, %182 : vector<32x32xf32>
    %184 = vector.extract_strided_slice %180 {offsets = [2, 64], sizes = [32, 32], strides = [1, 1]} : vector<68x96xf32> to vector<32x32xf32>
    %185 = arith.addf %183, %184 : vector<32x32xf32>
    %186 = vector.extract_strided_slice %180 {offsets = [34, 0], sizes = [32, 32], strides = [1, 1]} : vector<68x96xf32> to vector<32x32xf32>
    %187 = vector.extract_strided_slice %180 {offsets = [35, 32], sizes = [32, 32], strides = [1, 1]} : vector<68x96xf32> to vector<32x32xf32>
    %188 = arith.addf %186, %187 : vector<32x32xf32>
    %189 = vector.extract_strided_slice %180 {offsets = [36, 64], sizes = [32, 32], strides = [1, 1]} : vector<68x96xf32> to vector<32x32xf32>
    %190 = arith.addf %188, %189 : vector<32x32xf32>
    %191 = tpu.concatenate %185, %190 in 0 : vector<32x32xf32>, vector<32x32xf32> -> vector<64x32xf32>
    %c0_77 = arith.constant 0 : index
    %c0_78 = arith.constant 0 : index
    %192 = vector.load %arg26[%c0_77, %c0_78] : memref<1x32xf32, #tpu.memory_space<vmem>>, vector<1x32xf32>
    %193 = vector.broadcast %192 : vector<1x32xf32> to vector<64x32xf32>
    %194 = arith.addf %191, %193 : vector<64x32xf32>
    %195 = vector.shape_cast %194 : vector<64x32xf32> to vector<2x32x32xf32>
    %c0_79 = arith.constant 0 : index
    %c0_80 = arith.constant 0 : index
    %c0_81 = arith.constant 0 : index
    %196 = vector.load %arg27[%c0_79, %c0_80, %c0_81] : memref<2x32x32xf32, #tpu.memory_space<vmem>>, vector<2x32x32xf32>
    tpu.vector_store %arg27[%c0_79, %c0_80, %c0_81], %195 {strides = array<i32>} : memref<2x32x32xf32, #tpu.memory_space<vmem>>, vector<2x32x32xf32>,
    return
  }
}

</mosaic_0001>

<bundles_post_ra>
// kernel: fwd.1
= control target key start
LH: loop header
LB: loop body
LE: loop exit
PB: predicated region body
PF: predicated region fallthrough
CT: control target
= control target key end

     0   :  { %s5689_s0 = inlined_call_operand.vmem [shape: f32[2,32], index: 0, kind: input, shape index: {}]   ;;  %s5690_s1 = inlined_call_operand.hbm [shape: bf16[32,64], index: 1, kind: input, shape index: {}]   ;;  %s5691_s2 = inlined_call_operand.vmem [shape: f32[1,64], index: 2, kind: input, shape index: {}]   ;;  %s5692_s3 = inlined_call_operand.vmem [shape: bf16[64,64], index: 3, kind: input, shape index: {}]   ;;  %s5693_s4 = inlined_call_operand.hbm [shape: f32[1,64], index: 4, kind: input, shape index: {}]   ;;  %s5694_s5 = inlined_call_operand.hbm [shape: bf16[32,96], index: 5, kind: input, shape index: {}]   ;;  %s5695_s6 = inlined_call_operand.hbm [shape: f32[1,32], index: 6, kind: input, shape index: {}]   ;;  %s5696_s7 = inlined_call_operand.hbm [shape: bf16[32,128], index: 7, kind: input, shape index: {}]   ;;  %s5697_s8 = inlined_call_operand.hbm [shape: f32[1,128], index: 8, kind: input, shape index: {}]   ;;  %s5698_s9 = inlined_call_operand.vmem [shape: bf16[12,8], index: 9, kind: input, shape index: {}]   ;;  %s5699_s10 = inlined_call_operand.hbm [shape: bf16[64,96], index: 10, kind: input, shape index: {}]   ;;  %s5700_s11 = inlined_call_operand.hbm [shape: f32[1,32], index: 11, kind: input, shape index: {}]   ;;  %s5701_s12 = inlined_call_operand.hbm [shape: bf16[32,128], index: 12, kind: input, shape index: {}]   ;;  %s5702_s13 = inlined_call_operand.hbm [shape: f32[1,128], index: 13, kind: input, shape index: {}]   ;;  %s5703_s14 = inlined_call_operand.vmem [shape: bf16[20,16], index: 14, kind: input, shape index: {}]   ;;  %s5704_s15 = inlined_call_operand.vmem [shape: bf16[64,192], index: 15, kind: input, shape index: {}]   ;;  %s5705_s16 = inlined_call_operand.hbm [shape: f32[1,64], index: 16, kind: input, shape index: {}]   ;;  %s5706_s17 = inlined_call_operand.hbm [shape: bf16[64,256], index: 17, kind: input, shape index: {}]   ;;  %s5707_s18 = inlined_call_operand.vmem [shape: f32[1,256], index: 18, kind: input, shape index: {}]   ;;  %s5708_s19 = inlined_call_operand.vmem [shape: bf16[36,32], index: 19, kind: input, shape index: {}]   ;;  %s5709_s20 = inlined_call_operand.vmem [shape: bf16[128,384], index: 20, kind: input, shape index: {}]   ;;  %s5710_s21 = inlined_call_operand.hbm [shape: f32[1,128], index: 21, kind: input, shape index: {}]   ;;  %s5711_s22 = inlined_call_operand.vmem [shape: bf16[72,32], index: 22, kind: input, shape index: {}]   ;;  %s5712_s23 = inlined_call_operand.hbm [shape: bf16[128,1280], index: 23, kind: input, shape index: {}]   ;;  %s5713_s24 = inlined_call_operand.hbm [shape: f32[1,256], index: 24, kind: input, shape index: {}]   ;;  %s5714_s25 = inlined_call_operand.vmem [shape: bf16[256,96], index: 25, kind: input, shape index: {}]   ;;  %s5715_s26 = inlined_call_operand.hbm [shape: f32[1,32], index: 26, kind: input, shape index: {}]   ;;  %s5716_s27 = inlined_call_operand.hbm [shape: f32[2,32,32], index: 27, kind: output, shape index: {}]  }
   0x1   :  { %5721 = sst [smem:[#allocation40_spill]] %s5689_s0 }
   0x2   :  { %5722 = sst [smem:[#allocation41_spill]] %s5690_s1 }
   0x3   :  { %5723 = sst [smem:[#allocation42_spill]] %s5691_s2 }
   0x4   :  { %5724 = sst [smem:[#allocation43_spill]] %s5692_s3 }
   0x5   :  { %5725 = sst [smem:[#allocation44_spill]] %s5693_s4 }
   0x6   :  { %5726 = sst [smem:[#allocation45_spill]] %s5694_s5 }
   0x7   :  { %5727 = sst [smem:[#allocation46_spill]] %s5695_s6 }
   0x8   :  { %5728 = sst [smem:[#allocation47_spill]] %s5696_s7 }
   0x9   :  { %5729 = sst [smem:[#allocation48_spill]] %s5697_s8 }
   0xa   :  { %5730 = sst [smem:[#allocation49_spill]] %s5698_s9 }
   0xb   :  { %5731 = sst [smem:[#allocation50_spill]] %s5699_s10 }
   0xc   :  { %5732 = sst [smem:[#allocation51_spill]] %s5700_s11 }
   0xd   :  { %32 = vsyncpa [#allocation3], 0 }
   0xe   :  { %33 = vsyncpa [#allocation6], 0 }
   0xf   :  { %34 = vsyncpa [#allocation9], 0 }
  0x10   :  { %35 = vsyncpa [#allocation12], 0 }
  0x11   :  { %36 = vsyncpa [#allocation15], 0 }
  0x12   :  { %37 = vsyncpa [#allocation18], 0 }
  0x13   :  { %38 = vsyncpa [#allocation21], 0 }
  0x14   :  { %39 = vsyncpa [#allocation24], 0 }
  0x15   :  { %40 = vsyncpa [#allocation27], 0 }
  0x16   :  { %41 = vsyncpa [#allocation4], 0  ;;  %s4625_s7 = smov [#allocation5]   ;;  %s4626_s8 = smov [#allocation8]  }
  0x17   :  { %s66_s4 = sshll.u32 %s4625_s7, 4  ;;  %s88_s30 = sshll.u32 %s4626_s8, 4  ;;  %s67_s4 = int_to_ptr.vmem [resolvable:$true] %s66_s4  ;;  %s89_s30 = int_to_ptr.vmem [resolvable:$true] %s88_s30 }
  0x18   :  { %s4273_s9 = scalar_lea.vmem %s67_s4, 16  ;;  %s4277_s5 = scalar_lea.vmem %s67_s4, 32 }
  0x19   :  { %p4274_p0 = scmp.ne.s32.totalorder %s67_s4, %s4273_s9  ;;  %p4278_p1 = scmp.lt.s32.totalorder %s67_s4, %s67_s4 }
  0x1a   :  { %p4279_p2 = scmp.lt.s32.totalorder %s4277_s5, %s4273_s9 }
  0x1c   :  { %p4280_p3 = por %p4279_p2, %p4278_p1 }
  0x1e   :  { %p4281_p4 = pnand %p4280_p3, %p4274_p0 }
  0x20   :  { %4284 = shalt.err (!%p4281_p4)
}
  0x21   :  { %s5733_s10 = sld [smem:[#allocation44_spill]]  ;;  %s4293_s29 = scalar_lea.vmem %s89_s30, 16 }
  0x22   :  { %p4294_p5 = scmp.ne.s32.totalorder %s89_s30, %s4293_s29  ;;  %s4297_s1 = scalar_lea.vmem %s89_s30, 32 }
  0x23   :  { %p4298_p6 = scmp.lt.s32.totalorder %s89_s30, %s89_s30  ;;  %p4299_p7 = scmp.lt.s32.totalorder %s4297_s1, %s4293_s29 }
  0x25   :  { %p4300_p8 = por %p4299_p7, %p4298_p6 }
  0x27   :  { %69 = dma.hbm_to_vmem [thread:$0]  %s5733_s10, 16, %s67_s4, [#allocation6]  }
  0x28   :  { %p4301_p9 = pnand %p4300_p8, %p4294_p5 }
  0x2a   :  { %4304 = shalt.err (!%p4301_p9)
}
  0x2b   :  { %s5734_s2 = sld [smem:[#allocation46_spill]]  ;;  %s4627_s3 = smov [#allocation11]  }
  0x2c   :  { %s110_s7 = sshll.u32 %s4627_s3, 4  ;;  %s4628_s8 = smov [#allocation14]   ;;  %s111_s7 = int_to_ptr.vmem [resolvable:$true] %s110_s7 }
  0x2d   :  { %s134_s9 = sshll.u32 %s4628_s8, 4  ;;  %s4313_s5 = scalar_lea.vmem %s111_s7, 16  ;;  %s135_s9 = int_to_ptr.vmem [resolvable:$true] %s134_s9 }
  0x2e   :  { %p4314_p10 = scmp.ne.s32.totalorder %s111_s7, %s4313_s5  ;;  %s4317_s4 = scalar_lea.vmem %s111_s7, 32 }
  0x2f   :  { %p4318_p11 = scmp.lt.s32.totalorder %s111_s7, %s111_s7  ;;  %p4319_p12 = scmp.lt.s32.totalorder %s4317_s4, %s4313_s5 }
  0x31   :  { %91 = dma.hbm_to_vmem [thread:$0]  %s5734_s2, 16, %s89_s30, [#allocation9]  }
  0x32   :  { %p4320_p13 = por %p4319_p12, %p4318_p11 }
  0x34   :  { %p4321_p0 = pnand %p4320_p13, %p4314_p10 }
  0x36   :  { %4324 = shalt.err (!%p4321_p0)
}
  0x37   :  { %s5735_s10 = sld [smem:[#allocation48_spill]]  ;;  %s4333_s29 = scalar_lea.vmem %s135_s9, 16 }
  0x38   :  { %p4334_p1 = scmp.ne.s32.totalorder %s135_s9, %s4333_s29  ;;  %s4337_s30 = scalar_lea.vmem %s135_s9, 32 }
  0x39   :  { %p4338_p2 = scmp.lt.s32.totalorder %s135_s9, %s135_s9  ;;  %p4339_p3 = scmp.lt.s32.totalorder %s4337_s30, %s4333_s29 }
  0x3b   :  { %p4340_p4 = por %p4339_p3, %p4338_p2 }
  0x3d   :  { %113 = dma.hbm_to_vmem [thread:$0]  %s5735_s10, 16, %s111_s7, [#allocation12]  }
  0x3e   :  { %p4341_p5 = pnand %p4340_p4, %p4334_p1 }
  0x40   :  { %4344 = shalt.err (!%p4341_p5)
}
  0x41   :  { %s5736_s11 = sld [smem:[#allocation51_spill]]  ;;  %s4629_s2 = smov [#allocation17]  }
  0x42   :  { %s156_s3 = sshll.u32 %s4629_s2, 4  ;;  %s4630_s8 = smov [#allocation20]   ;;  %s157_s3 = int_to_ptr.vmem [resolvable:$true] %s156_s3 }
  0x43   :  { %s179_s5 = sshll.u32 %s4630_s8, 4  ;;  %s4353_s4 = scalar_lea.vmem %s157_s3, 16  ;;  %s180_s5 = int_to_ptr.vmem [resolvable:$true] %s179_s5 }
  0x44   :  { %p4354_p6 = scmp.ne.s32.totalorder %s157_s3, %s4353_s4  ;;  %s4357_s7 = scalar_lea.vmem %s157_s3, 32 }
  0x45   :  { %p4358_p7 = scmp.lt.s32.totalorder %s157_s3, %s157_s3  ;;  %p4359_p8 = scmp.lt.s32.totalorder %s4357_s7, %s4353_s4 }
  0x47   :  { %137 = dma.hbm_to_vmem [thread:$0]  %s5736_s11, 16, %s135_s9, [#allocation15]  }
  0x48   :  { %p4360_p9 = por %p4359_p8, %p4358_p7 }
  0x4a   :  { %p4361_p10 = pnand %p4360_p9, %p4354_p6 }
  0x4c   :  { %4364 = shalt.err (!%p4361_p10)
}
  0x4d   :  { %159 = dma.hbm_to_vmem [thread:$0]  %s5702_s13, 16, %s157_s3, [#allocation18]  }
  0x4e   :  { %s4373_s10 = scalar_lea.vmem %s180_s5, 1024  ;;  %p4378_p12 = scmp.lt.s32.totalorder %s180_s5, %s180_s5 }
  0x4f   :  { %p4374_p11 = scmp.ne.s32.totalorder %s180_s5, %s4373_s10  ;;  %p4379_p13 = scmp.lt.s32.totalorder %s4373_s10, %s4373_s10 }
  0x51   :  { %p4380_p0 = por %p4379_p13, %p4378_p12 }
  0x53   :  { %p4381_p1 = pnand %p4380_p0, %p4374_p11 }
  0x55   :  { %4384 = shalt.err (!%p4381_p1)
}
  0x56   :  { %s4631_s9 = smov 128   ;;  %s4632_s29 = smov 8  }
  0x57   :  { %185 = dma.hbm_to_vmem [thread:$0]  %s5706_s17, 1024, %s180_s5, [#allocation21], %s4631_s9, %s4631_s9, %s4632_s29  }
  0x58   :  { %s4633_s6 = smov [#allocation23]  }
  0x59   :  { %s209_s11 = sshll.u32 %s4633_s6, 4  ;;  %s210_s11 = int_to_ptr.vmem [resolvable:$true] %s209_s11 }
  0x5a   :  { %s4393_s13 = scalar_lea.vmem %s210_s11, 10240  ;;  %p4398_p3 = scmp.lt.s32.totalorder %s210_s11, %s210_s11 }
  0x5b   :  { %p4394_p2 = scmp.ne.s32.totalorder %s210_s11, %s4393_s13  ;;  %p4399_p4 = scmp.lt.s32.totalorder %s4393_s13, %s4393_s13 }
  0x5d   :  { %p4400_p5 = por %p4399_p4, %p4398_p3 }
  0x5f   :  { %p4401_p6 = pnand %p4400_p5, %p4394_p2 }
  0x61   :  { %4404 = shalt.err (!%p4401_p6)
}
  0x62   :  { %s4634_s2 = smov 640   ;;  %s4635_s3 = smov 40  }
  0x63   :  { %215 = dma.hbm_to_vmem [thread:$0]  %s5712_s23, 10240, %s210_s11, [#allocation24], %s4634_s2, %s4634_s2, %s4635_s3  }
  0x64   :  { %s4636_s7 = smov [#allocation2]  }
  0x65   :  { %s49_s28 = sshll.u32 %s4636_s7, 4  ;;  %s50_s28 = int_to_ptr.vmem [resolvable:$true] %s49_s28 }
  0x66   :  { %s4413_s17 = scalar_lea.vmem %s50_s28, 256  ;;  %p4418_p8 = scmp.lt.s32.totalorder %s50_s28, %s50_s28 }
  0x67   :  { %p4414_p7 = scmp.ne.s32.totalorder %s50_s28, %s4413_s17  ;;  %p4419_p9 = scmp.lt.s32.totalorder %s4413_s17, %s4413_s17 }
  0x69   :  { %p4420_p10 = por %p4419_p9, %p4418_p8 }
  0x6b   :  { %p4421_p11 = pnand %p4420_p10, %p4414_p7 }
  0x6d   :  { %4424 = shalt.err (!%p4421_p11)
}
  0x6e   :  { %s4637_s5 = smov 64   ;;  %s4638_s0 = smov 4  }
  0x6f   :  { %s5737_s1 = sld [smem:[#allocation41_spill]]  ;;  %s4639_s23 = smov [#allocation7]  }
  0x70   :  { %s75_s6 = sshll.u32 %s4639_s23, 4  ;;  %s4640_s11 = smov [#allocation10]   ;;  %s76_s6 = int_to_ptr.vmem [resolvable:$true] %s75_s6 }
  0x71   :  { %s97_s13 = sshll.u32 %s4640_s11, 4  ;;  %s4433_s2 = scalar_lea.vmem %s76_s6, 256  ;;  %s98_s13 = int_to_ptr.vmem [resolvable:$true] %s97_s13 }
  0x72   :  { %p4434_p12 = scmp.ne.s32.totalorder %s76_s6, %s4433_s2  ;;  %p4438_p13 = scmp.lt.s32.totalorder %s76_s6, %s76_s6 }
  0x73   :  { %p4439_p0 = scmp.lt.s32.totalorder %s4433_s2, %s4433_s2 }
  0x75   :  { %55 = dma.hbm_to_vmem [thread:$0]  %s5737_s1, 256, %s50_s28, [#allocation3], %s4637_s5, %s4637_s5, %s4638_s0  }
  0x76   :  { %p4440_p1 = por %p4439_p0, %p4438_p13 }
  0x78   :  { %p4441_p2 = pnand %p4440_p1, %p4434_p12 }
  0x7a   :  { %4444 = shalt.err (!%p4441_p2)
}
  0x7b   :  { %s5738_s4 = sld [smem:[#allocation45_spill]]  ;;  %s4453_s7 = scalar_lea.vmem %s98_s13, 256 }
  0x7c   :  { %p4454_p3 = scmp.ne.s32.totalorder %s98_s13, %s4453_s7  ;;  %p4458_p4 = scmp.lt.s32.totalorder %s98_s13, %s98_s13 }
  0x7d   :  { %p4459_p5 = scmp.lt.s32.totalorder %s4453_s7, %s4453_s7 }
  0x7f   :  { %p4460_p6 = por %p4459_p5, %p4458_p4 }
  0x81   :  { %81 = dma.hbm_to_vmem [thread:$0]  %s5738_s4, 256, %s76_s6, [#allocation6], %s4637_s5, %s4637_s5, %s4638_s0  }
  0x82   :  { %p4461_p7 = pnand %p4460_p6, %p4454_p3 }
  0x84   :  { %4464 = shalt.err (!%p4461_p7)
}
  0x85   :  { %s5739_s10 = sld [smem:[#allocation47_spill]]  ;;  %s4641_s30 = smov [#allocation13]  }
  0x86   :  { %s121_s1 = sshll.u32 %s4641_s30, 4  ;;  %s4642_s23 = smov [#allocation16]   ;;  %s122_s1 = int_to_ptr.vmem [resolvable:$true] %s121_s1 }
  0x87   :  { %s143_s11 = sshll.u32 %s4642_s23, 4  ;;  %s4473_s6 = scalar_lea.vmem %s122_s1, 512  ;;  %s144_s11 = int_to_ptr.vmem [resolvable:$true] %s143_s11 }
  0x88   :  { %p4474_p8 = scmp.ne.s32.totalorder %s122_s1, %s4473_s6  ;;  %p4478_p9 = scmp.lt.s32.totalorder %s122_s1, %s122_s1 }
  0x89   :  { %p4479_p10 = scmp.lt.s32.totalorder %s4473_s6, %s4473_s6 }
  0x8b   :  { %103 = dma.hbm_to_vmem [thread:$0]  %s5739_s10, 256, %s98_s13, [#allocation9], %s4637_s5, %s4637_s5, %s4638_s0  }
  0x8c   :  { %p4480_p11 = por %p4479_p10, %p4478_p9 }
  0x8e   :  { %p4481_p12 = pnand %p4480_p11, %p4474_p8 }
  0x90   :  { %4484 = shalt.err (!%p4481_p12)
}
  0x91   :  { %s5740_s8 = sld [smem:[#allocation50_spill]]  ;;  %s4493_s13 = scalar_lea.vmem %s144_s11, 256 }
  0x92   :  { %p4494_p13 = scmp.ne.s32.totalorder %s144_s11, %s4493_s13  ;;  %p4498_p0 = scmp.lt.s32.totalorder %s144_s11, %s144_s11 }
  0x93   :  { %p4499_p1 = scmp.lt.s32.totalorder %s4493_s13, %s4493_s13 }
  0x95   :  { %p4500_p2 = por %p4499_p1, %p4498_p0 }
  0x97   :  { %127 = dma.hbm_to_vmem [thread:$0]  %s5740_s8, 512, %s122_s1, [#allocation12], %s4637_s5, %s4637_s5, %s4638_s0  }
  0x98   :  { %p4501_p3 = pnand %p4500_p2, %p4494_p13 }
  0x9a   :  { %4504 = shalt.err (!%p4501_p3)
}
  0x9b   :  { %149 = dma.hbm_to_vmem [thread:$0]  %s5701_s12, 256, %s144_s11, [#allocation15], %s4637_s5, %s4637_s5, %s4638_s0  }
  0x9c   :  { %s4643_s28 = smov [#allocation19]   ;;  %s4644_s10 = smov [#allocation22]  }
  0x9d   :  { %s170_s17 = sshll.u32 %s4643_s28, 4  ;;  %s198_s30 = sshll.u32 %s4644_s10, 4  ;;  %s171_s17 = int_to_ptr.vmem [resolvable:$true] %s170_s17  ;;  %s199_s30 = int_to_ptr.vmem [resolvable:$true] %s198_s30 }
  0x9e   :  { %s4513_s1 = scalar_lea.vmem %s171_s17, 16  ;;  %s4517_s23 = scalar_lea.vmem %s171_s17, 32 }
  0x9f   :  { %p4514_p4 = scmp.ne.s32.totalorder %s171_s17, %s4513_s1  ;;  %p4518_p5 = scmp.lt.s32.totalorder %s171_s17, %s171_s17 }
  0xa0   :  { %p4519_p6 = scmp.lt.s32.totalorder %s4517_s23, %s4513_s1 }
  0xa2   :  { %p4520_p7 = por %p4519_p6, %p4518_p5 }
  0xa4   :  { %p4521_p8 = pnand %p4520_p7, %p4514_p4 }
  0xa6   :  { %4524 = shalt.err (!%p4521_p8)
}
  0xa7   :  { %173 = dma.hbm_to_vmem [thread:$0]  %s5705_s16, 16, %s171_s17, [#allocation18]  }
  0xa8   :  { %s4533_s3 = scalar_lea.vmem %s199_s30, 16  ;;  %s4537_s12 = scalar_lea.vmem %s199_s30, 32 }
  0xa9   :  { %p4534_p9 = scmp.ne.s32.totalorder %s199_s30, %s4533_s3  ;;  %p4538_p10 = scmp.lt.s32.totalorder %s199_s30, %s199_s30 }
  0xaa   :  { %p4539_p11 = scmp.lt.s32.totalorder %s4537_s12, %s4533_s3 }
  0xac   :  { %p4540_p12 = por %p4539_p11, %p4538_p10 }
  0xae   :  { %p4541_p13 = pnand %p4540_p12, %p4534_p9 }
  0xb0   :  { %4544 = shalt.err (!%p4541_p13)
}
  0xb1   :  { %201 = dma.hbm_to_vmem [thread:$0]  %s5710_s21, 16, %s199_s30, [#allocation21]  }
  0xb2   :  { %s4645_s8 = smov [#allocation25]   ;;  %s4646_s4 = smov [#allocation26]  }
  0xb3   :  { %s222_s13 = sshll.u32 %s4645_s8, 4  ;;  %s234_s7 = sshll.u32 %s4646_s4, 4  ;;  %s223_s13 = int_to_ptr.vmem [resolvable:$true] %s222_s13  ;;  %s235_s7 = int_to_ptr.vmem [resolvable:$true] %s234_s7 }
  0xb4   :  { %s4553_s28 = scalar_lea.vmem %s223_s13, 32  ;;  %p4558_p1 = scmp.lt.s32.totalorder %s223_s13, %s223_s13 }
  0xb5   :  { %p4554_p0 = scmp.ne.s32.totalorder %s223_s13, %s4553_s28  ;;  %p4559_p2 = scmp.lt.s32.totalorder %s4553_s28, %s4553_s28 }
  0xb7   :  { %p4560_p3 = por %p4559_p2, %p4558_p1 }
  0xb9   :  { %p4561_p4 = pnand %p4560_p3, %p4554_p0 }
  0xbb   :  { %4564 = shalt.err (!%p4561_p4)
}
  0xbc   :  { %225 = dma.hbm_to_vmem [thread:$0]  %s5713_s24, 32, %s223_s13, [#allocation24]  }
  0xbd   :  { %s4573_s10 = scalar_lea.vmem %s235_s7, 16  ;;  %s4577_s21 = scalar_lea.vmem %s235_s7, 32 }
  0xbe   :  { %p4574_p5 = scmp.ne.s32.totalorder %s235_s7, %s4573_s10  ;;  %p4578_p6 = scmp.lt.s32.totalorder %s235_s7, %s235_s7 }
  0xbf   :  { %p4579_p7 = scmp.lt.s32.totalorder %s4577_s21, %s4573_s10 }
  0xc1   :  { %p4580_p8 = por %p4579_p7, %p4578_p6 }
  0xc3   :  { %p4581_p9 = pnand %p4580_p8, %p4574_p5 }
  0xc5   :  { %4584 = shalt.err (!%p4581_p9)
}
  0xc6   :  { %237 = dma.hbm_to_vmem [thread:$0]  %s5715_s26, 16, %s235_s7, [#allocation27]  }
  0xc7   :  { %4605 = dma.done.wait [#allocation3], 256  }
  0xc8   :  { %4606 = vsyncadd [#allocation3], 4294967040 }
  0xc9   :  { %4607 = dma.done.wait [#allocation6], 272  }
  0xca   :  { %4608 = vsyncadd [#allocation6], 4294967024 }
  0xcb   :  { %4609 = dma.done.wait [#allocation9], 272  }
  0xcc   :  { %4610 = vsyncadd [#allocation9], 4294967024 }
  0xcd   :  { %4611 = dma.done.wait [#allocation12], 528  }
  0xce   :  { %4612 = vsyncadd [#allocation12], 4294966768 }
  0xcf   :  { %4613 = dma.done.wait [#allocation15], 272  }
  0xd0   :  { %4614 = vsyncadd [#allocation15], 4294967024 }
  0xd1   :  { %4615 = dma.done.wait [#allocation18], 32  }
  0xd2   :  { %4616 = vsyncadd [#allocation18], 4294967264 }
  0xd3   :  { %4617 = dma.done.wait [#allocation21], 1040  }
  0xd4   :  { %4618 = vsyncadd [#allocation21], 4294966256 }
  0xd5   :  { %4619 = dma.done.wait [#allocation24], 10272  }
  0xd6   :  { %4620 = vsyncadd [#allocation24], 4294957024 }
  0xd7   :  { %4621 = dma.done.wait [#allocation27], 16  }
  0xd8   :  { %4622 = vsyncadd [#allocation27], 4294967280  ;;  %v4647_v0 = vmov 0.0   ;;  %vm4648_vm0 = vmmov 0   ;;  %v4046_v1 = vld [vmem:[#allocation2 + $0x8] sm:$0xff]   ;;  %v4047_v2 = vld [vmem:[#allocation2] sm:$0xff]  }
  0xd9   :  { %3883 = vmatprep.subr.bf16.mxu1 %v4647_v0  ;;  %3887 = vmatprep.mubr.msk.bf16.mxu1 %vm4648_vm0, %v4647_v0  ;;  %s5741_s23 = sld [smem:[#allocation40_spill]]  ;;  %vm312_vm1 = vcmask 261120   ;;  %vm397_vm2 = vcmask 523264   ;;  %v3599_v17 = vld [vmem:[#allocation5] ss:$0 sm:$0xff]  ;;  %v4052_v22 = vld [vmem:[#allocation7 + $0x8] sm:$0xff]  }
  0xda   :  { %3903 = vmatprep.subr.bf16.mxu0 %v4647_v0  ;;  %3907 = vmatprep.mubr.msk.bf16.mxu0 %vm4648_vm0, %v4647_v0  ;;  %s5742_s3 = sld [smem:[#allocation43_spill]]  ;;  %s4649_s17 = smov 96   ;;  %v4053_v26 = vld [vmem:[#allocation7] sm:$0xff]   ;;  %vm452_vm3 = vcmask 1040384   ;;  %vm454_vm4 = vcmask 1041408   ;;  %vm456_vm5 = vcmask 1042432  }
  0xdb   :  { %3884 = vmatpush3.bf16.msra.mxu1 %v4046_v1  ;;  %s5743_s16 = sld [smem:[#allocation42_spill]]  ;;  %3904 = vmatpush3.bf16.msra.mxu0 %v4052_v22  ;;  %vm472_vm6 = vsmask.f32 256  ;;  %vm476_vm7 = vsmask.f32 1280  ;;  %v5746_v40 = vmov 0 }
  0xdc   :  { %3885 = vmatprep.subr.bf16.mxu1 %v4647_v0  ;;  %3905 = vmatprep.subr.bf16.mxu0 %v4647_v0  ;;  %vm4903_vm8 = vmand %vm452_vm3, %vm472_vm6  ;;  %vm484_vm9 = vsmask.f32 2304  ;;  %vm487_vm11 = vcmask 1043456   ;;  %vm488_vm12 = vsmask.f32 3328  ;;  %v4054_v48 = vld [vmem:[#allocation10 + $0x8] sm:$0xff]  }
  0xdd   :  { %vm4909_vm10 = vmand %vm454_vm4, %vm476_vm7  ;;  %v4055_v50 = vld [vmem:[#allocation10] sm:$0xff]   ;;  %v3608_v60 = vld [vmem:[#allocation8] ss:$0 sm:$0xff]  ;;  %s5749_s30 = sld [smem:[#allocation49_spill]]  ;;  %vm657_vm15 = vcmask 64512  }
  0xde   :  { %v5747_v40 = vsel %vm4909_vm10, 4294967295, %v5746_v40  ;;  %vm485_vm13 = vmand %vm456_vm5, %vm484_vm9  ;;  %vm912_vm9 = vcmask 130048  }
  0xdf   :  { %v287_v3 = vld [vmem:[%s5741_s23] sm:$0x3]  ;;  %3886 = vmatpush3.bf16.msra.mxu1 %v4047_v2  ;;  %3906 = vmatpush3.bf16.msra.mxu0 %v4053_v26  ;;  %5748 = vst [vmem:[#allocation39_spill] sm:$0xff] %v5747_v40  ;;  %vm489_vm14 = vmand %vm487_vm11, %vm488_vm12 }
  0xe0   :  { %v4048_v4 = vld [vmem:[%s5742_s3 + $0x18] sm:$0xff]   ;;  %v288_v5 = vpack.c.bf16 %v287_v3, %v287_v3  ;;  %3891 = vmatprep.subr.bf16.mxu1 %v4647_v0  ;;  %v4049_v6 = vld [vmem:[%s5742_s3 + $0x10] sm:$0xff]   ;;  %v4050_v7 = vld [vmem:[%s5742_s3 + $0x8] sm:$0xff]   ;;  %3911 = vmatprep.subr.bf16.mxu0 %v4647_v0 }
  0xe1   :  { %v4051_v8 = vld [vmem:[%s5742_s3] sm:$0xff]   ;;  %v3609_v3 = vld [vmem:[#allocation11] ss:$0 sm:$0xff] }
  0xe2   :  { %3888 = vmatmul.mubr.msk.bf16.vlgmr.msra.gmra.mxu1 %vm312_vm1, %v288_v5  ;;  %v3595_v9 = vld [vmem:[%s5743_s16] ss:$0 sm:$0xff] }
  0xe3   :  { %3892 = vmatpush3.bf16.msra.mxu1 %v4048_v4  ;;  %3899 = vmatprep.mubr.msk.bf16.mxu1 %vm4648_vm0, %v4647_v0 }
  0xe4   :  { %3893 = vmatprep.subr.bf16.mxu1 %v4647_v0 }
  0xe7   :  { %3894 = vmatpush3.bf16.msra.mxu1 %v4049_v6  ;;  %v4057_v6 = vld [vmem:[#allocation13 + $0x18] sm:$0xff]  }
  0xe8   :  { %3895 = vmatprep.subr.bf16.mxu1 %v4647_v0 }
  0xeb   :  { %3896 = vmatpush3.bf16.msra.mxu1 %v4050_v7 }
  0xec   :  { %3897 = vmatprep.subr.bf16.mxu1 %v4647_v0 }
  0xef   :  { %3898 = vmatpush3.bf16.msra.mxu1 %v4051_v8 }
  0xf0   :  { %3919 = vmatprep.subr.bf16.mxu1 %v4647_v0 }
 0x1a2   :  { %v350_v10 = vpop.f32.mrf.mxu1 }
 0x1a3   :  { %v351_v11 = vadd.f32 %v3595_v9, %v350_v10  ;;  %v4058_v9 = vld [vmem:[#allocation13 + $0x10] sm:$0xff]  }
 0x1a4   :  { %v3889_v12 = vpop.f32.mrf.mxu1 }
 0x1a5   :  { %v356_v13 = vmax.f32 %v351_v11, 0.0 }
 0x1a6   :  { %v353_v14 = vpop.f32.mrf.mxu1 }
 0x1a7   :  { %v357_v15 = vpack.c.bf16 %v356_v13, %v356_v13 }
 0x1a8   :  { %v3890_v16 = vpop.f32.mrf.mxu1 }
 0x1a9   :  { %3900 = vmatmul.mubr.msk.bf16.vlgmr.msra.gmra.mxu1 %vm397_vm2, %v357_v15 }
 0x1aa   :  { %3921 = vmatprep.mubr.msk.bf16.mxu1 %vm4648_vm0, %v4647_v0 }
 0x269   :  { %v435_v18 = vpop.f32.mrf.mxu1 }
 0x26a   :  { %v436_v19 = vadd.f32 %v3599_v17, %v435_v18  ;;  %v4056_v17 = vld [vmem:[%s5749_s30] sm:$0x3f]  }
 0x26b   :  { %v3901_v20 = vpop.f32.mrf.mxu1  ;;  %v4059_v18 = vld [vmem:[#allocation13 + $0x8] sm:$0xff]  }
 0x26c   :  { %v441_v21 = vmax.f32 %v436_v19, 0.0  ;;  %v4060_v19 = vld [vmem:[#allocation13] sm:$0xff]  }
 0x26d   :  { %v438_v23 = vpop.f32.mrf.mxu1 }
 0x26e   :  { %v443_v24 = vrot.slane %v441_v21, 7  ;;  %v448_v27 = vrot.slane %v441_v21, 6 }
 0x26f   :  { %v3902_v25 = vpop.f32.mrf.mxu1 }
 0x270   :  { %444 = vrot.lane.b32.xlu0 %v443_v24, %s4649_s17 }
 0x274   :  { %449 = vrot.lane.b32.xlu0 %v448_v27, %s4649_s17  ;;  %v4061_v27 = vld [vmem:[#allocation16 + $0x8] sm:$0xff]  }
 0x2e2   :  { %v445_v28 = vpop.permute.xlu0 %444 }
 0x2e3   :  { %v453_v29 = vsel %vm452_vm3, %v441_v21, %v445_v28 }
 0x2e4   :  { %v455_v30 = vsel %vm454_vm4, %v453_v29, %v443_v24 }
 0x2e6   :  { %v450_v31 = vpop.permute.xlu0 %449 }
 0x2e7   :  { %v457_v32 = vsel %vm456_vm5, %v455_v30, %v450_v31  ;;  %vm813_vm5 = vcmask 1045504  }
 0x2e8   :  { %v458_v33 = vpack.c.bf16 %v457_v32, %v457_v32 }
 0x2ea   :  { %v460_v34 = vshrl.u32 %v458_v33, 16  ;;  %v463_v35 = vshll.u32 %v458_v33, 16  ;;  %v4062_v33 = vld [vmem:[#allocation16] sm:$0xff]  }
 0x2ec   :  { %v462_v36 = vrot.slane %v460_v34, 7  ;;  %v467_v38 = vrot.slane %v460_v34, 6  ;;  %v468_v39 = vrot.slane %v463_v35, 7 }
 0x2ee   :  { %v465_v41 = vor.u32 %v463_v35, %v462_v36  ;;  %v469_v43 = vor.u32 %v468_v39, %v467_v38 }
 0x2f0   :  { %v474_v42 = vsel %vm4903_vm8, 0, %v465_v41 }
 0x2f1   :  { %v478_v44 = vsel %vm4909_vm10, %v474_v42, 0 }
 0x2f2   :  { %v481_v45 = vsel %vm454_vm4, %v478_v44, 0 }
 0x2f3   :  { %v486_v46 = vsel %vm485_vm13, %v481_v45, %v469_v43 }
 0x2f4   :  { %v490_v47 = vsel %vm489_vm14, %v486_v46, 0 }
 0x2f5   :  { %3908 = vmatmul.mubr.msk.bf16.vlgmr.msra.gmra.mxu0 %vm312_vm1, %v490_v47 }
 0x2f6   :  { %3915 = vmatprep.mubr.msk.bf16.mxu0 %vm4648_vm0, %v4647_v0  ;;  %3912 = vmatpush3.bf16.msra.mxu0 %v4054_v48 }
 0x2f7   :  { %3913 = vmatprep.subr.bf16.mxu0 %v4647_v0 }
 0x2fa   :  { %3914 = vmatpush3.bf16.msra.mxu0 %v4055_v50 }
 0x2fb   :  { %3925 = vmatprep.subr.bf16.mxu0 %v4647_v0 }
 0x3b5   :  { %v544_v49 = vpop.f32.mrf.mxu0 }
 0x3b6   :  { %v551_v51 = vrot.slane %v544_v49, 1  ;;  %v556_v54 = vrot.slane %v544_v49, 2 }
 0x3b7   :  { %v3909_v52 = vpop.f32.mrf.mxu0 }
 0x3b8   :  { %552 = vrot.lane.b32.xlu1 %v551_v51, %s4649_s17  ;;  %v3620_v51 = vld [vmem:[#allocation14] ss:$0 sm:$0xff] }
 0x3b9   :  { %v547_v53 = vpop.f32.mrf.mxu0 }
 0x3bb   :  { %v3910_v55 = vpop.f32.mrf.mxu0 }
 0x3bc   :  { %557 = vrot.lane.b32.xlu1 %v556_v54, %s4637_s5 }
 0x42a   :  { %v553_v56 = vpop.permute.xlu1 %552 }
 0x42b   :  { %v555_v57 = vadd.f32 %v553_v56, %v544_v49 }
 0x42e   :  { %v558_v58 = vpop.permute.xlu1 %557 }
 0x42f   :  { %v560_v59 = vadd.f32 %v558_v58, %v555_v57  ;;  %v4063_v57 = vld [vmem:[%s5703_s14] sm:$0xff]   ;;  %v3621_v58 = vld [vmem:[#allocation17] ss:$0 sm:$0xff] }
 0x431   :  { %v562_v61 = vrot.slane %v560_v59, 2 }
 0x433   :  { %v564_v62 = vsel %vm454_vm4, %v560_v59, %v562_v61  ;;  %vm794_vm4 = vcmask 1046528   ;;  %v4065_v59 = vld [vmem:[%s5704_s15 + $0x30] ss:$8 sps:$4 sm:$0xff]   ;;  %v4070_v61 = vld [vmem:[%s5704_s15 + $0x24] ss:$8 sps:$4 sm:$0xff]  }
 0x434   :  { %v572_v63 = vadd.f32 %v3608_v60, %v564_v62  ;;  %v4067_v60 = vld [vmem:[%s5704_s15 + $0x34] ss:$8 sps:$4 sm:$0xff]  }
 0x436   :  { %v573_v1 = vmax.f32 %v572_v63, 0.0 }
 0x438   :  { %v574_v2 = vpack.c.bf16 %v573_v1, %v573_v1  ;;  %v4068_v1 = vld [vmem:[%s5704_s15 + $0x20] ss:$8 sps:$4 sm:$0xff]  }
 0x43a   :  { %3916 = vmatmul.mubr.msk.bf16.vlgmr.msra.gmra.mxu0 %vm312_vm1, %v574_v2 }
 0x43b   :  { %3933 = vmatprep.mubr.msk.bf16.mxu0 %vm4648_vm0, %v4647_v0  ;;  %3926 = vmatpush3.bf16.msra.mxu0 %v4057_v6 }
 0x43c   :  { %3927 = vmatprep.subr.bf16.mxu0 %v4647_v0 }
 0x43f   :  { %3928 = vmatpush3.bf16.msra.mxu0 %v4058_v9  ;;  %v4073_v9 = vld [vmem:[%s5704_s15 + $0x14] ss:$8 sps:$4 sm:$0xff]  }
 0x440   :  { %3929 = vmatprep.subr.bf16.mxu0 %v4647_v0 }
 0x443   :  { %3930 = vmatpush3.bf16.msra.mxu0 %v4059_v18 }
 0x444   :  { %3931 = vmatprep.subr.bf16.mxu0 %v4647_v0 }
 0x447   :  { %3932 = vmatpush3.bf16.msra.mxu0 %v4060_v19 }
 0x448   :  { %1031 = vmatprep.subr.bf16.mxu0 %v4067_v60 }
 0x4fa   :  { %v635_v4 = vpop.f32.mrf.mxu0 }
 0x4fb   :  { %v636_v5 = vadd.f32 %v3609_v3, %v635_v4 }
 0x4fc   :  { %v3917_v7 = vpop.f32.mrf.mxu0 }
 0x4fd   :  { %v641_v8 = vmax.f32 %v636_v5, 0.0 }
 0x4fe   :  { %v638_v10 = vpop.f32.mrf.mxu0 }
 0x4ff   :  { %v643_v11 = vrot.slane %v641_v8, 4  ;;  %v4071_v10 = vld [vmem:[%s5704_s15 + $0x10] ss:$8 sps:$4 sm:$0xff]  }
 0x500   :  { %v3918_v12 = vpop.f32.mrf.mxu0 }
 0x501   :  { %644 = vrot.lane.b32.xlu0 %v643_v11, %s4637_s5  ;;  %v4076_v11 = vld [vmem:[%s5704_s15 + $0x4] ss:$8 sps:$4 sm:$0xff]   ;;  %v4074_v12 = vld [vmem:[%s5704_s15] ss:$8 sps:$4 sm:$0xff]  }
 0x573   :  { %v645_v13 = vpop.permute.xlu0 %644 }
 0x574   :  { %v648_v14 = vsel %vm487_vm11, %v641_v8, %v645_v13  ;;  %v4064_v8 = vld [vmem:[%s5703_s14 + $0x8] ss:$0 sps:$4 sm:$0x33]   ;;  %v4650_v13 = vmov 0  }
 0x575   :  { %v649_v15 = vpack.c.bf16 %v648_v14, %v648_v14 }
 0x577   :  { %v662_v16 = vsel %vm487_vm11, %v649_v15, 0 }
 0x578   :  { %3920 = vmatpush3.bf16.msra.mxu1 %v662_v16 }
 0x579   :  { %3937 = vmatprep.subr.bf16.mxu1 %v4647_v0 }
 0x57b   :  { %3922 = vmatmul.mubr.msk.bf16.vlgmr.msra.gmra.mxu1 %vm657_vm15, %v4056_v17 }
 0x57c   :  { %3941 = vmatprep.mubr.msk.bf16.mxu1 %vm4648_vm0, %v4647_v0  ;;  %3938 = vmatpush3.bf16.msra.mxu1 %v4061_v27 }
 0x57d   :  { %3939 = vmatprep.subr.bf16.mxu1 %v4647_v0 }
 0x580   :  { %3940 = vmatpush3.bf16.msra.mxu1 %v4062_v33 }
 0x63b   :  { %v698_v20 = vpop.f32.mrf.mxu1 }
 0x63d   :  { %v3923_v21 = vpop.f32.mrf.mxu1 }
 0x63e   :  { %v4079_v21 = vld [vmem:[#allocation20 + $0x34] ss:$8 sps:$4 sm:$0xff]  }
 0x63f   :  { %v701_v22 = vpop.f32.mrf.mxu1 }
 0x640   :  { %v705_v23 = vpack.c.bf16 %v701_v22, %v698_v20  ;;  %v4077_v20 = vld [vmem:[#allocation20 + $0x30] ss:$8 sps:$4 sm:$0xff]   ;;  %v4082_v22 = vld [vmem:[#allocation20 + $0x24] ss:$8 sps:$4 sm:$0xff]  }
 0x641   :  { %v3924_v24 = vpop.f32.mrf.mxu1 }
 0x642   :  { %3934 = vmatmul.mubr.msk.bf16.vlgmr.msra.gmra.mxu0 %vm397_vm2, %v705_v23  ;;  %v4080_v24 = vld [vmem:[#allocation20 + $0x20] ss:$8 sps:$4 sm:$0xff]  }
 0x643   :  { %1032 = vmatpush1.bf16.msra.mxu0 %v4065_v59  ;;  %1055 = vmatprep.mubr.bf16.mxu0 %v4650_v13 }
 0x644   :  { %1033 = vmatprep.subr.bf16.mxu0 %v4070_v61 }
 0x647   :  { %1034 = vmatpush1.bf16.msra.mxu0 %v4068_v1 }
 0x648   :  { %1035 = vmatprep.subr.bf16.mxu0 %v4073_v9  ;;  %v4106_v9 = vld [vmem:[%s5709_s20 + $0x64] ss:$12 sps:$4 sm:$0xff]  }
 0x64b   :  { %1036 = vmatpush1.bf16.msra.mxu0 %v4071_v10  ;;  %v4104_v10 = vld [vmem:[%s5709_s20 + $0x60] ss:$12 sps:$4 sm:$0xff]  }
 0x64c   :  { %1037 = vmatprep.subr.bf16.mxu0 %v4076_v11  ;;  %v4110_v11 = vld [vmem:[%s5709_s20 + $0x4c] ss:$12 sps:$4 sm:$0xff]  }
 0x64f   :  { %1038 = vmatpush1.bf16.msra.mxu0 %v4074_v12  ;;  %v4108_v12 = vld [vmem:[%s5709_s20 + $0x48] ss:$12 sps:$4 sm:$0xff]  }
 0x702   :  { %v775_v25 = vpop.f32.mrf.mxu0 }
 0x703   :  { %v783_v29 = vrot.slane %v775_v25, 1  ;;  %v788_v35 = vrot.slane %v775_v25, 2 }
 0x704   :  { %v3935_v26 = vpop.f32.mrf.mxu0 }
 0x705   :  { %v4085_v26 = vld [vmem:[#allocation20 + $0x14] ss:$8 sps:$4 sm:$0xff]  }
 0x706   :  { %v778_v28 = vpop.f32.mrf.mxu0 }
 0x707   :  { %v795_v30 = vrot.slane %v778_v28, 1  ;;  %v805_v34 = vrot.slane %v778_v28, 2 }
 0x708   :  { %v3936_v31 = vpop.f32.mrf.mxu0 }
 0x709   :  { %799 = vrot.lane.b32.xlu0 %v795_v30, %s4649_s17  ;;  %v796_v32 = vsel %vm794_vm4, %v783_v29, %v795_v30 }
 0x70a   :  { %797 = vrot.lane.b32.xlu1 %v796_v32, %s4649_s17  ;;  %v4088_v32 = vld [vmem:[#allocation20 + $0x4] ss:$8 sps:$4 sm:$0xff]  }
 0x70d   :  { %784 = vrot.lane.b32.xlu0 %v783_v29, %s4649_s17 }
 0x70e   :  { %806 = vrot.lane.b32.xlu1 %v805_v34, %s4637_s5  ;;  %v4086_v34 = vld [vmem:[#allocation20] ss:$8 sps:$4 sm:$0xff]  }
 0x712   :  { %789 = vrot.lane.b32.xlu1 %v788_v35, %s4637_s5 }
 0x77b   :  { %v800_v36 = vpop.permute.xlu0 %799 }
 0x77c   :  { %v798_v38 = vpop.permute.xlu1 %797  ;;  %v804_v39 = vadd.f32 %v800_v36, %v778_v28  ;;  %v4083_v28 = vld [vmem:[#allocation20 + $0x10] ss:$8 sps:$4 sm:$0xff]  }
 0x77d   :  { %v803_v41 = vadd.f32 %v798_v38, %v775_v25 }
 0x77f   :  { %v785_v42 = vpop.permute.xlu0 %784 }
 0x780   :  { %v807_v43 = vpop.permute.xlu1 %806  ;;  %v787_v46 = vadd.f32 %v785_v42, %v775_v25 }
 0x781   :  { %v809_v44 = vadd.f32 %v807_v43, %v803_v41  ;;  %v810_v45 = vadd.f32 %v807_v43, %v804_v39 }
 0x783   :  { %v814_v47 = vrot.slane %v809_v44, 2  ;;  %v815_v48 = vrot.slane %v810_v45, 2 }
 0x784   :  { %v790_v49 = vpop.permute.xlu1 %789 }
 0x785   :  { %v816_v50 = vsel %vm813_vm5, %v814_v47, %v815_v48  ;;  %v792_v52 = vadd.f32 %v790_v49, %v787_v46 }
 0x787   :  { %v818_v53 = vsel %vm487_vm11, %v792_v52, %v816_v50 }
 0x788   :  { %v826_v54 = vadd.f32 %v3620_v51, %v818_v53 }
 0x78a   :  { %v827_v55 = vmax.f32 %v826_v54, 0.0 }
 0x78c   :  { %v828_v56 = vpack.c.bf16 %v827_v55, %v827_v55 }
 0x78e   :  { %3942 = vmatmul.mubr.msk.bf16.vlgmr.msra.gmra.mxu1 %vm312_vm1, %v828_v56 }
 0x78f   :  { %3947 = vmatprep.mubr.msk.bf16.mxu1 %vm912_vm9, %v4063_v57  ;;  %v3639_v57 = vld [vmem:[#allocation19] ss:$0 sm:$0xff] }
 0x84e   :  { %v889_v62 = vpop.f32.mrf.mxu1 }
 0x84f   :  { %v890_v63 = vadd.f32 %v3621_v58, %v889_v62 }
 0x850   :  { %v3943_v2 = vpop.f32.mrf.mxu1 }
 0x851   :  { %v895_v3 = vmax.f32 %v890_v63, 0.0 }
 0x852   :  { %v892_v4 = vpop.f32.mrf.mxu1 }
 0x853   :  { %897 = vrot.lane.b32.xlu0 %v895_v3, %s4637_s5  ;;  %v4094_v4 = vld [vmem:[%s5709_s20 + $0xac] ss:$12 sps:$4 sm:$0xff]  }
 0x854   :  { %v3944_v5 = vpop.f32.mrf.mxu1  ;;  %1484 = vmatprep.subr.bf16.mxu0 %v4094_v4 }
 0x855   :  { %v4098_v5 = vld [vmem:[%s5709_s20 + $0x94] ss:$12 sps:$4 sm:$0xff]  }
 0x8c5   :  { %v898_v6 = vpop.permute.xlu0 %897 }
 0x8c6   :  { %v900_v7 = vpack.c.bf16 %v898_v6, %v895_v3  ;;  %v4092_v3 = vld [vmem:[%s5709_s20 + $0xa8] ss:$12 sps:$4 sm:$0xff]   ;;  %v4096_v6 = vld [vmem:[%s5709_s20 + $0x90] ss:$12 sps:$4 sm:$0xff]  }
 0x8c8   :  { %3945 = vmatprep.subr.bf16.mxu1 %v900_v7 }
 0x8c9   :  { %3946 = vmatpush3.bf16.msra.mxu1 %v900_v7  ;;  %v4102_v7 = vld [vmem:[%s5709_s20 + $0x7c] ss:$12 sps:$4 sm:$0xff]  }
 0x8ca   :  { %1197 = vmatprep.subr.bf16.mxu1 %v4079_v21  ;;  %v1134_v21 = vld [vmem:[%s5707_s18] sm:$0x3] }
 0x8cc   :  { %3948 = vmatmul.mubr.msk.bf16.vlgmr.msra.gmra.mxu1 %vm912_vm9, %v4064_v8  ;;  %v4100_v8 = vld [vmem:[%s5709_s20 + $0x78] ss:$12 sps:$4 sm:$0xff]  }
 0x8cd   :  { %1221 = vmatprep.mubr.bf16.mxu1 %v4650_v13  ;;  %1198 = vmatpush1.bf16.msra.mxu1 %v4077_v20 }
 0x8ce   :  { %1199 = vmatprep.subr.bf16.mxu1 %v4082_v22 }
 0x8d1   :  { %1200 = vmatpush1.bf16.msra.mxu1 %v4080_v24 }
 0x8d2   :  { %1201 = vmatprep.subr.bf16.mxu1 %v4085_v26 }
 0x8d5   :  { %1202 = vmatpush1.bf16.msra.mxu1 %v4083_v28 }
 0x8d6   :  { %1203 = vmatprep.subr.bf16.mxu1 %v4088_v32 }
 0x8d9   :  { %1204 = vmatpush1.bf16.msra.mxu1 %v4086_v34 }
 0x8da   :  { %3951 = vmatprep.subr.bf16.mxu1 %v4647_v0 }
 0x98c   :  { %v3949_v14 = vpop.f32.mrf.mxu1 }
 0x98d   :  { %v968_v19 = vpack.c.bf16 %v3949_v14, %v3949_v14  ;;  %v4114_v14 = vld [vmem:[%s5709_s20 + $0x34] ss:$12 sps:$4 sm:$0xff]  }
 0x98e   :  { %v953_v15 = vpop.f32.mrf.mxu1 }
 0x990   :  { %v3950_v16 = vpop.f32.mrf.mxu1 }
 0x991   :  { %v4118_v16 = vld [vmem:[%s5709_s20 + $0x1c] ss:$12 sps:$4 sm:$0xff]  }
 0x992   :  { %v956_v17 = vpop.f32.mrf.mxu1 }
 0x993   :  { %v967_v18 = vpack.c.bf16 %v956_v17, %v953_v15  ;;  %v4112_v15 = vld [vmem:[%s5709_s20 + $0x30] ss:$12 sps:$4 sm:$0xff]   ;;  %v4116_v17 = vld [vmem:[%s5709_s20 + $0x18] ss:$12 sps:$4 sm:$0xff]  }
 0x995   :  { %3637 = vmatmul.mubr.msk.bf16.vlgmr.msra.gmra.mxu0 %vm397_vm2, %v967_v18  ;;  %v1136_v18 = vlaneseq }
 0x996   :  { %1065 = vmatprep.mubr.bf16.mxu0 %v4650_v13  ;;  %1485 = vmatpush1.bf16.msra.mxu0 %v4092_v3 }
 0x997   :  { %1486 = vmatprep.subr.bf16.mxu0 %v4098_v5 }
 0x99a   :  { %1487 = vmatpush1.bf16.msra.mxu0 %v4096_v6  ;;  %v4129_v6 = vld [vmem:[#allocation23 + $0x230] ss:$40 sps:$4 sm:$0xff]  }
 0x99b   :  { %1488 = vmatprep.subr.bf16.mxu0 %v4102_v7  ;;  %v4131_v7 = vld [vmem:[#allocation23 + $0x234] ss:$40 sps:$4 sm:$0xff]  }
 0x99d   :  { %3638 = vmatmul.mubr.msk.bf16.gmra.mxu0 %vm397_vm2, %v968_v19  ;;  %v5047_v19 = vshrl.u32 %v1136_v18, 7  ;;  %v4159_v18 = vld [vmem:[#allocation23 + $0xa0] ss:$40 sps:$4 sm:$0xff]  }
 0x99e   :  { %1516 = vmatprep.mubr.bf16.mxu0 %v4650_v13  ;;  %1489 = vmatpush1.bf16.msra.mxu0 %v4100_v8  ;;  %v4137_v8 = vld [vmem:[#allocation23 + $0x1e4] ss:$40 sps:$4 sm:$0xff]  }
 0x99f   :  { %1490 = vmatprep.subr.bf16.mxu0 %v4106_v9  ;;  %v5718_v20 = vsub.s32 1, %v5047_v19  ;;  %v4135_v9 = vld [vmem:[#allocation23 + $0x1e0] ss:$40 sps:$4 sm:$0xff]  }
 0x9a1   :  { %v1143_v24 = vrot.slane %v1134_v21, %v5718_v20 }
 0x9a2   :  { %1491 = vmatpush1.bf16.msra.mxu0 %v4104_v10  ;;  %v4143_v10 = vld [vmem:[#allocation23 + $0x194] ss:$40 sps:$4 sm:$0xff]  }
 0x9a3   :  { %1492 = vmatprep.subr.bf16.mxu0 %v4110_v11  ;;  %v4141_v11 = vld [vmem:[#allocation23 + $0x190] ss:$40 sps:$4 sm:$0xff]  }
 0x9a6   :  { %1493 = vmatpush1.bf16.msra.mxu0 %v4108_v12  ;;  %v4149_v12 = vld [vmem:[#allocation23 + $0x144] ss:$40 sps:$4 sm:$0xff]  }
 0x9a7   :  { %1494 = vmatprep.subr.bf16.mxu0 %v4114_v14  ;;  %v4147_v14 = vld [vmem:[#allocation23 + $0x140] ss:$40 sps:$4 sm:$0xff]  }
 0x9aa   :  { %1495 = vmatpush1.bf16.msra.mxu0 %v4112_v15  ;;  %v4155_v15 = vld [vmem:[#allocation23 + $0xf4] ss:$40 sps:$4 sm:$0xff]  }
 0x9ab   :  { %1496 = vmatprep.subr.bf16.mxu0 %v4118_v16  ;;  %v4153_v16 = vld [vmem:[#allocation23 + $0xf0] ss:$40 sps:$4 sm:$0xff]  }
 0x9ae   :  { %1497 = vmatpush1.bf16.msra.mxu0 %v4116_v17  ;;  %v4161_v17 = vld [vmem:[#allocation23 + $0xa4] ss:$40 sps:$4 sm:$0xff]  }
 0xa55   :  { %v1057_v23 = vpop.f32.mrf.mxu0 }
 0xa56   :  { %v1076_v44 = vrot.slane %v1057_v23, 1 }
 0xa57   :  { %v1059_v25 = vpop.f32.mrf.mxu0 }
 0xa58   :  { %v1085_v30 = vrot.slane %v1059_v25, 2 }
 0xa59   :  { %v1061_v27 = vpop.f32.mrf.mxu0 }
 0xa5a   :  { %v1077_v35 = vrot.slane %v1061_v27, 1 }
 0xa5b   :  { %v1063_v29 = vpop.f32.mrf.mxu0 }
 0xa5c   :  { %v1086_v31 = vrot.slane %v1063_v29, 2  ;;  %v1078_v47 = vsel %vm794_vm4, %v1076_v44, %v1077_v35  ;;  %v4090_v44 = vld [vmem:[%s5708_s19 + $0x8] sm:$0xff]  }
 0xa5d   :  { %v1067_v33 = vpop.f32.mrf.mxu0 }
 0xa5e   :  { %v1091_v36 = vrot.slane %v1067_v33, 1  ;;  %v1087_v38 = vsel %vm813_vm5, %v1085_v30, %v1086_v31 }
 0xa5f   :  { %v1069_v39 = vpop.f32.mrf.mxu0 }
 0xa60   :  { %v1102_v41 = vrot.slane %v1069_v39, 2  ;;  %1095 = vrot.lane.b32.xlu0 %v1091_v36, %s4637_s5  ;;  %v1092_v42 = vsel %vm794_vm4, %v1077_v35, %v1091_v36 }
 0xa61   :  { %1093 = vrot.lane.b32.xlu1 %v1092_v42, %s4637_s5  ;;  %v1071_v43 = vpop.f32.mrf.mxu0  ;;  %v4095_v42 = vld [vmem:[%s5709_s20 + $0xb0] ss:$12 sps:$4 sm:$0xff]  }
 0xa62   :  { %v1103_v45 = vsel %vm813_vm5, %v1086_v31, %v1102_v41  ;;  %v4099_v43 = vld [vmem:[%s5709_s20 + $0x98] ss:$12 sps:$4 sm:$0xff]  }
 0xa63   :  { %v1072_v46 = vpop.f32.mrf.mxu0 }
 0xa64   :  { %v4107_v46 = vld [vmem:[%s5709_s20 + $0x68] ss:$12 sps:$4 sm:$0xff]  }
 0xa65   :  { %1079 = vrot.lane.b32.xlu1 %v1078_v47, %s4637_s5  ;;  %v4091_v47 = vld [vmem:[%s5708_s19 + $0x10] ss:$0 sps:$4 sm:$0x33]  }
 0xad2   :  { %v1096_v48 = vpop.permute.xlu0 %1095 }
 0xad3   :  { %v1100_v49 = vadd.f32 %v1096_v48, %v1067_v33  ;;  %v1094_v50 = vpop.permute.xlu1 %1093  ;;  %v4111_v48 = vld [vmem:[%s5709_s20 + $0x50] ss:$12 sps:$4 sm:$0xff]  }
 0xad4   :  { %v1099_v51 = vadd.f32 %v1094_v50, %v1061_v27  ;;  %v4119_v50 = vld [vmem:[%s5709_s20 + $0x20] ss:$12 sps:$4 sm:$0xff]  }
 0xad5   :  { %v1107_v52 = vadd.f32 %v1102_v41, %v1100_v49  ;;  %v4089_v41 = vld [vmem:[%s5708_s19] sm:$0xff]  }
 0xad6   :  { %v1106_v53 = vadd.f32 %v1103_v45, %v1099_v51  ;;  %v4103_v45 = vld [vmem:[%s5709_s20 + $0x80] ss:$12 sps:$4 sm:$0xff]   ;;  %v4115_v49 = vld [vmem:[%s5709_s20 + $0x38] ss:$12 sps:$4 sm:$0xff]  }
 0xad7   :  { %v1111_v54 = vrot.slane %v1107_v52, 2  ;;  %v1080_v55 = vpop.permute.xlu1 %1079  ;;  %v4122_v51 = vld [vmem:[%s5709_s20 + $0x4] ss:$12 sps:$4 sm:$0xff]   ;;  %v4120_v52 = vld [vmem:[%s5709_s20] ss:$12 sps:$4 sm:$0xff]  }
 0xad8   :  { %v1110_v56 = vrot.slane %v1106_v53, 2  ;;  %v1082_v58 = vadd.f32 %v1080_v55, %v1057_v23  ;;  %v1138_v23 = vsub.s32 0, %v5047_v19  ;;  %v4123_v53 = vld [vmem:[%s5709_s20 + $0x8] ss:$12 sps:$4 sm:$0xff]   ;;  %1498 = vmatprep.subr.bf16.mxu0 %v4122_v51 }
 0xad9   :  { %1499 = vmatpush1.bf16.msra.mxu0 %v4120_v52 }
 0xada   :  { %v1089_v59 = vadd.f32 %v1087_v38, %v1082_v58  ;;  %v1112_v60 = vsel %vm813_vm5, %v1110_v56, %v1111_v54  ;;  %v1139_v27 = vrot.slane %v1134_v21, %v1138_v23  ;;  %3995 = vmatprep.subr.bf16.mxu0 %v4647_v0  ;;  %v4167_v21 = vld [vmem:[#allocation23 + $0x54] ss:$40 sps:$4 sm:$0xff]  }
 0xadb   :  { %v1122_v61 = vadd.f32 %v3639_v57, %v1112_v60 }
 0xadc   :  { %v1121_v62 = vadd.f32 %v3639_v57, %v1089_v59 }
 0xadd   :  { %v1124_v63 = vmax.f32 %v1122_v61, 0.0 }
 0xade   :  { %v1123_v1 = vmax.f32 %v1121_v62, 0.0 }
 0xae0   :  { %v1125_v2 = vpack.c.bf16 %v1124_v63, %v1123_v1 }
 0xae2   :  { %3648 = vmatmul.mubr.msk.bf16.vlgmr.msra.gmra.mxu1 %vm397_vm2, %v1125_v2 }
 0xae3   :  { %3955 = vmatprep.mubr.msk.bf16.mxu1 %vm4648_vm0, %v4647_v0 }
 0xba2   :  { %v1223_v22 = vpop.f32.mrf.mxu1 }
 0xba3   :  { %v1224_v32 = vadd.f32 %v1223_v22, %v1139_v27  ;;  %v4165_v22 = vld [vmem:[#allocation23 + $0x50] ss:$40 sps:$4 sm:$0xff]  }
 0xba4   :  { %v1225_v25 = vpop.f32.mrf.mxu1 }
 0xba5   :  { %v1226_v28 = vadd.f32 %v1225_v25, %v1143_v24  ;;  %v1232_v38 = vmax.f32 %v1224_v32, 0.0 }
 0xba6   :  { %v1227_v26 = vpop.f32.mrf.mxu1 }
 0xba7   :  { %v1228_v30 = vadd.f32 %v1227_v26, %v1139_v27  ;;  %v1233_v33 = vmax.f32 %v1226_v28, 0.0 }
 0xba8   :  { %v1229_v29 = vpop.f32.mrf.mxu1 }
 0xba9   :  { %v1230_v31 = vadd.f32 %v1229_v29, %v1143_v24  ;;  %v1234_v35 = vmax.f32 %v1228_v30, 0.0 }
 0xbab   :  { %v1235_v34 = vmax.f32 %v1230_v31, 0.0  ;;  %v1236_v39 = vpack.c.bf16 %v1234_v35, %v1232_v38 }
 0xbad   :  { %v1237_v36 = vpack.c.bf16 %v1235_v34, %v1233_v33 }
 0xbaf   :  { %3952 = vmatpush3.bf16.msra.mxu1 %v1237_v36 }
 0xbb0   :  { %3953 = vmatprep.subr.bf16.mxu1 %v4647_v0 }
 0xbb3   :  { %3954 = vmatpush3.bf16.msra.mxu1 %v1236_v39 }
 0xbb4   :  { %3967 = vmatprep.subr.bf16.mxu1 %v4647_v0 }
 0xbb6   :  { %3956 = vmatmul.mubr.msk.bf16.vlgmr.msra.gmra.mxu1 %vm312_vm1, %v4089_v41 }
 0xbb7   :  { %3959 = vmatprep.mubr.msk.bf16.mxu1 %vm4648_vm0, %v4647_v0  ;;  %3968 = vmatpush3.bf16.msra.mxu1 %v4095_v42 }
 0xbb8   :  { %3969 = vmatprep.subr.bf16.mxu1 %v4647_v0 }
 0xbbb   :  { %3970 = vmatpush3.bf16.msra.mxu1 %v4099_v43 }
 0xbbc   :  { %3971 = vmatprep.subr.bf16.mxu1 %v4647_v0 }
 0xbbe   :  { %3960 = vmatmul.mubr.msk.bf16.gmra.mxu1 %vm312_vm1, %v4090_v44 }
 0xbbf   :  { %3963 = vmatprep.mubr.msk.bf16.mxu1 %vm4648_vm0, %v4647_v0  ;;  %3972 = vmatpush3.bf16.msra.mxu1 %v4103_v45 }
 0xbc0   :  { %3973 = vmatprep.subr.bf16.mxu1 %v4647_v0 }
 0xbc3   :  { %3974 = vmatpush3.bf16.msra.mxu1 %v4107_v46 }
 0xbc4   :  { %3975 = vmatprep.subr.bf16.mxu1 %v4647_v0 }
 0xbc6   :  { %3964 = vmatmul.mubr.msk.bf16.gmra.mxu1 %vm312_vm1, %v4091_v47 }
 0xbc7   :  { %3976 = vmatpush3.bf16.msra.mxu1 %v4111_v48  ;;  %3983 = vmatprep.mubr.msk.bf16.mxu1 %vm4648_vm0, %v4647_v0 }
 0xbc8   :  { %3977 = vmatprep.subr.bf16.mxu1 %v4647_v0 }
 0xbcb   :  { %3978 = vmatpush3.bf16.msra.mxu1 %v4115_v49 }
 0xbcc   :  { %3979 = vmatprep.subr.bf16.mxu1 %v4647_v0 }
 0xbcf   :  { %3980 = vmatpush3.bf16.msra.mxu1 %v4119_v50 }
 0xbd0   :  { %3981 = vmatprep.subr.bf16.mxu1 %v4647_v0 }
 0xbd3   :  { %3982 = vmatpush3.bf16.msra.mxu1 %v4123_v53 }
 0xbd4   :  { %2280 = vmatprep.subr.bf16.mxu1 %v4131_v7 }
 0xc76   :  { %v1299_v54 = vpop.f32.mrf.mxu1 }
 0xc78   :  { %v3957_v55 = vpop.f32.mrf.mxu1 }
 0xc7a   :  { %v1302_v56 = vpop.f32.mrf.mxu1 }
 0xc7b   :  { %v1321_v57 = vpack.c.bf16 %v1302_v56, %v1299_v54 }
 0xc7c   :  { %v3958_v58 = vpop.f32.mrf.mxu1 }
 0xc7d   :  { %1517 = vmatmul.mubr.bf16.vlgmr.msra.gmra.mxu0 %v1321_v57  ;;  %3984 = vmatmul.mubr.bf16.vlgmr.msra.gmra.mxu1 %v1321_v57 }
 0xc7e   :  { %v1307_v59 = vpop.f32.mrf.mxu1  ;;  %1526 = vmatprep.mubr.bf16.mxu0 %v4650_v13  ;;  %3987 = vmatprep.mubr.msk.bf16.mxu1 %vm4648_vm0, %v4647_v0 }
 0xc7f   :  { %2281 = vmatpush1.bf16.msra.mxu1 %v4129_v6 }
 0xc80   :  { %v3961_v60 = vpop.f32.mrf.mxu1  ;;  %2282 = vmatprep.subr.bf16.mxu1 %v4137_v8 }
 0xc82   :  { %v1310_v61 = vpop.f32.mrf.mxu1 }
 0xc83   :  { %v1322_v62 = vpack.c.bf16 %v1310_v61, %v1307_v59  ;;  %2283 = vmatpush1.bf16.msra.mxu1 %v4135_v9 }
 0xc84   :  { %v3962_v63 = vpop.f32.mrf.mxu1  ;;  %2284 = vmatprep.subr.bf16.mxu1 %v4143_v10 }
 0xc85   :  { %1527 = vmatmul.mubr.bf16.gmra.mxu0 %v1322_v62  ;;  %3988 = vmatmul.mubr.bf16.gmra.mxu1 %v1322_v62 }
 0xc86   :  { %v1315_v1 = vpop.f32.mrf.mxu1  ;;  %1536 = vmatprep.mubr.bf16.mxu0 %v4650_v13  ;;  %3991 = vmatprep.mubr.msk.bf16.mxu1 %vm4648_vm0, %v4647_v0 }
 0xc87   :  { %v1323_v3 = vpack.c.bf16 %v1315_v1, %v1315_v1  ;;  %2285 = vmatpush1.bf16.msra.mxu1 %v4141_v11 }
 0xc88   :  { %v3965_v2 = vpop.f32.mrf.mxu1  ;;  %2286 = vmatprep.subr.bf16.mxu1 %v4149_v12 }
 0xc8a   :  { %v1318_v4 = vpop.f32.mrf.mxu1 }
 0xc8b   :  { %2287 = vmatpush1.bf16.msra.mxu1 %v4147_v14 }
 0xc8c   :  { %v3966_v5 = vpop.f32.mrf.mxu1  ;;  %2288 = vmatprep.subr.bf16.mxu1 %v4155_v15 }
 0xc8d   :  { %1537 = vmatmul.mubr.bf16.gmra.mxu0 %v1323_v3  ;;  %3992 = vmatmul.mubr.bf16.gmra.mxu1 %v1323_v3 }
 0xc8e   :  { %3999 = vmatprep.mubr.msk.bf16.mxu0 %vm4648_vm0, %v4647_v0  ;;  %2312 = vmatprep.mubr.bf16.mxu1 %v4650_v13 }
 0xc8f   :  { %2289 = vmatpush1.bf16.msra.mxu1 %v4153_v16 }
 0xc90   :  { %2290 = vmatprep.subr.bf16.mxu1 %v4161_v17 }
 0xc93   :  { %2291 = vmatpush1.bf16.msra.mxu1 %v4159_v18 }
 0xc94   :  { %2292 = vmatprep.subr.bf16.mxu1 %v4167_v21 }
 0xc97   :  { %2293 = vmatpush1.bf16.msra.mxu1 %v4165_v22 }
 0xd3d   :  { %v1518_v24 = vpop.f32.mrf.mxu0  ;;  %v1579_v25 = vpop.f32.mrf.mxu1 }
 0xd3e   :  { %v1616_v9 = vrot.slane %v1579_v25, 2 }
 0xd3f   :  { %v1520_v26 = vpop.f32.mrf.mxu0  ;;  %v3985_v27 = vpop.f32.mrf.mxu1 }
 0xd40   :  { %v1604_v49 = vrot.slane %v1520_v26, 1  ;;  %v3679_v26 = vld [vmem:[#allocation22] ss:$0 sm:$0xff] }
 0xd41   :  { %v1522_v28 = vpop.f32.mrf.mxu0  ;;  %v1582_v29 = vpop.f32.mrf.mxu1 }
 0xd42   :  { %v1617_v1 = vrot.slane %v1582_v29, 2 }
 0xd43   :  { %v1524_v30 = vpop.f32.mrf.mxu0  ;;  %v3986_v31 = vpop.f32.mrf.mxu1 }
 0xd44   :  { %v1605_v44 = vrot.slane %v1524_v30, 1  ;;  %v1618_v15 = vsel %vm813_vm5, %v1616_v9, %v1617_v1  ;;  %v4186_v9 = vld [vmem:[#allocation23 + $0x1f8] ss:$40 sps:$4 sm:$0xff]  }
 0xd45   :  { %v1528_v32 = vpop.f32.mrf.mxu0  ;;  %v1587_v33 = vpop.f32.mrf.mxu1 }
 0xd46   :  { %v1619_v54 = vrot.slane %v1587_v33, 2  ;;  %v1606_v57 = vsel %vm794_vm4, %v1604_v49, %v1605_v44  ;;  %v4156_v49 = vld [vmem:[#allocation23 + $0xf8] ss:$40 sps:$4 sm:$0xff]  }
 0xd47   :  { %v1530_v34 = vpop.f32.mrf.mxu0  ;;  %v3989_v35 = vpop.f32.mrf.mxu1  ;;  %v1611_v6 = vadd.f32 %v1606_v57, %v1518_v24  ;;  %v4176_v57 = vld [vmem:[#allocation23 + $0xc] ss:$40 sps:$4 sm:$0xff]  }
 0xd48   :  { %v1607_v39 = vrot.slane %v1530_v34, 1  ;;  %v1620_v10 = vsel %vm813_vm5, %v1617_v1, %v1619_v54  ;;  %v4134_v34 = vld [vmem:[#allocation23 + $0x23c] ss:$40 sps:$4 sm:$0xff]  }
 0xd49   :  { %v1532_v36 = vpop.f32.mrf.mxu0  ;;  %v1590_v38 = vpop.f32.mrf.mxu1  ;;  %v1623_v18 = vadd.f32 %v1618_v15, %v1611_v6  ;;  %v4188_v6 = vld [vmem:[#allocation23 + $0x1fc] ss:$40 sps:$4 sm:$0xff]  }
 0xd4a   :  { %v1639_v47 = vrot.slane %v1590_v38, 2  ;;  %v1608_v50 = vsel %vm794_vm4, %v1605_v44, %v1607_v39  ;;  %v4132_v38 = vld [vmem:[#allocation23 + $0x238] ss:$40 sps:$4 sm:$0xff]  }
 0xd4b   :  { %v1534_v41 = vpop.f32.mrf.mxu0  ;;  %v3990_v42 = vpop.f32.mrf.mxu1  ;;  %v1612_v60 = vadd.f32 %v1608_v50, %v1522_v28  ;;  %v1666_v30 = vadd.f32 %v3679_v26, %v1623_v18  ;;  %v4144_v44 = vld [vmem:[#allocation23 + $0x198] ss:$40 sps:$4 sm:$0xff]   ;;  %v4164_v50 = vld [vmem:[#allocation23 + $0xac] ss:$40 sps:$4 sm:$0xff]  }
 0xd4c   :  { %v1627_v43 = vrot.slane %v1534_v41, 1  ;;  %v1640_v61 = vsel %vm813_vm5, %v1619_v54, %v1639_v47  ;;  %v4138_v41 = vld [vmem:[#allocation23 + $0x1e8] ss:$40 sps:$4 sm:$0xff]   ;;  %v4146_v42 = vld [vmem:[#allocation23 + $0x19c] ss:$40 sps:$4 sm:$0xff]  }
 0xd4d   :  { %v1538_v45 = vpop.f32.mrf.mxu0  ;;  %v1595_v46 = vpop.f32.mrf.mxu1  ;;  %v1624_v12 = vadd.f32 %v1620_v10, %v1612_v60  ;;  %v1670_v33 = vmax.f32 %v1666_v30, 0.0  ;;  %v4168_v54 = vld [vmem:[#allocation23 + $0x58] ss:$40 sps:$4 sm:$0xff]   ;;  %v4179_v60 = vld [vmem:[#allocation23 + $0x244] ss:$40 sps:$4 sm:$0xff]  }
 0xd4e   :  { %v1628_v48 = vsel %vm794_vm4, %v1607_v39, %v1627_v43  ;;  %v1641_v55 = vrot.slane %v1595_v46, 2  ;;  %v4140_v39 = vld [vmem:[#allocation23 + $0x1ec] ss:$40 sps:$4 sm:$0xff]   ;;  %v4150_v46 = vld [vmem:[#allocation23 + $0x148] ss:$40 sps:$4 sm:$0xff]  }
 0xd4f   :  { %v1634_v51 = vadd.f32 %v1628_v48, %v1528_v32  ;;  %v1540_v52 = vpop.f32.mrf.mxu0  ;;  %v3993_v53 = vpop.f32.mrf.mxu1  ;;  %v1667_v28 = vadd.f32 %v3679_v26, %v1624_v12  ;;  %v4126_v48 = vld [vmem:[%s5711_s22 + $0x10] sm:$0xff]   ;;  %v4194_v12 = vld [vmem:[#allocation23 + $0x1ac] ss:$40 sps:$4 sm:$0xff]  }
 0xd50   :  { %v1629_v56 = vrot.slane %v1540_v52, 1  ;;  %v1642_v7 = vsel %vm813_vm5, %v1639_v47, %v1641_v55  ;;  %v4158_v47 = vld [vmem:[#allocation23 + $0xfc] ss:$40 sps:$4 sm:$0xff]   ;;  %v4127_v53 = vld [vmem:[%s5711_s22 + $0x18] sm:$0xff]  }
 0xd51   :  { %v1542_v58 = vpop.f32.mrf.mxu0  ;;  %v1598_v59 = vpop.f32.mrf.mxu1  ;;  %v1646_v2 = vadd.f32 %v1640_v61, %v1634_v51  ;;  %v1671_v32 = vmax.f32 %v1667_v28, 0.0  ;;  %v4162_v51 = vld [vmem:[#allocation23 + $0xa8] ss:$40 sps:$4 sm:$0xff]   ;;  %v4170_v52 = vld [vmem:[#allocation23 + $0x5c] ss:$40 sps:$4 sm:$0xff]  }
 0xd52   :  { %v1630_v62 = vsel %vm794_vm4, %v1627_v43, %v1629_v56  ;;  %v1636_v63 = vadd.f32 %v1629_v56, %v1538_v45  ;;  %v4125_v43 = vld [vmem:[%s5711_s22 + $0x8] sm:$0xff]   ;;  %v4152_v45 = vld [vmem:[#allocation23 + $0x14c] ss:$40 sps:$4 sm:$0xff]   ;;  %v4174_v59 = vld [vmem:[#allocation23 + $0x8] ss:$40 sps:$4 sm:$0xff]  }
 0xd53   :  { %v1635_v3 = vadd.f32 %v1630_v62, %v1532_v36  ;;  %v1543_v4 = vpop.f32.mrf.mxu0  ;;  %v3994_v5 = vpop.f32.mrf.mxu1  ;;  %v1652_v16 = vrot.slane %v1646_v2, 2  ;;  %v1683_v35 = vpack.c.bf16 %v1671_v32, %v1670_v33  ;;  %v4124_v36 = vld [vmem:[%s5711_s22] sm:$0xff]   ;;  %v4173_v56 = vld [vmem:[#allocation23 + $0x4] ss:$40 sps:$4 sm:$0xff]   ;;  %v4171_v58 = vld [vmem:[#allocation23] ss:$40 sps:$4 sm:$0xff]  }
 0xd54   :  { %v1648_v8 = vadd.f32 %v1641_v55, %v1636_v63  ;;  %v4128_v55 = vld [vmem:[%s5711_s22 + $0x20] ss:$0 sps:$4 sm:$0xff]   ;;  %2294 = vmatprep.subr.bf16.mxu1 %v4173_v56  ;;  %v4182_v61 = vld [vmem:[#allocation23 + $0x24c] ss:$40 sps:$4 sm:$0xff]   ;;  %v4177_v2 = vld [vmem:[#allocation23 + $0x240] ss:$40 sps:$4 sm:$0xff]  }
 0xd55   :  { %v1647_v11 = vadd.f32 %v1642_v7, %v1635_v3  ;;  %2295 = vmatpush1.bf16.msra.mxu1 %v4171_v58  ;;  %v4180_v3 = vld [vmem:[#allocation23 + $0x248] ss:$40 sps:$4 sm:$0xff]   ;;  %v4185_v5 = vld [vmem:[#allocation23 + $0x1f4] ss:$40 sps:$4 sm:$0xff]  }
 0xd56   :  { %v1655_v14 = vrot.slane %v1648_v8, 2  ;;  %2442 = vmatprep.subr.bf16.mxu1 %v4179_v60  ;;  %v4183_v8 = vld [vmem:[#allocation23 + $0x1f0] ss:$40 sps:$4 sm:$0xff]   ;;  %v4201_v32 = vld [vmem:[#allocation23 + $0x100] ss:$40 sps:$4 sm:$0xff]  }
 0xd57   :  { %v1653_v17 = vrot.slane %v1647_v11, 2  ;;  %v4191_v11 = vld [vmem:[#allocation23 + $0x1a4] ss:$40 sps:$4 sm:$0xff]   ;;  %v4204_v33 = vld [vmem:[#allocation23 + $0x108] ss:$40 sps:$4 sm:$0xff]  }
 0xd58   :  { %v4227_v56 = vld [vmem:[#allocation23 + $0x254] ss:$40 sps:$4 sm:$0xff]   ;;  %v4225_v60 = vld [vmem:[#allocation23 + $0x250] ss:$40 sps:$4 sm:$0xff]  }
 0xd59   :  { %v1656_v21 = vsel %vm813_vm5, %v1653_v17, %v1655_v14  ;;  %v1654_v22 = vsel %vm813_vm5, %v1652_v16, %v1653_v17  ;;  %v4189_v16 = vld [vmem:[#allocation23 + $0x1a0] ss:$40 sps:$4 sm:$0xff]  }
 0xd5a   :  { %v1668_v24 = vadd.f32 %v3679_v26, %v1654_v22  ;;  %v1669_v27 = vadd.f32 %v3679_v26, %v1656_v21  ;;  %v4192_v17 = vld [vmem:[#allocation23 + $0x1a8] ss:$40 sps:$4 sm:$0xff]   ;;  %v4197_v21 = vld [vmem:[#allocation23 + $0x154] ss:$40 sps:$4 sm:$0xff]  }
 0xd5b   :  { %v4200_v22 = vld [vmem:[#allocation23 + $0x15c] ss:$40 sps:$4 sm:$0xff]  }
 0xd5c   :  { %v1672_v29 = vmax.f32 %v1668_v24, 0.0  ;;  %v1673_v25 = vmax.f32 %v1669_v27, 0.0  ;;  %v4195_v24 = vld [vmem:[#allocation23 + $0x150] ss:$40 sps:$4 sm:$0xff]  }
 0xd5d   :  { %v4198_v27 = vld [vmem:[#allocation23 + $0x158] ss:$40 sps:$4 sm:$0xff]  }
 0xd5e   :  { %v1684_v31 = vpack.c.bf16 %v1673_v25, %v1672_v29  ;;  %v4203_v29 = vld [vmem:[#allocation23 + $0x104] ss:$40 sps:$4 sm:$0xff]  }
 0xd5f   :  { %v4206_v25 = vld [vmem:[#allocation23 + $0x10c] ss:$40 sps:$4 sm:$0xff]  }
 0xd60   :  { %3996 = vmatpush3.bf16.msra.mxu0 %v1684_v31 }
 0xd61   :  { %3997 = vmatprep.subr.bf16.mxu0 %v4647_v0 }
 0xd64   :  { %3998 = vmatpush3.bf16.msra.mxu0 %v1683_v35  ;;  %v4209_v35 = vld [vmem:[#allocation23 + $0xb4] ss:$40 sps:$4 sm:$0xff]  }
 0xd65   :  { %2361 = vmatprep.subr.bf16.mxu0 %v4134_v34 }
 0xd67   :  { %4000 = vmatmul.mubr.msk.bf16.vlgmr.msra.gmra.mxu0 %vm312_vm1, %v4124_v36  ;;  %v4212_v36 = vld [vmem:[#allocation23 + $0xbc] ss:$40 sps:$4 sm:$0xff]  }
 0xd68   :  { %4003 = vmatprep.mubr.msk.bf16.mxu0 %vm4648_vm0, %v4647_v0  ;;  %2362 = vmatpush1.bf16.msra.mxu0 %v4132_v38 }
 0xd69   :  { %2363 = vmatprep.subr.bf16.mxu0 %v4140_v39  ;;  %v4207_v39 = vld [vmem:[#allocation23 + $0xb0] ss:$40 sps:$4 sm:$0xff]  }
 0xd6c   :  { %2364 = vmatpush1.bf16.msra.mxu0 %v4138_v41  ;;  %v4210_v41 = vld [vmem:[#allocation23 + $0xb8] ss:$40 sps:$4 sm:$0xff]  }
 0xd6d   :  { %2365 = vmatprep.subr.bf16.mxu0 %v4146_v42 }
 0xd6f   :  { %4004 = vmatmul.mubr.msk.bf16.gmra.mxu0 %vm312_vm1, %v4125_v43  ;;  %v4215_v43 = vld [vmem:[#allocation23 + $0x64] ss:$40 sps:$4 sm:$0xff]  }
 0xd70   :  { %4007 = vmatprep.mubr.msk.bf16.mxu0 %vm4648_vm0, %v4647_v0  ;;  %2366 = vmatpush1.bf16.msra.mxu0 %v4144_v44  ;;  %v4218_v44 = vld [vmem:[#allocation23 + $0x6c] ss:$40 sps:$4 sm:$0xff]  }
 0xd71   :  { %2367 = vmatprep.subr.bf16.mxu0 %v4152_v45 }
 0xd74   :  { %2368 = vmatpush1.bf16.msra.mxu0 %v4150_v46 }
 0xd75   :  { %2369 = vmatprep.subr.bf16.mxu0 %v4158_v47  ;;  %v4213_v47 = vld [vmem:[#allocation23 + $0x60] ss:$40 sps:$4 sm:$0xff]  }
 0xd77   :  { %4008 = vmatmul.mubr.msk.bf16.gmra.mxu0 %vm312_vm1, %v4126_v48  ;;  %v4216_v48 = vld [vmem:[#allocation23 + $0x68] ss:$40 sps:$4 sm:$0xff]  }
 0xd78   :  { %4011 = vmatprep.mubr.msk.bf16.mxu0 %vm4648_vm0, %v4647_v0  ;;  %2370 = vmatpush1.bf16.msra.mxu0 %v4156_v49 }
 0xd79   :  { %2371 = vmatprep.subr.bf16.mxu0 %v4164_v50  ;;  %v4221_v50 = vld [vmem:[#allocation23 + $0x14] ss:$40 sps:$4 sm:$0xff]  }
 0xd7c   :  { %2372 = vmatpush1.bf16.msra.mxu0 %v4162_v51  ;;  %v4224_v51 = vld [vmem:[#allocation23 + $0x1c] ss:$40 sps:$4 sm:$0xff]  }
 0xd7d   :  { %2373 = vmatprep.subr.bf16.mxu0 %v4170_v52 }
 0xd7f   :  { %4012 = vmatmul.mubr.msk.bf16.gmra.mxu0 %vm312_vm1, %v4127_v53  ;;  %v4219_v53 = vld [vmem:[#allocation23 + $0x10] ss:$40 sps:$4 sm:$0xff]  }
 0xd80   :  { %4015 = vmatprep.mubr.msk.bf16.mxu0 %vm4648_vm0, %v4647_v0  ;;  %2374 = vmatpush1.bf16.msra.mxu0 %v4168_v54  ;;  %v4222_v54 = vld [vmem:[#allocation23 + $0x18] ss:$40 sps:$4 sm:$0xff]   ;;  %vm2783_vm0 = vcmask 1044480  }
 0xd81   :  { %2375 = vmatprep.subr.bf16.mxu0 %v4176_v57 }
 0xd84   :  { %2376 = vmatpush1.bf16.msra.mxu0 %v4174_v59 }
 0xd85   :  { %2523 = vmatprep.subr.bf16.mxu0 %v4182_v61  ;;  %v4230_v61 = vld [vmem:[#allocation23 + $0x204] ss:$40 sps:$4 sm:$0xff]  }
 0xd87   :  { %4016 = vmatmul.mubr.msk.bf16.gmra.mxu0 %vm312_vm1, %v4128_v55 }
 0xd88   :  { %2393 = vmatprep.mubr.bf16.mxu0 %v4650_v13 }
 0xe27   :  { %v1757_v0 = vpop.f32.mrf.mxu0 }
 0xe29   :  { %v4001_v62 = vpop.f32.mrf.mxu0 }
 0xe2a   :  { %v4233_v62 = vld [vmem:[#allocation23 + $0x1b4] ss:$40 sps:$4 sm:$0xff]  }
 0xe2b   :  { %v1760_v63 = vpop.f32.mrf.mxu0 }
 0xe2c   :  { %v5165_v1 = vpack.c.bf16 %v1760_v63, %v1757_v0  ;;  %v4228_v0 = vld [vmem:[#allocation23 + $0x200] ss:$40 sps:$4 sm:$0xff]   ;;  %v4231_v63 = vld [vmem:[#allocation23 + $0x1b0] ss:$40 sps:$4 sm:$0xff]  }
 0xe2d   :  { %v4002_v4 = vpop.f32.mrf.mxu0 }
 0xe2e   :  { %2313 = vmatmul.mubr.bf16.vlgmr.msra.gmra.mxu1 %v5165_v1  ;;  %2394 = vmatmul.mubr.bf16.vlgmr.msra.gmra.mxu0 %v5165_v1  ;;  %v4239_v4 = vld [vmem:[#allocation23 + $0x114] ss:$40 sps:$4 sm:$0xff]  }
 0xe2f   :  { %v1765_v7 = vpop.f32.mrf.mxu0  ;;  %2322 = vmatprep.mubr.bf16.mxu1 %v4650_v13  ;;  %2403 = vmatprep.mubr.bf16.mxu0 %v4650_v13 }
 0xe30   :  { %2443 = vmatpush1.bf16.msra.mxu1 %v4177_v2  ;;  %2524 = vmatpush1.bf16.msra.mxu0 %v4180_v3  ;;  %v4236_v2 = vld [vmem:[#allocation23 + $0x164] ss:$40 sps:$4 sm:$0xff]   ;;  %v4234_v3 = vld [vmem:[#allocation23 + $0x160] ss:$40 sps:$4 sm:$0xff]  }
 0xe31   :  { %v4005_v10 = vpop.f32.mrf.mxu0  ;;  %2444 = vmatprep.subr.bf16.mxu1 %v4185_v5  ;;  %2525 = vmatprep.subr.bf16.mxu0 %v4188_v6  ;;  %v4237_v5 = vld [vmem:[#allocation23 + $0x110] ss:$40 sps:$4 sm:$0xff]   ;;  %v4242_v6 = vld [vmem:[#allocation23 + $0xc4] ss:$40 sps:$4 sm:$0xff]  }
 0xe32   :  { %v4248_v10 = vld [vmem:[#allocation23 + $0x24] ss:$40 sps:$4 sm:$0xff]  }
 0xe33   :  { %v1768_v14 = vpop.f32.mrf.mxu0 }
 0xe34   :  { %v5171_v15 = vpack.c.bf16 %v1768_v14, %v1765_v7  ;;  %2445 = vmatpush1.bf16.msra.mxu1 %v4183_v8  ;;  %2526 = vmatpush1.bf16.msra.mxu0 %v4186_v9  ;;  %v4240_v7 = vld [vmem:[#allocation23 + $0xc0] ss:$40 sps:$4 sm:$0xff]   ;;  %v4245_v8 = vld [vmem:[#allocation23 + $0x74] ss:$40 sps:$4 sm:$0xff]   ;;  %v4243_v9 = vld [vmem:[#allocation23 + $0x70] ss:$40 sps:$4 sm:$0xff]  }
 0xe35   :  { %v4006_v18 = vpop.f32.mrf.mxu0  ;;  %2446 = vmatprep.subr.bf16.mxu1 %v4191_v11  ;;  %2527 = vmatprep.subr.bf16.mxu0 %v4194_v12  ;;  %v4246_v11 = vld [vmem:[#allocation23 + $0x20] ss:$40 sps:$4 sm:$0xff]  }
 0xe36   :  { %2323 = vmatmul.mubr.bf16.gmra.mxu1 %v5171_v15  ;;  %2404 = vmatmul.mubr.bf16.gmra.mxu0 %v5171_v15  ;;  %v4250_v12 = vld [vmem:[%s5714_s25 + $0x38] sm:$0xff]   ;;  %v4251_v14 = vld [vmem:[%s5714_s25 + $0x70] sm:$0xff]   ;;  %v4256_v18 = vld [vmem:[%s5714_s25 + $0x20] sm:$0xff]  }
 0xe37   :  { %v1773_v26 = vpop.f32.mrf.mxu0  ;;  %2332 = vmatprep.mubr.bf16.mxu1 %v4650_v13  ;;  %2413 = vmatprep.mubr.bf16.mxu0 %v4650_v13 }
 0xe38   :  { %2447 = vmatpush1.bf16.msra.mxu1 %v4189_v16  ;;  %2528 = vmatpush1.bf16.msra.mxu0 %v4192_v17  ;;  %v4254_v16 = vld [vmem:[%s5714_s25 + $0x28] sm:$0xff]   ;;  %v4255_v17 = vld [vmem:[%s5714_s25 + $0x60] sm:$0xff]  }
 0xe39   :  { %v4009_v28 = vpop.f32.mrf.mxu0  ;;  %2448 = vmatprep.subr.bf16.mxu1 %v4197_v21  ;;  %2529 = vmatprep.subr.bf16.mxu0 %v4200_v22  ;;  %v4257_v21 = vld [vmem:[%s5714_s25 + $0x58] sm:$0xff]  }
 0xe3a   :  { %v4258_v22 = vld [vmem:[%s5714_s25 + $0x18] sm:$0xff]   ;;  %v4262_v28 = vld [vmem:[%s5714_s25 + $0x8] sm:$0xff]  }
 0xe3b   :  { %v1776_v30 = vpop.f32.mrf.mxu0 }
 0xe3c   :  { %v5177_v31 = vpack.c.bf16 %v1776_v30, %v1773_v26  ;;  %2449 = vmatpush1.bf16.msra.mxu1 %v4195_v24  ;;  %2530 = vmatpush1.bf16.msra.mxu0 %v4198_v27  ;;  %v4259_v26 = vld [vmem:[%s5714_s25 + $0x50] sm:$0xff]   ;;  %v4261_v27 = vld [vmem:[%s5714_s25 + $0x48] sm:$0xff]  }
 0xe3d   :  { %v4010_v34 = vpop.f32.mrf.mxu0  ;;  %2450 = vmatprep.subr.bf16.mxu1 %v4203_v29  ;;  %2531 = vmatprep.subr.bf16.mxu0 %v4206_v25  ;;  %v4260_v24 = vld [vmem:[%s5714_s25 + $0x10] sm:$0xff]   ;;  %v4263_v29 = vld [vmem:[%s5714_s25 + $0x40] sm:$0xff]  }
 0xe3e   :  { %2333 = vmatmul.mubr.bf16.gmra.mxu1 %v5177_v31  ;;  %2414 = vmatmul.mubr.bf16.gmra.mxu0 %v5177_v31  ;;  %v4264_v25 = vld [vmem:[%s5714_s25] sm:$0xff]  }
 0xe3f   :  { %v1781_v38 = vpop.f32.mrf.mxu0  ;;  %2342 = vmatprep.mubr.bf16.mxu1 %v4650_v13  ;;  %2423 = vmatprep.mubr.bf16.mxu0 %v4650_v13 }
 0xe40   :  { %2451 = vmatpush1.bf16.msra.mxu1 %v4201_v32  ;;  %2532 = vmatpush1.bf16.msra.mxu0 %v4204_v33 }
 0xe41   :  { %v4013_v42 = vpop.f32.mrf.mxu0  ;;  %2452 = vmatprep.subr.bf16.mxu1 %v4209_v35  ;;  %2533 = vmatprep.subr.bf16.mxu0 %v4212_v36 }
 0xe43   :  { %v1784_v45 = vpop.f32.mrf.mxu0 }
 0xe44   :  { %v5183_v46 = vpack.c.bf16 %v1784_v45, %v1781_v38  ;;  %2453 = vmatpush1.bf16.msra.mxu1 %v4207_v39  ;;  %2534 = vmatpush1.bf16.msra.mxu0 %v4210_v41 }
 0xe45   :  { %v4014_v49 = vpop.f32.mrf.mxu0  ;;  %2454 = vmatprep.subr.bf16.mxu1 %v4215_v43  ;;  %2535 = vmatprep.subr.bf16.mxu0 %v4218_v44 }
 0xe46   :  { %2343 = vmatmul.mubr.bf16.gmra.mxu1 %v5183_v46  ;;  %2424 = vmatmul.mubr.bf16.gmra.mxu0 %v5183_v46 }
 0xe47   :  { %v1789_v52 = vpop.f32.mrf.mxu0  ;;  %2352 = vmatprep.mubr.bf16.mxu1 %v4650_v13  ;;  %2433 = vmatprep.mubr.bf16.mxu0 %v4650_v13 }
 0xe48   :  { %2455 = vmatpush1.bf16.msra.mxu1 %v4213_v47  ;;  %2536 = vmatpush1.bf16.msra.mxu0 %v4216_v48  ;;  %v5189_v57 = vpack.c.bf16 %v1789_v52, %v1789_v52 }
 0xe49   :  { %2456 = vmatprep.subr.bf16.mxu1 %v4221_v50  ;;  %2537 = vmatprep.subr.bf16.mxu0 %v4224_v51  ;;  %v4017_v55 = vpop.f32.mrf.mxu0 }
 0xe4b   :  { %v1792_v58 = vpop.f32.mrf.mxu0 }
 0xe4c   :  { %2457 = vmatpush1.bf16.msra.mxu1 %v4219_v53  ;;  %2538 = vmatpush1.bf16.msra.mxu0 %v4222_v54 }
 0xe4d   :  { %v4018_v59 = vpop.f32.mrf.mxu0  ;;  %2604 = vmatprep.subr.bf16.mxu1 %v4227_v56 }
 0xe4e   :  { %2353 = vmatmul.mubr.bf16.gmra.mxu1 %v5189_v57  ;;  %2434 = vmatmul.mubr.bf16.gmra.mxu0 %v5189_v57 }
 0xe4f   :  { %2474 = vmatprep.mubr.bf16.mxu1 %v4650_v13  ;;  %2555 = vmatprep.mubr.bf16.mxu0 %v4650_v13 }
 0xe56   :  { %2475 = vmatmul.mubr.bf16.vlgmr.msra.gmra.mxu1 %v5165_v1  ;;  %2556 = vmatmul.mubr.bf16.vlgmr.msra.gmra.mxu0 %v5165_v1 }
 0xe57   :  { %2484 = vmatprep.mubr.bf16.mxu1 %v4650_v13  ;;  %2565 = vmatprep.mubr.bf16.mxu0 %v4650_v13 }
 0xe58   :  { %2605 = vmatpush1.bf16.msra.mxu1 %v4225_v60 }
 0xe59   :  { %2606 = vmatprep.subr.bf16.mxu1 %v4230_v61 }
 0xe5c   :  { %2607 = vmatpush1.bf16.msra.mxu1 %v4228_v0 }
 0xe5d   :  { %2608 = vmatprep.subr.bf16.mxu1 %v4233_v62 }
 0xe5e   :  { %2485 = vmatmul.mubr.bf16.gmra.mxu1 %v5171_v15  ;;  %2566 = vmatmul.mubr.bf16.gmra.mxu0 %v5171_v15 }
 0xe5f   :  { %2494 = vmatprep.mubr.bf16.mxu1 %v4650_v13  ;;  %2575 = vmatprep.mubr.bf16.mxu0 %v4650_v13 }
 0xe60   :  { %2609 = vmatpush1.bf16.msra.mxu1 %v4231_v63 }
 0xe61   :  { %2610 = vmatprep.subr.bf16.mxu1 %v4236_v2 }
 0xe64   :  { %2611 = vmatpush1.bf16.msra.mxu1 %v4234_v3 }
 0xe65   :  { %2612 = vmatprep.subr.bf16.mxu1 %v4239_v4 }
 0xe66   :  { %2495 = vmatmul.mubr.bf16.gmra.mxu1 %v5177_v31  ;;  %2576 = vmatmul.mubr.bf16.gmra.mxu0 %v5177_v31 }
 0xe67   :  { %2504 = vmatprep.mubr.bf16.mxu1 %v4650_v13  ;;  %2585 = vmatprep.mubr.bf16.mxu0 %v4650_v13 }
 0xe68   :  { %2613 = vmatpush1.bf16.msra.mxu1 %v4237_v5 }
 0xe69   :  { %2614 = vmatprep.subr.bf16.mxu1 %v4242_v6 }
 0xe6c   :  { %2615 = vmatpush1.bf16.msra.mxu1 %v4240_v7 }
 0xe6d   :  { %2616 = vmatprep.subr.bf16.mxu1 %v4245_v8 }
 0xe6e   :  { %2505 = vmatmul.mubr.bf16.gmra.mxu1 %v5183_v46  ;;  %2586 = vmatmul.mubr.bf16.gmra.mxu0 %v5183_v46 }
 0xe6f   :  { %2514 = vmatprep.mubr.bf16.mxu1 %v4650_v13  ;;  %2595 = vmatprep.mubr.bf16.mxu0 %v4650_v13 }
 0xe70   :  { %2617 = vmatpush1.bf16.msra.mxu1 %v4243_v9 }
 0xe71   :  { %2618 = vmatprep.subr.bf16.mxu1 %v4248_v10 }
 0xe74   :  { %2619 = vmatpush1.bf16.msra.mxu1 %v4246_v11 }
 0xe76   :  { %2515 = vmatmul.mubr.bf16.gmra.mxu1 %v5189_v57  ;;  %2596 = vmatmul.mubr.bf16.gmra.mxu0 %v5189_v57 }
 0xe77   :  { %2636 = vmatprep.mubr.bf16.mxu1 %v4650_v13 }
 0xe7e   :  { %2637 = vmatmul.mubr.bf16.vlgmr.msra.gmra.mxu1 %v5165_v1  ;;  %v4249_v1 = vld [vmem:[%s5714_s25 + $0x78] sm:$0xff]  }
 0xe7f   :  { %2646 = vmatprep.mubr.bf16.mxu1 %v4650_v13  ;;  %3837 = vmatprep.subr.bf16.mxu0 %v4249_v1 }
 0xe80   :  { %3838 = vmatpush3.bf16.msra.mxu0 %v4250_v12 }
 0xe81   :  { %3839 = vmatprep.subr.bf16.mxu0 %v4251_v14 }
 0xe86   :  { %2647 = vmatmul.mubr.bf16.gmra.mxu1 %v5171_v15  ;;  %v4253_v15 = vld [vmem:[%s5714_s25 + $0x68] sm:$0xff]  }
 0xe87   :  { %2656 = vmatprep.mubr.bf16.mxu1 %v4650_v13 }
 0xe8e   :  { %2657 = vmatmul.mubr.bf16.gmra.mxu1 %v5177_v31 }
 0xe8f   :  { %2666 = vmatprep.mubr.bf16.mxu1 %v4650_v13 }
 0xe96   :  { %2667 = vmatmul.mubr.bf16.gmra.mxu1 %v5183_v46 }
 0xe97   :  { %2676 = vmatprep.mubr.bf16.mxu1 %v4650_v13  ;;  %v4252_v13 = vld [vmem:[%s5714_s25 + $0x30] sm:$0xff]   ;;  %s4651_s25 = smov [#allocation28]  }
 0xe98   :  { %3840 = vmatpush3.bf16.msra.mxu0 %v4252_v13 }
 0xe99   :  { %3841 = vmatprep.subr.bf16.mxu0 %v4253_v15 }
 0xe9c   :  { %3842 = vmatpush3.bf16.msra.mxu0 %v4254_v16 }
 0xe9d   :  { %3843 = vmatprep.subr.bf16.mxu0 %v4255_v17 }
 0xe9e   :  { %2677 = vmatmul.mubr.bf16.gmra.mxu1 %v5189_v57 }
 0xea0   :  { %3844 = vmatpush3.bf16.msra.mxu0 %v4256_v18 }
 0xea1   :  { %3845 = vmatprep.subr.bf16.mxu0 %v4257_v21 }
 0xea4   :  { %3846 = vmatpush3.bf16.msra.mxu0 %v4258_v22 }
 0xea5   :  { %3847 = vmatprep.subr.bf16.mxu0 %v4259_v26 }
 0xea8   :  { %3848 = vmatpush3.bf16.msra.mxu0 %v4260_v24 }
 0xea9   :  { %3849 = vmatprep.subr.bf16.mxu0 %v4261_v27 }
 0xeac   :  { %3850 = vmatpush3.bf16.msra.mxu0 %v4262_v28 }
 0xead   :  { %3851 = vmatprep.subr.bf16.mxu0 %v4263_v29 }
 0xeb0   :  { %3852 = vmatpush3.bf16.msra.mxu0 %v4264_v25 }
 0xeee   :  { %v2314_v30 = vpop.f32.mrf.mxu1  ;;  %v2395_v31 = vpop.f32.mrf.mxu0 }
 0xeef   :  { %v2695_v36 = vrot.slane %v2395_v31, 1 }
 0xef0   :  { %v2316_v32 = vpop.f32.mrf.mxu1  ;;  %v2397_v33 = vpop.f32.mrf.mxu0 }
 0xef1   :  { %v2698_v42 = vrot.slane %v2397_v33, 1 }
 0xef2   :  { %v2318_v34 = vpop.f32.mrf.mxu1  ;;  %v2399_v35 = vpop.f32.mrf.mxu0 }
 0xef3   :  { %v2696_v38 = vrot.slane %v2399_v35, 1 }
 0xef4   :  { %v2320_v39 = vpop.f32.mrf.mxu1  ;;  %v2401_v41 = vpop.f32.mrf.mxu0 }
 0xef5   :  { %v2697_v43 = vsel %vm794_vm4, %v2695_v36, %v2696_v38  ;;  %v2699_v44 = vrot.slane %v2401_v41, 1 }
 0xef6   :  { %v5272_v45 = vadd.f32 %v2697_v43, %v2314_v30  ;;  %v2324_v46 = vpop.f32.mrf.mxu1  ;;  %v2405_v47 = vpop.f32.mrf.mxu0 }
 0xef7   :  { %v2700_v48 = vsel %vm794_vm4, %v2698_v42, %v2699_v44  ;;  %v2701_v49 = vrot.slane %v2405_v47, 1 }
 0xef8   :  { %v5275_v50 = vadd.f32 %v2700_v48, %v2316_v32  ;;  %v2326_v51 = vpop.f32.mrf.mxu1  ;;  %v2407_v52 = vpop.f32.mrf.mxu0 }
 0xef9   :  { %v2702_v53 = vsel %vm794_vm4, %v2696_v38, %v2701_v49  ;;  %v2703_v54 = vrot.slane %v2407_v52, 1 }
 0xefa   :  { %v5278_v55 = vadd.f32 %v2702_v53, %v2318_v34  ;;  %v2328_v56 = vpop.f32.mrf.mxu1  ;;  %v2409_v57 = vpop.f32.mrf.mxu0 }
 0xefb   :  { %v2704_v58 = vsel %vm794_vm4, %v2699_v44, %v2703_v54  ;;  %v2705_v59 = vrot.slane %v2409_v57, 1 }
 0xefc   :  { %v5281_v60 = vadd.f32 %v2704_v58, %v2320_v39  ;;  %v2330_v61 = vpop.f32.mrf.mxu1  ;;  %v2411_v0 = vpop.f32.mrf.mxu0 }
 0xefd   :  { %v2706_v62 = vsel %vm794_vm4, %v2701_v49, %v2705_v59  ;;  %v2707_v63 = vrot.slane %v2411_v0, 1 }
 0xefe   :  { %v5284_v2 = vadd.f32 %v2706_v62, %v2324_v46  ;;  %v2334_v3 = vpop.f32.mrf.mxu1  ;;  %v2415_v4 = vpop.f32.mrf.mxu0 }
 0xeff   :  { %v2708_v5 = vsel %vm794_vm4, %v2703_v54, %v2707_v63  ;;  %v2709_v6 = vrot.slane %v2415_v4, 1 }
 0xf00   :  { %v5287_v7 = vadd.f32 %v2708_v5, %v2326_v51  ;;  %v2336_v8 = vpop.f32.mrf.mxu1  ;;  %v2417_v9 = vpop.f32.mrf.mxu0 }
 0xf01   :  { %v2710_v10 = vsel %vm794_vm4, %v2705_v59, %v2709_v6  ;;  %v2711_v11 = vrot.slane %v2417_v9, 1 }
 0xf02   :  { %v5290_v1 = vadd.f32 %v2710_v10, %v2328_v56  ;;  %v2338_v12 = vpop.f32.mrf.mxu1  ;;  %v2419_v14 = vpop.f32.mrf.mxu0 }
 0xf03   :  { %v2712_v13 = vsel %vm794_vm4, %v2707_v63, %v2711_v11  ;;  %v2870_v15 = vrot.slane %v2419_v14, 1 }
 0xf04   :  { %v5293_v16 = vadd.f32 %v2712_v13, %v2330_v61  ;;  %v2340_v17 = vpop.f32.mrf.mxu1  ;;  %v2421_v18 = vpop.f32.mrf.mxu0 }
 0xf05   :  { %v2871_v21 = vsel %vm794_vm4, %v2709_v6, %v2870_v15  ;;  %v2872_v22 = vrot.slane %v2421_v18, 1 }
 0xf06   :  { %v5296_v26 = vadd.f32 %v2871_v21, %v2334_v3  ;;  %v2344_v24 = vpop.f32.mrf.mxu1  ;;  %v2425_v27 = vpop.f32.mrf.mxu0 }
 0xf07   :  { %v2873_v28 = vsel %vm794_vm4, %v2711_v11, %v2872_v22  ;;  %v2874_v29 = vrot.slane %v2425_v27, 1 }
 0xf08   :  { %v5299_v25 = vadd.f32 %v2873_v28, %v2336_v8  ;;  %v2346_v30 = vpop.f32.mrf.mxu1  ;;  %v2427_v31 = vpop.f32.mrf.mxu0 }
 0xf09   :  { %v2875_v32 = vsel %vm794_vm4, %v2870_v15, %v2874_v29  ;;  %v2876_v33 = vrot.slane %v2427_v31, 1 }
 0xf0a   :  { %v5302_v34 = vadd.f32 %v2875_v32, %v2338_v12  ;;  %v2348_v35 = vpop.f32.mrf.mxu1  ;;  %v2429_v36 = vpop.f32.mrf.mxu0 }
 0xf0b   :  { %v2877_v38 = vsel %vm794_vm4, %v2872_v22, %v2876_v33  ;;  %v2878_v39 = vrot.slane %v2429_v36, 1 }
 0xf0c   :  { %v5305_v41 = vadd.f32 %v2877_v38, %v2340_v17  ;;  %v2350_v42 = vpop.f32.mrf.mxu1  ;;  %v2431_v43 = vpop.f32.mrf.mxu0 }
 0xf0d   :  { %v2879_v44 = vsel %vm794_vm4, %v2874_v29, %v2878_v39  ;;  %v2880_v46 = vrot.slane %v2431_v43, 1 }
 0xf0e   :  { %v5308_v47 = vadd.f32 %v2879_v44, %v2344_v24  ;;  %v2354_v48 = vpop.f32.mrf.mxu1  ;;  %v2435_v49 = vpop.f32.mrf.mxu0 }
 0xf0f   :  { %v2881_v51 = vsel %vm794_vm4, %v2876_v33, %v2880_v46  ;;  %v2882_v52 = vrot.slane %v2435_v49, 1  ;;  %v3072_v49 = vld [vmem:[#allocation25] sm:$0x3] }
 0xf10   :  { %v5311_v53 = vadd.f32 %v2881_v51, %v2346_v30  ;;  %v2356_v54 = vpop.f32.mrf.mxu1  ;;  %v2437_v56 = vpop.f32.mrf.mxu0 }
 0xf11   :  { %v2883_v57 = vsel %vm794_vm4, %v2878_v39, %v2882_v52  ;;  %v5314_v58 = vadd.f32 %v2882_v52, %v2354_v48  ;;  %v2884_v59 = vrot.slane %v2437_v56, 1 }
 0xf12   :  { %v5316_v61 = vadd.f32 %v2883_v57, %v2348_v35  ;;  %v2358_v0 = vpop.f32.mrf.mxu1  ;;  %v2439_v62 = vpop.f32.mrf.mxu0 }
 0xf13   :  { %v2885_v63 = vsel %vm794_vm4, %v2880_v46, %v2884_v59  ;;  %v5319_v3 = vadd.f32 %v2884_v59, %v2356_v54  ;;  %v5364_v59 = vrot.slane %v3072_v49, %v1138_v23 }
 0xf14   :  { %v5321_v4 = vadd.f32 %v2885_v63, %v2350_v42  ;;  %v2359_v5 = vpop.f32.mrf.mxu1  ;;  %v2440_v6 = vpop.f32.mrf.mxu0 }
 0xf16   :  { %v2476_v8 = vpop.f32.mrf.mxu1  ;;  %v2557_v9 = vpop.f32.mrf.mxu0 }
 0xf17   :  { %v2739_v43 = vrot.slane %v2476_v8, 2 }
 0xf18   :  { %v2478_v10 = vpop.f32.mrf.mxu1  ;;  %v2559_v11 = vpop.f32.mrf.mxu0 }
 0xf19   :  { %v2742_v52 = vrot.slane %v2478_v10, 2  ;;  %v2787_v20 = vrot.slane %v2559_v11, 3 }
 0xf1a   :  { %v2480_v12 = vpop.f32.mrf.mxu1  ;;  %v2561_v14 = vpop.f32.mrf.mxu0 }
 0xf1b   :  { %v2740_v38 = vrot.slane %v2480_v12, 2  ;;  %v2785_v0 = vrot.slane %v2561_v14, 3 }
 0xf1c   :  { %v2482_v13 = vpop.f32.mrf.mxu1  ;;  %v5323_v15 = vpop.f32.mrf.mxu0 }
 0xf1d   :  { %v2743_v44 = vrot.slane %v2482_v13, 2  ;;  %v2741_v54 = vsel %vm813_vm5, %v2739_v43, %v2740_v38  ;;  %v2788_v8 = vrot.slane %v5323_v15, 3  ;;  %v2784_v13 = vrot.slane %v2557_v9, 3 }
 0xf1e   :  { %v2486_v17 = vpop.f32.mrf.mxu1  ;;  %v5325_v18 = vpop.f32.mrf.mxu0  ;;  %v2765_v6 = vadd.f32 %v2741_v54, %v5272_v45 }
 0xf1f   :  { %v2745_v51 = vrot.slane %v2486_v17, 2  ;;  %v2744_v62 = vsel %vm813_vm5, %v2742_v52, %v2743_v44  ;;  %v2790_v17 = vrot.slane %v5325_v18, 3  ;;  %v2786_v18 = vsel %vm2783_vm0, %v2784_v13, %v2785_v0 }
 0xf20   :  { %v2488_v21 = vpop.f32.mrf.mxu1  ;;  %v5327_v22 = vpop.f32.mrf.mxu0  ;;  %v2766_v40 = vadd.f32 %v2744_v62, %v5275_v50  ;;  %v5395_v11 = vadd.f32 %v2786_v18, %v2765_v6  ;;  %v2789_v50 = vsel %vm2783_vm0, %v2787_v20, %v2788_v8 }
 0xf21   :  { %v2746_v10 = vsel %vm813_vm5, %v2740_v38, %v2745_v51  ;;  %v2747_v12 = vrot.slane %v2488_v21, 2  ;;  %v2792_v45 = vrot.slane %v5327_v22, 3  ;;  %v5750_v21 = vsub.s32 1, %v5047_v19 }
 0xf22   :  { %v5329_v24 = vpop.f32.mrf.mxu1  ;;  %v5331_v27 = vpop.f32.mrf.mxu0  ;;  %v5408_v6 = vadd.f32 %v2789_v50, %v2766_v40 }
 0xf23   :  { %v2749_v23 = vrot.slane %v5329_v24, 2  ;;  %v5386_v9 = vrot.slane %v3072_v49, %v5750_v21  ;;  %v2767_v24 = vadd.f32 %v2746_v10, %v5278_v55  ;;  %v2748_v22 = vsel %vm813_vm5, %v2743_v44, %v2747_v12 }
 0xf24   :  { %v5333_v28 = vpop.f32.mrf.mxu1  ;;  %v5335_v29 = vpop.f32.mrf.mxu0  ;;  %v2794_v55 = vrot.slane %v5331_v27, 3  ;;  %v2793_v20 = vsel %vm2783_vm0, %v2788_v8, %v2792_v45 }
 0xf25   :  { %v2751_v14 = vrot.slane %v5333_v28, 2  ;;  %v2750_v49 = vsel %vm813_vm5, %v2745_v51, %v2749_v23  ;;  %v2768_v51 = vadd.f32 %v2748_v22, %v5281_v60  ;;  %v2796_v27 = vrot.slane %v5335_v29, 3 }
 0xf26   :  { %v5337_v30 = vpop.f32.mrf.mxu1  ;;  %v5339_v31 = vpop.f32.mrf.mxu0  ;;  %v2769_v18 = vadd.f32 %v2750_v49, %v5284_v2 }
 0xf27   :  { %v2753_v15 = vrot.slane %v5337_v30, 2  ;;  %v2791_v30 = vsel %vm2783_vm0, %v2785_v0, %v2790_v17  ;;  %v2798_v8 = vrot.slane %v5339_v31, 3 }
 0xf28   :  { %v5341_v32 = vpop.f32.mrf.mxu1  ;;  %v5343_v33 = vpop.f32.mrf.mxu0  ;;  %v5413_v13 = vadd.f32 %v2791_v30, %v2767_v24  ;;  %v5430_v30 = vadd.f32 %v2793_v20, %v2768_v51 }
 0xf29   :  { %v2755_v28 = vrot.slane %v5341_v32, 2  ;;  %v2752_v32 = vsel %vm813_vm5, %v2747_v12, %v2751_v14  ;;  %v2754_v44 = vsel %vm813_vm5, %v2749_v23, %v2753_v15  ;;  %v2800_v60 = vrot.slane %v5343_v33, 3 }
 0xf2a   :  { %v5345_v35 = vpop.f32.mrf.mxu1  ;;  %v5347_v36 = vpop.f32.mrf.mxu0  ;;  %v2770_v40 = vadd.f32 %v2752_v32, %v5287_v7  ;;  %v2771_v24 = vadd.f32 %v2754_v44, %v5290_v1 }
 0xf2b   :  { %v2914_v19 = vrot.slane %v5345_v35, 2  ;;  %v2756_v0 = vsel %vm813_vm5, %v2751_v14, %v2755_v28  ;;  %v2958_v2 = vrot.slane %v5347_v36, 3 }
 0xf2c   :  { %v5349_v39 = vpop.f32.mrf.mxu1  ;;  %v5351_v42 = vpop.f32.mrf.mxu0  ;;  %v2772_v22 = vadd.f32 %v2756_v0, %v5293_v16  ;;  %v2799_v16 = vsel %vm2783_vm0, %v2794_v55, %v2798_v8 }
 0xf2d   :  { %v2916_v35 = vrot.slane %v5349_v39, 2  ;;  %v2915_v23 = vsel %vm813_vm5, %v2753_v15, %v2914_v19  ;;  %v2795_v39 = vsel %vm2783_vm0, %v2790_v17, %v2794_v55  ;;  %v2797_v17 = vsel %vm2783_vm0, %v2792_v45, %v2796_v27 }
 0xf2e   :  { %v5353_v46 = vpop.f32.mrf.mxu1  ;;  %v5355_v48 = vpop.f32.mrf.mxu0  ;;  %v2940_v1 = vadd.f32 %v2915_v23, %v5296_v26  ;;  %v2960_v33 = vrot.slane %v5351_v42, 3  ;;  %v5437_v49 = vadd.f32 %v2797_v17, %v2770_v40  ;;  %v5445_v20 = vadd.f32 %v2799_v16, %v2771_v24 }
 0xf2f   :  { %v2918_v29 = vrot.slane %v5353_v46, 2  ;;  %v2917_v7 = vsel %vm813_vm5, %v2755_v28, %v2916_v35  ;;  %v5435_v46 = vadd.f32 %v2795_v39, %v2769_v18  ;;  %v2962_v36 = vrot.slane %v5355_v48, 3 }
 0xf30   :  { %v5358_v56 = vpop.f32.mrf.mxu1  ;;  %v5360_v57 = vpop.f32.mrf.mxu0  ;;  %v2801_v28 = vsel %vm2783_vm0, %v2796_v27, %v2800_v60  ;;  %v2959_v44 = vsel %vm2783_vm0, %v2798_v8, %v2958_v2  ;;  %v2961_v55 = vsel %vm2783_vm0, %v2800_v60, %v2960_v33 }
 0xf31   :  { %v2920_v31 = vrot.slane %v5358_v56, 2  ;;  %v2941_v56 = vadd.f32 %v2917_v7, %v5299_v25  ;;  %v2919_v32 = vsel %vm813_vm5, %v2914_v19, %v2918_v29  ;;  %v5447_v42 = vadd.f32 %v2801_v28, %v2772_v22 }
 0xf32   :  { %v5367_v63 = vpop.f32.mrf.mxu1  ;;  %v5369_v5 = vpop.f32.mrf.mxu0  ;;  %v2964_v48 = vrot.slane %v5360_v57, 3  ;;  %v5454_v0 = vadd.f32 %v2959_v44, %v2940_v1  ;;  %v2963_v19 = vsel %vm2783_vm0, %v2958_v2, %v2962_v36 }
 0xf33   :  { %v2922_v45 = vrot.slane %v5367_v63, 2  ;;  %v2921_v51 = vsel %vm813_vm5, %v2916_v35, %v2920_v31  ;;  %v2942_v63 = vadd.f32 %v2919_v32, %v5302_v34  ;;  %v2966_v35 = vrot.slane %v5369_v5, 3 }
 0xf34   :  { %v5377_v43 = vpop.f32.mrf.mxu1  ;;  %v5379_v52 = vpop.f32.mrf.mxu0  ;;  %v2943_v18 = vadd.f32 %v2921_v51, %v5305_v41  ;;  %v5461_v23 = vadd.f32 %v2961_v55, %v2941_v56  ;;  %v2965_v34 = vsel %vm2783_vm0, %v2960_v33, %v2964_v48 }
 0xf35   :  { %v2924_v27 = vrot.slane %v5377_v43, 2  ;;  %v2923_v40 = vsel %vm813_vm5, %v2918_v29, %v2922_v45  ;;  %v2968_v57 = vrot.slane %v5379_v52, 3  ;;  %v2967_v1 = vsel %vm2783_vm0, %v2962_v36, %v2966_v35 }
 0xf36   :  { %v5391_v38 = vpop.f32.mrf.mxu1  ;;  %v5393_v54 = vpop.f32.mrf.mxu0  ;;  %v2944_v22 = vadd.f32 %v2923_v40, %v5308_v47  ;;  %v5475_v17 = vadd.f32 %v2965_v34, %v2943_v18 }
 0xf37   :  { %v2926_v41 = vrot.slane %v5391_v38, 2  ;;  %v2970_v33 = vrot.slane %v5393_v54, 3 }
 0xf38   :  { %v5404_v62 = vpop.f32.mrf.mxu1  ;;  %v5406_v10 = vpop.f32.mrf.mxu0 }
 0xf39   :  { %v2927_v28 = vsel %vm813_vm5, %v2922_v45, %v2926_v41  ;;  %v2971_v51 = vsel %vm2783_vm0, %v2966_v35, %v2970_v33  ;;  %v2928_v55 = vrot.slane %v5404_v62, 2 }
 0xf3a   :  { %v2520_v12 = vpop.f32.mrf.mxu1  ;;  %v2601_v21 = vpop.f32.mrf.mxu0 }
 0xf3c   :  { %v2521_v50 = vpop.f32.mrf.mxu1  ;;  %v2602_v14 = vpop.f32.mrf.mxu0 }
 0xf3d   :  { %v2925_v50 = vsel %vm813_vm5, %v2920_v31, %v2924_v27  ;;  %v5471_v14 = vadd.f32 %v2963_v19, %v2942_v63 }
 0xf3e   :  { %v2638_v15 = vpop.f32.mrf.mxu1  ;;  %v2945_v38 = vadd.f32 %v2925_v50, %v5311_v53  ;;  %v2948_v53 = vadd.f32 %v2926_v41, %v5314_v58  ;;  %v2929_v41 = vsel %vm813_vm5, %v2924_v27, %v2928_v55 }
 0xf3f   :  { %v2828_v12 = vrot.slane %v2638_v15, 4  ;;  %v5520_v27 = vadd.f32 %v2929_v41, %v5321_v4 }
 0xf40   :  { %v2640_v26 = vpop.f32.mrf.mxu1  ;;  %v5503_v62 = vadd.f32 %v2970_v33, %v2948_v53 }
 0xf41   :  { %v2831_v39 = vrot.slane %v2640_v26, 4 }
 0xf42   :  { %v2642_v25 = vpop.f32.mrf.mxu1 }
 0xf43   :  { %v2829_v21 = vrot.slane %v2642_v25, 4 }
 0xf44   :  { %v2644_v8 = vpop.f32.mrf.mxu1 }
 0xf45   :  { %v2830_v24 = vsel %vm487_vm11, %v2828_v12, %v2829_v21  ;;  %v2832_v60 = vrot.slane %v2644_v8, 4  ;;  %v2972_v8 = vrot.slane %v5406_v10, 3  ;;  %v2949_v10 = vadd.f32 %v2928_v55, %v5319_v3 }
 0xf46   :  { %v2854_v29 = vadd.f32 %v2830_v24, %v5395_v11  ;;  %v2648_v5 = vpop.f32.mrf.mxu1  ;;  %v2969_v11 = vsel %vm2783_vm0, %v2964_v48, %v2968_v57 }
 0xf47   :  { %v2833_v2 = vsel %vm487_vm11, %v2831_v39, %v2832_v60  ;;  %v2834_v7 = vrot.slane %v2648_v5, 4  ;;  %v5497_v63 = vadd.f32 %v2969_v11, %v2945_v38 }
 0xf48   :  { %v2855_v31 = vadd.f32 %v2833_v2, %v5408_v6  ;;  %v2650_v15 = vpop.f32.mrf.mxu1  ;;  %v3084_v56 = vadd.f32 %v5364_v59, %v2854_v29  ;;  %v5489_v6 = vadd.f32 %v2967_v1, %v2944_v22 }
 0xf49   :  { %v2835_v47 = vsel %vm487_vm11, %v2829_v21, %v2834_v7  ;;  %v2836_v16 = vrot.slane %v2650_v15, 4 }
 0xf4a   :  { %v3085_v36 = vadd.f32 %v5386_v9, %v2855_v31  ;;  %v2856_v54 = vadd.f32 %v2835_v47, %v5413_v13  ;;  %v2652_v32 = vpop.f32.mrf.mxu1  ;;  %v2946_v13 = vadd.f32 %v2927_v28, %v5316_v61  ;;  %v3100_v58 = vmax.f32 %v3084_v56, 0.0 }
 0xf4b   :  { %v2837_v26 = vsel %vm487_vm11, %v2832_v60, %v2836_v16  ;;  %v2838_v44 = vrot.slane %v2652_v32, 4 }
 0xf4c   :  { %v3086_v45 = vadd.f32 %v5364_v59, %v2856_v54  ;;  %v2857_v48 = vadd.f32 %v2837_v26, %v5430_v30  ;;  %v2654_v25 = vpop.f32.mrf.mxu1  ;;  %v3101_v24 = vmax.f32 %v3085_v36, 0.0  ;;  %v5516_v33 = vadd.f32 %v2971_v51, %v2946_v13 }
 0xf4d   :  { %v2839_v19 = vsel %vm487_vm11, %v2834_v7, %v2838_v44  ;;  %v2840_v12 = vrot.slane %v2654_v25, 4  ;;  %v2973_v13 = vsel %vm2783_vm0, %v2968_v57, %v2972_v8 }
 0xf4e   :  { %v3102_v21 = vmax.f32 %v3086_v45, 0.0  ;;  %v3087_v18 = vadd.f32 %v5386_v9, %v2857_v48  ;;  %v2858_v40 = vadd.f32 %v2839_v19, %v5435_v46  ;;  %v2658_v35 = vpop.f32.mrf.mxu1  ;;  %v2993_v19 = vadd.f32 %v2972_v8, %v2949_v10 }
 0xf4f   :  { %v2841_v30 = vsel %vm487_vm11, %v2836_v16, %v2840_v12  ;;  %v2842_v39 = vrot.slane %v2658_v35, 4 }
 0xf50   :  { %v3116_v60 = vpack.c.bf16 %v3102_v21, %v3100_v58  ;;  %v3103_v61 = vmax.f32 %v3087_v18, 0.0  ;;  %v2859_v34 = vadd.f32 %v2841_v30, %v5437_v49  ;;  %v2660_v50 = vpop.f32.mrf.mxu1  ;;  %v3088_v46 = vadd.f32 %v5364_v59, %v2858_v40 }
 0xf51   :  { %v2843_v29 = vsel %vm487_vm11, %v2838_v44, %v2842_v39  ;;  %v2844_v5 = vrot.slane %v2660_v50, 4 }
 0xf52   :  { %v3089_v22 = vadd.f32 %v5386_v9, %v2859_v34  ;;  %v2860_v2 = vadd.f32 %v2843_v29, %v5445_v20  ;;  %v2662_v7 = vpop.f32.mrf.mxu1  ;;  %v3117_v1 = vpack.c.bf16 %v3103_v61, %v3101_v24  ;;  %v3125_v31 = vshrl.u32 %v3116_v60, 16 }
 0xf53   :  { %v2845_v49 = vsel %vm487_vm11, %v2840_v12, %v2844_v5  ;;  %v3002_v43 = vrot.slane %v2662_v7, 4  ;;  %v3104_v47 = vmax.f32 %v3088_v46, 0.0  ;;  %v3128_v28 = vshll.u32 %v3116_v60, 16 }
 0xf54   :  { %v3090_v15 = vadd.f32 %v5364_v59, %v2860_v2  ;;  %v2861_v38 = vadd.f32 %v2845_v49, %v5447_v42  ;;  %v2664_v3 = vpop.f32.mrf.mxu1  ;;  %v3132_v11 = vshrl.u32 %v3117_v1, 16  ;;  %v5524_v20 = vrot.slane %v3125_v31, 7 }
 0xf55   :  { %v3003_v16 = vrot.slane %v2664_v3, 4  ;;  %v3135_v53 = vshll.u32 %v3117_v1, 16  ;;  %v3105_v26 = vmax.f32 %v3089_v22, 0.0  ;;  %v3026_v4 = vadd.f32 %v3002_v43, %v5454_v0 }
 0xf56   :  { %v3106_v56 = vmax.f32 %v3090_v15, 0.0  ;;  %v3091_v36 = vadd.f32 %v5386_v9, %v2861_v38  ;;  %v2668_v54 = vpop.f32.mrf.mxu1  ;;  %v3134_v32 = vrot.slane %v3132_v11, 7  ;;  %v3130_v51 = vor.u32 %v3128_v28, %v5524_v20 }
 0xf57   :  { %v3004_v44 = vrot.slane %v2668_v54, 4  ;;  %v3027_v55 = vadd.f32 %v3003_v16, %v5461_v23  ;;  %v3046_v23 = vrot.slane %v3026_v4, 4 }
 0xf58   :  { %v3107_v42 = vmax.f32 %v3091_v36, 0.0  ;;  %v2670_v45 = vpop.f32.mrf.mxu1  ;;  %v3137_v48 = vor.u32 %v3135_v53, %v3134_v32  ;;  %v3118_v25 = vpack.c.bf16 %v3106_v56, %v3104_v47  ;;  %v3200_v52 = vsel %vm4903_vm8, 0, %v3130_v51 }
 0xf59   :  { %v3005_v12 = vsel %vm487_vm11, %v3002_v43, %v3004_v44  ;;  %v3006_v58 = vrot.slane %v2670_v45, 4  ;;  %v3049_v57 = vrot.slane %v3027_v55, 4 }
 0xf5a   :  { %v3028_v21 = vadd.f32 %v3005_v12, %v5471_v14  ;;  %v2672_v0 = vpop.f32.mrf.mxu1  ;;  %v3201_v18 = vsel %vm4903_vm8, 0, %v3137_v48  ;;  %v3119_v40 = vpack.c.bf16 %v3107_v42, %v3105_v26  ;;  %v3139_v35 = vshrl.u32 %v3118_v25, 16 }
 0xf5b   :  { %v3007_v30 = vsel %vm487_vm11, %v3003_v16, %v3006_v58  ;;  %v3008_v39 = vrot.slane %v2672_v0, 4  ;;  %3374 = vmatprep.mubr.bf16.mxu0 %v3201_v18  ;;  %v3142_v1 = vshll.u32 %v3118_v25, 16 }
 0xf5c   :  { %v3047_v8 = vrot.slane %v3028_v21, 4  ;;  %v3029_v24 = vadd.f32 %v3007_v30, %v5475_v17  ;;  %v2674_v60 = vpop.f32.mrf.mxu1  ;;  %3375 = vmatmul.mubr.bf16.vlgmr.msra.gmra.mxu0 %v3200_v52  ;;  %v3147_v14 = vshrl.u32 %v3119_v40, 16  ;;  %v3150_v50 = vshll.u32 %v3119_v40, 16 }
 0xf5d   :  { %v3009_v61 = vsel %vm487_vm11, %v3004_v44, %v3008_v39  ;;  %v3010_v34 = vrot.slane %v2674_v60, 4  ;;  %v5542_v41 = vrot.slane %v3139_v35, 7 }
 0xf5e   :  { %v3048_v46 = vsel %vm487_vm11, %v3046_v23, %v3047_v8  ;;  %v3050_v29 = vrot.slane %v3029_v24, 4  ;;  %v3030_v5 = vadd.f32 %v3009_v61, %v5489_v6  ;;  %v2678_v10 = vpop.f32.mrf.mxu1  ;;  %v5546_v22 = vrot.slane %v3147_v14, 7 }
 0xf5f   :  { %v3092_v2 = vadd.f32 %v5364_v59, %v3048_v46  ;;  %v3011_v17 = vsel %vm487_vm11, %v3006_v58, %v3010_v34  ;;  %v3012_v7 = vrot.slane %v2678_v10, 4  ;;  %v3144_v47 = vor.u32 %v3142_v1, %v5542_v41 }
 0xf60   :  { %v3051_v49 = vsel %vm487_vm11, %v3049_v57, %v3050_v29  ;;  %v3052_v43 = vrot.slane %v3030_v5, 4  ;;  %v3031_v31 = vadd.f32 %v3011_v17, %v5497_v63  ;;  %v2680_v15 = vpop.f32.mrf.mxu1  ;;  %v3152_v38 = vor.u32 %v3150_v50, %v5546_v22 }
 0xf61   :  { %v3093_v3 = vadd.f32 %v5386_v9, %v3051_v49  ;;  %v3013_v6 = vsel %vm487_vm11, %v3008_v39, %v3012_v7  ;;  %v3034_v11 = vadd.f32 %v3012_v7, %v5503_v62  ;;  %v3014_v36 = vrot.slane %v2680_v15, 4 }
 0xf62   :  { %v3053_v16 = vsel %vm487_vm11, %v3047_v8, %v3052_v43  ;;  %v3054_v28 = vrot.slane %v3031_v31, 4  ;;  %v3032_v56 = vadd.f32 %v3013_v6, %v5516_v33  ;;  %v2682_v54 = vpop.f32.mrf.mxu1  ;;  %v2991_v63 = vadd.f32 %v2973_v13, %v5520_v27 }
 0xf63   :  { %v3094_v53 = vadd.f32 %v5364_v59, %v3053_v16  ;;  %v3060_v26 = vrot.slane %v3034_v11, 4  ;;  %v3153_v4 = vsel %vm472_vm6, %v3134_v32, %v3152_v38  ;;  %v3015_v62 = vsel %vm487_vm11, %v3010_v34, %v3014_v36 }
 0xf64   :  { %v3055_v44 = vsel %vm487_vm11, %v3050_v29, %v3054_v28  ;;  %v3056_v51 = vrot.slane %v3032_v56, 4  ;;  %v3035_v42 = vadd.f32 %v3014_v36, %v2993_v19  ;;  %3382 = vmatprep.mubr.bf16.mxu0 %v3153_v4  ;;  %v2683_v55 = vpop.f32.mrf.mxu1  ;;  %v3033_v48 = vadd.f32 %v3015_v62, %v2991_v63 }
 0xf65   :  { %v3110_v45 = vmax.f32 %v3094_v53, 0.0  ;;  %v3095_v33 = vadd.f32 %v5386_v9, %v3055_v44  ;;  %v3145_v27 = vsel %vm472_vm6, %v5524_v20, %v3144_v47  ;;  %v3108_v25 = vmax.f32 %v3092_v2, 0.0 }
 0xf66   :  { %v3057_v13 = vsel %vm487_vm11, %v3052_v43, %v3056_v51  ;;  %v3061_v32 = vsel %vm487_vm11, %v3056_v51, %v3060_v26  ;;  %v3062_v12 = vrot.slane %v3035_v42, 4  ;;  %3383 = vmatmul.mubr.bf16.gmra.mxu0 %v3145_v27  ;;  %v3058_v0 = vrot.slane %v3033_v48, 4 }
 0xf67   :  { %v3111_v58 = vmax.f32 %v3095_v33, 0.0  ;;  %v3096_v21 = vadd.f32 %v5364_v59, %v3057_v13  ;;  %v3098_v19 = vadd.f32 %v5364_v59, %v3061_v32  ;;  %v3109_v18 = vmax.f32 %v3093_v3, 0.0 }
 0xf68   :  { %v3120_v40 = vpack.c.bf16 %v3110_v45, %v3108_v25  ;;  %v3059_v30 = vsel %vm487_vm11, %v3054_v28, %v3058_v0  ;;  %v3063_v20 = vsel %vm487_vm11, %v3058_v0, %v3062_v12  ;;  %v3202_v59 = vsel %vm4903_vm8, %v5542_v41, 0 }
 0xf69   :  { %v3112_v35 = vmax.f32 %v3096_v21, 0.0  ;;  %v3114_v23 = vmax.f32 %v3098_v19, 0.0  ;;  %v3097_v39 = vadd.f32 %v5386_v9, %v3059_v30  ;;  %v3099_v52 = vadd.f32 %v5386_v9, %v3063_v20 }
 0xf6a   :  { %v3121_v57 = vpack.c.bf16 %v3111_v58, %v3109_v18  ;;  %v3161_v8 = vshrl.u32 %v3120_v40, 16  ;;  %v3164_v24 = vshll.u32 %v3120_v40, 16  ;;  %v3203_v9 = vsel %vm4903_vm8, %v5546_v22, 0 }
 0xf6b   :  { %v3122_v60 = vpack.c.bf16 %v3114_v23, %v3112_v35  ;;  %v3113_v14 = vmax.f32 %v3097_v39, 0.0  ;;  %v3115_v61 = vmax.f32 %v3099_v52, 0.0  ;;  %v3205_v31 = vsel %vm452_vm3, %v3202_v59, 0 }
 0xf6c   :  { %v3169_v34 = vshrl.u32 %v3121_v57, 16  ;;  %v3172_v50 = vshll.u32 %v3121_v57, 16  ;;  %v3163_v46 = vrot.slane %v3161_v8, 6  ;;  %v3166_v29 = vrot.slane %v3164_v24, 7 }
 0xf6d   :  { %v3177_v5 = vshrl.u32 %v3122_v60, 16  ;;  %v3180_v10 = vshll.u32 %v3122_v60, 16  ;;  %v3123_v7 = vpack.c.bf16 %v3115_v61, %v3113_v14  ;;  %v3208_v3 = vsel %vm452_vm3, %v3203_v9, 0 }
 0xf6e   :  { %v3171_v2 = vrot.slane %v3169_v34, 6  ;;  %v3174_v17 = vrot.slane %v3172_v50, 7  ;;  %v3167_v1 = vor.u32 %v3166_v29, %v3163_v46 }
 0xf6f   :  { %v3179_v49 = vrot.slane %v3177_v5, 6  ;;  %v3182_v43 = vrot.slane %v3180_v10, 7  ;;  %v3186_v15 = vshrl.u32 %v3123_v7, 16  ;;  %v3189_v38 = vshll.u32 %v3123_v7, 16 }
 0xf70   :  { %v3175_v41 = vor.u32 %v3174_v17, %v3171_v2  ;;  %v3210_v11 = vsel %vm4909_vm10, %v3205_v31, %v3167_v1 }
 0xf71   :  { %v3183_v47 = vor.u32 %v3182_v43, %v3179_v49  ;;  %v3188_v37 = vrot.slane %v3186_v15, 6  ;;  %v3191_v22 = vrot.slane %v3189_v38, 7 }
 0xf72   :  { %v3211_v16 = vsel %vm4909_vm10, %v3208_v3, %v3175_v41 }
 0xf73   :  { %3390 = vmatprep.mubr.bf16.mxu0 %v3211_v16  ;;  %v3184_v28 = vsel %vm476_vm7, %v3167_v1, %v3183_v47  ;;  %v3192_v56 = vor.u32 %v3191_v22, %v3188_v37  ;;  %v3212_v63 = vsel %vm4909_vm10, %v3183_v47, 0 }
 0xf74   :  { %3391 = vmatmul.mubr.bf16.gmra.mxu0 %v3210_v11 }
 0xf75   :  { %v3193_v36 = vsel %vm476_vm7, %v3175_v41, %v3192_v56  ;;  %v3213_v54 = vsel %vm4909_vm10, %v3192_v56, 0 }
 0xf76   :  { %3398 = vmatprep.mubr.bf16.mxu0 %v3193_v36 }
 0xf7c   :  { %3399 = vmatmul.mubr.bf16.gmra.mxu0 %v3184_v28 }
 0xf7d   :  { %3406 = vmatprep.mubr.bf16.mxu0 %v3213_v54 }
 0xf84   :  { %3407 = vmatmul.mubr.bf16.gmra.mxu0 %v3212_v63 }
0x101c   :  { %v3853_v53 = vpop.f32.mrf.mxu0 }
0x101e   :  { %v3854_v26 = vpop.f32.mrf.mxu0 }
0x101f   :  { %v5593_v44 = vadd.f32 %v3854_v26, %v3853_v53  ;;  %v3786_v26 = vld [vmem:[#allocation26] ss:$0 sm:$0xff] }
0x1020   :  { %v3856_v4 = vpop.f32.mrf.mxu0 }
0x1021   :  { %v3419_v42 = vrot.slane %v5593_v44, 1  ;;  %v3444_v13 = vrot.slane %v5593_v44, 2 }
0x1022   :  { %v3857_v51 = vpop.f32.mrf.mxu0 }
0x1023   :  { %v5595_v62 = vadd.f32 %v3857_v51, %v3856_v4 }
0x1025   :  { %v3420_v55 = vrot.slane %v5595_v62, 1  ;;  %v3445_v48 = vrot.slane %v5595_v62, 2 }
0x1026   :  { %v3859_v45 = vpop.f32.mrf.mxu0 }
0x1027   :  { %v3421_v33 = vsel %vm794_vm4, %v3419_v42, %v3420_v55  ;;  %v3446_v58 = vsel %vm813_vm5, %v3444_v13, %v3445_v48 }
0x1028   :  { %v3860_v27 = vpop.f32.mrf.mxu0  ;;  %3428 = vrot.lane.b32.xlu0 %v3421_v33, %s4649_s17 }
0x1029   :  { %v5602_v25 = vadd.f32 %v3860_v27, %v3859_v45 }
0x102a   :  { %v3862_v32 = vpop.f32.mrf.mxu0 }
0x102b   :  { %v3422_v12 = vrot.slane %v5602_v25, 1  ;;  %v3447_v22 = vrot.slane %v5602_v25, 2 }
0x102c   :  { %v3863_v21 = vpop.f32.mrf.mxu0  ;;  %3453 = vrot.lane.b32.xlu0 %v3446_v58, %s4637_s5 }
0x102d   :  { %v5610_v19 = vadd.f32 %v3863_v21, %v3862_v32  ;;  %v3423_v0 = vsel %vm794_vm4, %v3420_v55, %v3422_v12  ;;  %v3448_v56 = vsel %vm813_vm5, %v3445_v48, %v3447_v22 }
0x102e   :  { %3430 = vrot.lane.b32.xlu1 %v3423_v0, %s4649_s17 }
0x102f   :  { %v3424_v18 = vrot.slane %v5610_v19, 1  ;;  %v3449_v28 = vrot.slane %v5610_v19, 2 }
0x1031   :  { %v3425_v40 = vsel %vm794_vm4, %v3422_v12, %v3424_v18  ;;  %v3450_v36 = vsel %vm813_vm5, %v3447_v22, %v3449_v28 }
0x1032   :  { %3432 = vrot.lane.b32.xlu0 %v3425_v40, %s4649_s17 }
0x1034   :  { %v3865_v35 = vpop.f32.mrf.mxu0 }
0x1036   :  { %v3866_v23 = vpop.f32.mrf.mxu0 }
0x1037   :  { %v5617_v30 = vadd.f32 %v3866_v23, %v3865_v35 }
0x1038   :  { %v3868_v20 = vpop.f32.mrf.mxu0 }
0x1039   :  { %v3426_v39 = vrot.slane %v5617_v30, 1  ;;  %v3451_v60 = vrot.slane %v5617_v30, 2 }
0x103a   :  { %v3869_v52 = vpop.f32.mrf.mxu0 }
0x103b   :  { %v5620_v57 = vadd.f32 %v3869_v52, %v3868_v20  ;;  %v3427_v8 = vsel %vm794_vm4, %v3424_v18, %v3426_v39  ;;  %v3452_v54 = vsel %vm813_vm5, %v3449_v28, %v3451_v60 }
0x103c   :  { %v3871_v24 = vpop.f32.mrf.mxu0  ;;  %3434 = vrot.lane.b32.xlu1 %v3427_v8, %s4649_s17 }
0x103d   :  { %v3473_v59 = vrot.slane %v5620_v57, 1  ;;  %v3501_v14 = vrot.slane %v5620_v57, 2 }
0x103e   :  { %v3872_v61 = vpop.f32.mrf.mxu0 }
0x103f   :  { %v5627_v34 = vadd.f32 %v3872_v61, %v3871_v24  ;;  %v3502_v50 = vsel %vm813_vm5, %v3451_v60, %v3501_v14  ;;  %v3474_v46 = vsel %vm794_vm4, %v3426_v39, %v3473_v59 }
0x1040   :  { %v3874_v29 = vpop.f32.mrf.mxu0  ;;  %3509 = vrot.lane.b32.xlu1 %v3502_v50, %s4637_s5  ;;  %3481 = vrot.lane.b32.xlu0 %v3474_v46, %s4649_s17 }
0x1041   :  { %v3475_v5 = vrot.slane %v5627_v34, 1  ;;  %v3503_v10 = vrot.slane %v5627_v34, 2 }
0x1042   :  { %v3875_v2 = vpop.f32.mrf.mxu0 }
0x1043   :  { %v5635_v17 = vadd.f32 %v3875_v2, %v3874_v29  ;;  %v3476_v9 = vsel %vm794_vm4, %v3473_v59, %v3475_v5  ;;  %v3504_v7 = vsel %vm813_vm5, %v3501_v14, %v3503_v10 }
0x1044   :  { %v3877_v1 = vpop.f32.mrf.mxu0  ;;  %3483 = vrot.lane.b32.xlu1 %v3476_v9, %s4649_s17  ;;  %3511 = vrot.lane.b32.xlu0 %v3504_v7, %s4637_s5 }
0x1045   :  { %v3477_v49 = vrot.slane %v5635_v17, 1  ;;  %v3505_v43 = vrot.slane %v5635_v17, 2 }
0x1046   :  { %v3878_v41 = vpop.f32.mrf.mxu0 }
0x1047   :  { %v3879_v31 = vadd.f32 %v3878_v41, %v3877_v1  ;;  %v3506_v15 = vsel %vm813_vm5, %v3503_v10, %v3505_v43  ;;  %v3478_v38 = vsel %vm794_vm4, %v3475_v5, %v3477_v49 }
0x1048   :  { %v3880_v3 = vpop.f32.mrf.mxu0  ;;  %3513 = vrot.lane.b32.xlu1 %v3506_v15, %s4637_s5  ;;  %3485 = vrot.lane.b32.xlu0 %v3478_v38, %s4649_s17 }
0x1049   :  { %v3507_v6 = vrot.slane %v3879_v31, 2  ;;  %v3479_v11 = vrot.slane %v3879_v31, 1 }
0x104a   :  { %v3881_v47 = vpop.f32.mrf.mxu0 }
0x104b   :  { %v3480_v16 = vsel %vm794_vm4, %v3477_v49, %v3479_v11  ;;  %v3508_v37 = vsel %vm813_vm5, %v3505_v43, %v3507_v6 }
0x104c   :  { %3517 = vrot.lane.b32.xlu1 %v3507_v6, %s4637_s5  ;;  %3489 = vrot.lane.b32.xlu0 %v3479_v11, %s4649_s17 }
0x1050   :  { %3487 = vrot.lane.b32.xlu1 %v3480_v16, %s4649_s17  ;;  %3515 = vrot.lane.b32.xlu0 %v3508_v37, %s4637_s5 }
0x1054   :  { %3455 = vrot.lane.b32.xlu1 %v3448_v56, %s4637_s5  ;;  %3457 = vrot.lane.b32.xlu0 %v3450_v36, %s4637_s5 }
0x1058   :  { %3459 = vrot.lane.b32.xlu1 %v3452_v54, %s4637_s5  ;;  %s3575_s5 = sshll.u32 %s4651_s25, 4  ;;  %s3576_s5 = int_to_ptr.vmem [resolvable:$true] %s3575_s5 }
0x1059   :  { %s4585_s17 = scalar_lea.vmem %s3576_s5, 1024  ;;  %p4590_p11 = scmp.lt.s32.totalorder %s3576_s5, %s3576_s5 }
0x105a   :  { %p4586_p10 = scmp.ne.s32.totalorder %s3576_s5, %s4585_s17  ;;  %p4591_p12 = scmp.lt.s32.totalorder %s4585_s17, %s4585_s17 }
0x105c   :  { %p4592_p13 = por %p4591_p12, %p4590_p11 }
0x105e   :  { %p4593_p0 = pnand %p4592_p13, %p4586_p10 }
0x109a   :  { %v3429_v63 = vpop.permute.xlu0 %3428 }
0x109b   :  { %v3440_v53 = vadd.f32 %v5593_v44, %v3429_v63 }
0x109e   :  { %v3454_v4 = vpop.permute.xlu0 %3453 }
0x109f   :  { %v3465_v51 = vadd.f32 %v3454_v4, %v3440_v53 }
0x10a0   :  { %v3431_v55 = vpop.permute.xlu1 %3430 }
0x10a1   :  { %v3554_v42 = vadd.f32 %v3786_v26, %v3465_v51 }
0x10a3   :  { %3562 = vst.msk [vmem:[#allocation28] sm:$0xff] %vm312_vm1, %v3554_v42 }
0x10a4   :  { %v3433_v45 = vpop.permute.xlu0 %3432 }
0x10a5   :  { %v3442_v29 = vadd.f32 %v5602_v25, %v3433_v45 }
0x10ae   :  { %v3435_v33 = vpop.permute.xlu1 %3434 }
0x10af   :  { %v3443_v43 = vadd.f32 %v5610_v19, %v3435_v33 }
0x10b2   :  { %v3510_v48 = vpop.permute.xlu1 %3509  ;;  %v3482_v27 = vpop.permute.xlu0 %3481 }
0x10b3   :  { %v3496_v13 = vadd.f32 %v5617_v30, %v3482_v27 }
0x10b5   :  { %v3524_v58 = vadd.f32 %v3510_v48, %v3496_v13 }
0x10b6   :  { %v3484_v32 = vpop.permute.xlu1 %3483  ;;  %v3512_v12 = vpop.permute.xlu0 %3511 }
0x10b7   :  { %v3497_v21 = vadd.f32 %v5620_v57, %v3484_v32  ;;  %v3534_v40 = vrot.slane %v3524_v58, 2 }
0x10b9   :  { %v3525_v0 = vadd.f32 %v3512_v12, %v3497_v21 }
0x10ba   :  { %v3514_v44 = vpop.permute.xlu1 %3513  ;;  %v3486_v18 = vpop.permute.xlu0 %3485 }
0x10bb   :  { %v3535_v35 = vrot.slane %v3525_v0, 2  ;;  %v3498_v23 = vadd.f32 %v5627_v34, %v3486_v18  ;;  %v3441_v34 = vadd.f32 %v5595_v62, %v3431_v55 }
0x10bd   :  { %v3536_v20 = vsel %vm813_vm5, %v3534_v40, %v3535_v35  ;;  %v3526_v39 = vadd.f32 %v3514_v44, %v3498_v23 }
0x10be   :  { %v3558_v52 = vadd.f32 %v3786_v26, %v3536_v20  ;;  %v3518_v8 = vpop.permute.xlu1 %3517  ;;  %v3490_v24 = vpop.permute.xlu0 %3489 }
0x10bf   :  { %v3537_v59 = vrot.slane %v3526_v39, 2  ;;  %v3500_v30 = vadd.f32 %v3879_v31, %v3490_v24 }
0x10c0   :  { %3566 = vst.msk [vmem:[#allocation28 + $0x20] sm:$0xff] %vm312_vm1, %v3558_v52 }
0x10c1   :  { %v3538_v60 = vsel %vm813_vm5, %v3535_v35, %v3537_v59  ;;  %v3528_v50 = vadd.f32 %v3518_v8, %v3500_v30 }
0x10c2   :  { %v3559_v57 = vadd.f32 %v3786_v26, %v3538_v60  ;;  %v3488_v14 = vpop.permute.xlu1 %3487  ;;  %v3516_v61 = vpop.permute.xlu0 %3515 }
0x10c3   :  { %v3499_v46 = vadd.f32 %v5635_v17, %v3488_v14  ;;  %v3541_v9 = vrot.slane %v3528_v50, 2 }
0x10c4   :  { %3567 = vst.msk [vmem:[#allocation28 + $0x28] sm:$0xff] %vm312_vm1, %v3559_v57 }
0x10c5   :  { %v3527_v5 = vadd.f32 %v3516_v61, %v3499_v46 }
0x10c6   :  { %v3456_v10 = vpop.permute.xlu1 %3455  ;;  %v3458_v2 = vpop.permute.xlu0 %3457 }
0x10c7   :  { %v3539_v7 = vrot.slane %v3527_v5, 2  ;;  %v3466_v1 = vadd.f32 %v3456_v10, %v3441_v34  ;;  %v3467_v49 = vadd.f32 %v3458_v2, %v3442_v29 }
0x10c9   :  { %v3540_v41 = vsel %vm813_vm5, %v3537_v59, %v3539_v7  ;;  %v3542_v31 = vsel %vm813_vm5, %v3539_v7, %v3541_v9  ;;  %v3555_v17 = vadd.f32 %v3786_v26, %v3466_v1  ;;  %v3556_v15 = vadd.f32 %v3786_v26, %v3467_v49 }
0x10ca   :  { %v3560_v38 = vadd.f32 %v3786_v26, %v3540_v41  ;;  %v3561_v3 = vadd.f32 %v3786_v26, %v3542_v31  ;;  %v3460_v62 = vpop.permute.xlu1 %3459 }
0x10cb   :  { %3563 = vst.msk [vmem:[#allocation28 + $0x8] sm:$0xff] %vm312_vm1, %v3555_v17  ;;  %3564 = vst.msk [vmem:[#allocation28 + $0x10] sm:$0xff] %vm312_vm1, %v3556_v15  ;;  %v3468_v25 = vadd.f32 %v3460_v62, %v3443_v43 }
0x10cc   :  { %3568 = vst.msk [vmem:[#allocation28 + $0x30] sm:$0xff] %vm312_vm1, %v3560_v38  ;;  %3569 = vst.msk [vmem:[#allocation28 + $0x38] sm:$0xff] %vm312_vm1, %v3561_v3 }
0x10cd   :  { %v3557_v19 = vadd.f32 %v3786_v26, %v3468_v25 }
0x10cf   :  { %3565 = vst.msk [vmem:[#allocation28 + $0x18] sm:$0xff] %vm312_vm1, %v3557_v19 }
0x10d0   :  { %4596 = shalt.err (!%p4593_p0)
}
0x10d1   :  { %3581 = dma.vmem_to_hbm [thread:$0]  %s3576_s5, 1024, %s5716_s27, [#allocation4], %s4631_s9, %s4631_s9, %s4632_s29  }
0x10d2   :  { %4623 = dma.done.wait [#allocation4], 1024  }
0x10d3   :  { %4624 = vsyncadd [#allocation4], 4294966272 }
0x10d4   :  { %3585 = vsyncpa [#allocation3], 1 }
0x10d5   :  { %3586 = vsyncpa [#allocation6], 1 }
0x10d6   :  { %3587 = vsyncpa [#allocation9], 1 }
0x10d7   :  { %3588 = vsyncpa [#allocation12], 1 }
0x10d8   :  { %3589 = vsyncpa [#allocation15], 1 }
0x10d9   :  { %3590 = vsyncpa [#allocation18], 1 }
0x10da   :  { %3591 = vsyncpa [#allocation21], 1 }
0x10db   :  { %3592 = vsyncpa [#allocation24], 1 }
0x10dc   :  { %3593 = vsyncpa [#allocation27], 1 }
0x10dd   :  { %3594 = vsyncpa [#allocation4], 1 }

</bundles_post_ra>
